<compile_context>
chip_gen: v7x
topology: tpu7x:2x2x1
jax: 0.10.0
libtpu: 0.0.40
codegen_flags: <defaults>
</compile_context>

<pallas_src>
import functools

import jax
import jax.numpy as jnp
from jax.experimental import pallas as pl
from jax.experimental.pallas import tpu as pltpu

OPAD = 128  # lane-dense padded class dimension (output_dim <= 128)


def _round_up(x, m):
    return (x + m - 1) // m * m


# ---------------------------------------------------------------------------
# Kernel 1: feature projection  xw = x @ W1      (re-associated layer 1)
# grid = (row tiles of N, reduction tiles of F)
# ---------------------------------------------------------------------------
def _proj_kernel(x_ref, w1_ref, xw_ref, acc_ref):
    @pl.when(pl.program_id(1) == 0)
    def _():
        acc_ref[...] = jnp.zeros_like(acc_ref)

    acc_ref[...] += jnp.dot(x_ref[...], w1_ref[...],
                            preferred_element_type=jnp.float32)

    @pl.when(pl.program_id(1) == pl.num_programs(1) - 1)
    def _():
        xw_ref[...] = acc_ref[...].astype(xw_ref.dtype)


# ---------------------------------------------------------------------------
# Kernel 2: h = relu(adj @ xw + b1);  hw = h @ W2_pad
# grid = (row tiles of N, reduction tiles of N)
# ---------------------------------------------------------------------------
def _agg1_kernel(adj_ref, xw_ref, b1_ref, w2_ref, hw_ref, acc_ref):
    k = pl.program_id(1)

    @pl.when(k == 0)
    def _():
        acc_ref[...] = jnp.zeros_like(acc_ref)

    acc_ref[...] += jnp.dot(adj_ref[...], xw_ref[...],
                            preferred_element_type=jnp.float32)

    @pl.when(k == pl.num_programs(1) - 1)
    def _():
        h = jnp.maximum(acc_ref[...] + b1_ref[...], 0.0)
        hw_ref[...] = jnp.dot(h.astype(jnp.bfloat16), w2_ref[...],
                              preferred_element_type=jnp.float32
                              ).astype(hw_ref.dtype)


# ---------------------------------------------------------------------------
# Kernel 3: z = adj @ hw + b2;  out = log_softmax(z) over the first O lanes
# grid = (row tiles of N, reduction tiles of N)
# ---------------------------------------------------------------------------
def _agg2_kernel(adj_ref, hw_ref, b2_ref, out_ref, acc_ref, *, num_classes):
    k = pl.program_id(1)

    @pl.when(k == 0)
    def _():
        acc_ref[...] = jnp.zeros_like(acc_ref)

    acc_ref[...] += jnp.dot(adj_ref[...], hw_ref[...],
                            preferred_element_type=jnp.float32)

    @pl.when(k == pl.num_programs(1) - 1)
    def _():
        z = acc_ref[...] + b2_ref[...]
        col = jax.lax.broadcasted_iota(jnp.int32, z.shape, 1)
        valid = col < num_classes
        zm = jnp.where(valid, z, -1e30)
        m = jnp.max(zm, axis=-1, keepdims=True)
        s = z - m
        e = jnp.where(valid, jnp.exp(s), 0.0)
        lse = jnp.log(jnp.sum(e, axis=-1, keepdims=True))
        out_ref[...] = jnp.where(valid, s - lse, 0.0)


# ---------------------------------------------------------------------------
# Wrapper
# ---------------------------------------------------------------------------
def gcn_forward(x, adj, w1, b1, w2, b2, *, tn=256, tf=256,
                vmem_limit_bytes=32 * 1024 * 1024):
    N, F = x.shape
    H = w1.shape[1]
    O = w2.shape[1]
    assert adj.shape == (N, N)
    assert O <= OPAD, "output_dim must fit within one 128-lane slab"

    f32, bf16 = jnp.float32, jnp.bfloat16

    # Effective tile / padded sizes (tiles stay (8,128)-aligned; tiny shapes fall
    # back to full-array blocks).
    tn = min(tn, _round_up(N, 8))
    tf = min(tf, _round_up(F, 128))
    Np = _round_up(N, tn)
    Fp = _round_up(F, tf)
    Hp = _round_up(H, 8)

    # Zero-pad + cast MXU operands to bf16 (f32 accumulation inside kernels).
    adj_p = jnp.zeros((Np, Np), f32).at[:N, :N].set(adj).astype(bf16)
    x_p = jnp.zeros((Np, Fp), f32).at[:N, :F].set(x).astype(bf16)
    w1_p = jnp.zeros((Fp, Hp), f32).at[:F, :H].set(w1).astype(bf16)
    b1_p = jnp.zeros((1, Hp), f32).at[0, :H].set(b1)
    w2_p = jnp.zeros((Hp, OPAD), f32).at[:H, :O].set(w2).astype(bf16)
    b2_p = jnp.zeros((1, OPAD), f32).at[0, :O].set(b2)

    cparams = pltpu.CompilerParams(
        dimension_semantics=("parallel", "arbitrary"),
        vmem_limit_bytes=vmem_limit_bytes,
    )

    # --- K1: xw = x @ W1 ---------------------------------------------------
    xw = pl.pallas_call(
        _proj_kernel,
        out_shape=jax.ShapeDtypeStruct((Np, Hp), bf16),
        grid_spec=pltpu.PrefetchScalarGridSpec(
            num_scalar_prefetch=0,
            grid=(Np // tn, Fp // tf),
            in_specs=[
                pl.BlockSpec((tn, tf), lambda i, k: (i, k)),
                pl.BlockSpec((tf, Hp), lambda i, k: (k, 0)),
            ],
            out_specs=pl.BlockSpec((tn, Hp), lambda i, k: (i, 0)),
            scratch_shapes=[pltpu.VMEM((tn, Hp), jnp.float32)],
        ),
        compiler_params=cparams,
        cost_estimate=pl.CostEstimate(
            flops=2 * Np * Fp * Hp,
            transcendentals=0,
            bytes_accessed=2 * (Np * Fp + Fp * Hp + Np * Hp)),
    )(x_p, w1_p)

    # --- K2: hw = relu(adj @ xw + b1) @ W2_pad ------------------------------
    hw = pl.pallas_call(
        _agg1_kernel,
        out_shape=jax.ShapeDtypeStruct((Np, OPAD), bf16),
        grid_spec=pltpu.PrefetchScalarGridSpec(
            num_scalar_prefetch=0,
            grid=(Np // tn, Np // tn),
            in_specs=[
                pl.BlockSpec((tn, tn), lambda i, k: (i, k)),     # adj tile
                pl.BlockSpec((tn, Hp), lambda i, k: (k, 0)),     # xw rows (reduction)
                pl.BlockSpec((1, Hp), lambda i, k: (0, 0)),      # b1
                pl.BlockSpec((Hp, OPAD), lambda i, k: (0, 0)),   # W2 (lane-padded)
            ],
            out_specs=pl.BlockSpec((tn, OPAD), lambda i, k: (i, 0)),
            scratch_shapes=[pltpu.VMEM((tn, Hp), jnp.float32)],
        ),
        compiler_params=cparams,
        cost_estimate=pl.CostEstimate(
            flops=2 * Np * Np * Hp + 2 * Np * Hp * OPAD,
            transcendentals=0,
            bytes_accessed=2 * (Np * Np + Np * Hp + Hp * OPAD + Np * OPAD)),
    )(adj_p, xw, b1_p, w2_p)

    # --- K3: out = log_softmax(adj @ hw + b2) -------------------------------
    out_pad = pl.pallas_call(
        functools.partial(_agg2_kernel, num_classes=O),
        out_shape=jax.ShapeDtypeStruct((Np, OPAD), jnp.float32),
        grid_spec=pltpu.PrefetchScalarGridSpec(
            num_scalar_prefetch=0,
            grid=(Np // tn, Np // tn),
            in_specs=[
                pl.BlockSpec((tn, tn), lambda i, k: (i, k)),     # adj tile
                pl.BlockSpec((tn, OPAD), lambda i, k: (k, 0)),   # hw rows (reduction)
                pl.BlockSpec((1, OPAD), lambda i, k: (0, 0)),    # b2
            ],
            out_specs=pl.BlockSpec((tn, OPAD), lambda i, k: (i, 0)),
            scratch_shapes=[pltpu.VMEM((tn, OPAD), jnp.float32)],
        ),
        compiler_params=cparams,
        cost_estimate=pl.CostEstimate(
            flops=2 * Np * Np * OPAD,
            transcendentals=Np * OPAD,
            bytes_accessed=2 * Np * Np + 2 * Np * OPAD + 4 * Np * OPAD),
    )(adj_p, hw, b2_p)

    return out_pad[:N, :O]


# ---------------------------------------------------------------------------
# References
# ---------------------------------------------------------------------------
def gcn_reference(x, adj, w1, b1, w2, b2):
    h = jnp.maximum(adj @ x @ w1 + b1, 0.0)
    z = adj @ h @ w2 + b2
    return jax.nn.log_softmax(z, axis=1)


def gcn_reference_matched(x, adj, w1, b1, w2, b2):
    # Same dtype flow as the kernels (bf16 MXU inputs, f32 accumulation).
    bf, f32 = jnp.bfloat16, jnp.float32
    adj_b = adj.astype(bf)
    xw = jnp.dot(x.astype(bf), w1.astype(bf), preferred_element_type=f32).astype(bf)
    h = jnp.maximum(jnp.dot(adj_b, xw, preferred_element_type=f32) + b1, 0.0)
    hw = jnp.dot(h.astype(bf), w2.astype(bf), preferred_element_type=f32).astype(bf)
    z = jnp.dot(adj_b, hw, preferred_element_type=f32) + b2
    return jax.nn.log_softmax(z, axis=1)


if __name__ == "__main__":
    # Small-but-tileable shapes consistent with the module
    # (module spec: input_dim=3072, hidden_dim=64, output_dim=10).
    N, input_dim, hidden_dim, output_dim = 512, 256, 64, 10

    key = jax.random.PRNGKey(0)
    k_x, k_adj, k_w1, k_b1, k_w2, k_b2 = jax.random.split(key, 6)

    x = jax.random.normal(k_x, (N, input_dim), dtype=jnp.float32)

    # Sparse-ish symmetric adjacency with self loops, row-normalized.
    u = jax.random.uniform(k_adj, (N, N), dtype=jnp.float32)
    a = (u < (8.0 / N)).astype(jnp.float32)
    a = jnp.maximum(a, a.T) + jnp.eye(N, dtype=jnp.float32)
    adj = a / jnp.sum(a, axis=1, keepdims=True)

    # Deterministic parameter init (module __init__ only defines shapes).
    w1 = jax.random.normal(k_w1, (input_dim, hidden_dim), jnp.float32) / jnp.sqrt(input_dim)
    b1 = jax.random.normal(k_b1, (hidden_dim,), jnp.float32) * 0.1
    w2 = jax.random.normal(k_w2, (hidden_dim, output_dim), jnp.float32) / jnp.sqrt(hidden_dim)
    b2 = jax.random.normal(k_b2, (output_dim,), jnp.float32) * 0.1

    gcn = jax.jit(gcn_forward)
    out = gcn(x, adj, w1, b1, w2, b2)
    out = jax.block_until_ready(out)
    assert out.shape == (N, output_dim)

    # Tight check against a reference with matched bf16/f32 dtype flow.
    ref_matched = gcn_reference_matched(x, adj, w1, b1, w2, b2)
    assert jnp.allclose(out, ref_matched, atol=5e-3, rtol=5e-3), \
        "mismatch vs bf16-matched reference"

    # Loose check against the pure-f32 module semantics.
    ref_f32 = gcn_reference(x, adj, w1, b1, w2, b2)
    assert jnp.allclose(out, ref_f32, atol=5e-2, rtol=5e-2), \
        "mismatch vs f32 reference"

    print("KERNEL_OK")
</pallas_src>

<mosaic_0001>
module attributes {stable_mosaic.version = 11 : i64} {
  func.func @_proj_kernel(%arg0: i32, %arg1: i32, %arg2: memref<256x256xbf16, #tpu.memory_space<vmem>>, %arg3: memref<256x64xbf16, #tpu.memory_space<vmem>>, %arg4: memref<256x64xbf16, #tpu.memory_space<vmem>>, %arg5: memref<256x64xf32, #tpu.memory_space<vmem>>) attributes {dimension_semantics = [#tpu.dimension_semantics<parallel>, #tpu.dimension_semantics<arbitrary>], iteration_bounds = array<i64: 2, 1>, scalar_prefetch = 0 : i64, scratch_operands = 1 : i64, tpu.core_type = #tpu.core_type<tc>, window_params = [{transform_indices = @transform_0, window_bounds = array<i64: 256, 256>}, {transform_indices = @transform_1, window_bounds = array<i64: 256, 64>}, {transform_indices = @transform_2, window_bounds = array<i64: 256, 64>}]} {
    %c0_i32 = arith.constant 0 : i32
    %0 = arith.cmpi eq, %arg1, %c0_i32 : i32
    %1 = arith.extui %0 : i1 to i32
    %c0_i32_0 = arith.constant 0 : i32
    %2 = arith.cmpi ne, %1, %c0_i32_0 : i32
    scf.if %2 {
      %cst_10 = arith.constant 0.000000e+00 : f32
      %12 = vector.broadcast %cst_10 : f32 to vector<256x64xf32>
      %c0_11 = arith.constant 0 : index
      %c0_12 = arith.constant 0 : index
      %13 = vector.load %arg5[%c0_11, %c0_12] : memref<256x64xf32, #tpu.memory_space<vmem>>, vector<256x64xf32>
      tpu.vector_store %arg5[%c0_11, %c0_12], %12 {strides = array<i32>} : memref<256x64xf32, #tpu.memory_space<vmem>>, vector<256x64xf32>,
    } else {
    }
    %c0 = arith.constant 0 : index
    %c0_1 = arith.constant 0 : index
    %3 = vector.load %arg5[%c0, %c0_1] : memref<256x64xf32, #tpu.memory_space<vmem>>, vector<256x64xf32>
    %c0_2 = arith.constant 0 : index
    %c0_3 = arith.constant 0 : index
    %4 = vector.load %arg2[%c0_2, %c0_3] : memref<256x256xbf16, #tpu.memory_space<vmem>>, vector<256x256xbf16>
    %c0_4 = arith.constant 0 : index
    %c0_5 = arith.constant 0 : index
    %5 = vector.load %arg3[%c0_4, %c0_5] : memref<256x64xbf16, #tpu.memory_space<vmem>>, vector<256x64xbf16>
    %cst = arith.constant dense<0.000000e+00> : vector<256x64xf32>
    %6 = tpu.matmul %4, %5, %cst {dimension_numbers = #tpu.dot_dimension_numbers<[1], [0], [0], [1], [0, 0, 1, 1], [], []>} : vector<256x256xbf16>, vector<256x64xbf16>, vector<256x64xf32> -> vector<256x64xf32>
    %7 = arith.addf %3, %6 : vector<256x64xf32>
    %c0_6 = arith.constant 0 : index
    %c0_7 = arith.constant 0 : index
    %8 = vector.load %arg5[%c0_6, %c0_7] : memref<256x64xf32, #tpu.memory_space<vmem>>, vector<256x64xf32>
    tpu.vector_store %arg5[%c0_6, %c0_7], %7 {strides = array<i32>} : memref<256x64xf32, #tpu.memory_space<vmem>>, vector<256x64xf32>,
    %c0_i32_8 = arith.constant 0 : i32
    %9 = arith.cmpi eq, %arg1, %c0_i32_8 : i32
    %10 = arith.extui %9 : i1 to i32
    %c0_i32_9 = arith.constant 0 : i32
    %11 = arith.cmpi ne, %10, %c0_i32_9 : i32
    scf.if %11 {
      %c0_10 = arith.constant 0 : index
      %c0_11 = arith.constant 0 : index
      %12 = vector.load %arg5[%c0_10, %c0_11] : memref<256x64xf32, #tpu.memory_space<vmem>>, vector<256x64xf32>
      %13 = arith.truncf %12 : vector<256x64xf32> to vector<256x64xbf16>
      %c0_12 = arith.constant 0 : index
      %c0_13 = arith.constant 0 : index
      %14 = vector.load %arg4[%c0_12, %c0_13] : memref<256x64xbf16, #tpu.memory_space<vmem>>, vector<256x64xbf16>
      tpu.vector_store %arg4[%c0_12, %c0_13], %13 {strides = array<i32>} : memref<256x64xbf16, #tpu.memory_space<vmem>>, vector<256x64xbf16>,
    } else {
    }
    return
  }
  func.func @transform_0(%arg0: i32, %arg1: i32) -> (i32, i32) {
    %c0_i32 = arith.constant 0 : i32
    return %arg0, %arg1 : i32, i32
  }
  func.func @transform_1(%arg0: i32, %arg1: i32) -> (i32, i32) {
    %c0_i32 = arith.constant 0 : i32
    %c0_i32_0 = arith.constant 0 : i32
    return %arg1, %c0_i32 : i32, i32
  }
  func.func @transform_2(%arg0: i32, %arg1: i32) -> (i32, i32) {
    %c0_i32 = arith.constant 0 : i32
    %c0_i32_0 = arith.constant 0 : i32
    return %arg0, %c0_i32 : i32, i32
  }
}

module attributes {stable_mosaic.version = 11 : i64} {
  func.func @_agg1_kernel(%arg0: i32, %arg1: i32, %arg2: memref<256x256xbf16, #tpu.memory_space<vmem>>, %arg3: memref<256x64xbf16, #tpu.memory_space<vmem>>, %arg4: memref<1x64xf32, #tpu.memory_space<vmem>>, %arg5: memref<64x128xbf16, #tpu.memory_space<vmem>>, %arg6: memref<256x128xbf16, #tpu.memory_space<vmem>>, %arg7: memref<256x64xf32, #tpu.memory_space<vmem>>) attributes {dimension_semantics = [#tpu.dimension_semantics<parallel>, #tpu.dimension_semantics<arbitrary>], iteration_bounds = array<i64: 2, 2>, scalar_prefetch = 0 : i64, scratch_operands = 1 : i64, tpu.core_type = #tpu.core_type<tc>, window_params = [{transform_indices = @transform_0, window_bounds = array<i64: 256, 256>}, {transform_indices = @transform_1, window_bounds = array<i64: 256, 64>}, {pipeline_mode = #tpu.pipeline_mode<synchronous>, transform_indices = @transform_2, window_bounds = array<i64: 1, 64>}, {pipeline_mode = #tpu.pipeline_mode<synchronous>, transform_indices = @transform_3, window_bounds = array<i64: 64, 128>}, {transform_indices = @transform_4, window_bounds = array<i64: 256, 128>}]} {
    %c0_i32 = arith.constant 0 : i32
    %0 = arith.cmpi eq, %arg1, %c0_i32 : i32
    %1 = arith.extui %0 : i1 to i32
    %c0_i32_0 = arith.constant 0 : i32
    %2 = arith.cmpi ne, %1, %c0_i32_0 : i32
    scf.if %2 {
      %cst_9 = arith.constant 0.000000e+00 : f32
      %12 = vector.broadcast %cst_9 : f32 to vector<256x64xf32>
      %c0_10 = arith.constant 0 : index
      %c0_11 = arith.constant 0 : index
      %13 = vector.load %arg7[%c0_10, %c0_11] : memref<256x64xf32, #tpu.memory_space<vmem>>, vector<256x64xf32>
      tpu.vector_store %arg7[%c0_10, %c0_11], %12 {strides = array<i32>} : memref<256x64xf32, #tpu.memory_space<vmem>>, vector<256x64xf32>,
    } else {
    }
    %c0 = arith.constant 0 : index
    %c0_1 = arith.constant 0 : index
    %3 = vector.load %arg7[%c0, %c0_1] : memref<256x64xf32, #tpu.memory_space<vmem>>, vector<256x64xf32>
    %c0_2 = arith.constant 0 : index
    %c0_3 = arith.constant 0 : index
    %4 = vector.load %arg2[%c0_2, %c0_3] : memref<256x256xbf16, #tpu.memory_space<vmem>>, vector<256x256xbf16>
    %c0_4 = arith.constant 0 : index
    %c0_5 = arith.constant 0 : index
    %5 = vector.load %arg3[%c0_4, %c0_5] : memref<256x64xbf16, #tpu.memory_space<vmem>>, vector<256x64xbf16>
    %cst = arith.constant dense<0.000000e+00> : vector<256x64xf32>
    %6 = tpu.matmul %4, %5, %cst {dimension_numbers = #tpu.dot_dimension_numbers<[1], [0], [0], [1], [0, 0, 1, 1], [], []>} : vector<256x256xbf16>, vector<256x64xbf16>, vector<256x64xf32> -> vector<256x64xf32>
    %7 = arith.addf %3, %6 : vector<256x64xf32>
    %c0_6 = arith.constant 0 : index
    %c0_7 = arith.constant 0 : index
    %8 = vector.load %arg7[%c0_6, %c0_7] : memref<256x64xf32, #tpu.memory_space<vmem>>, vector<256x64xf32>
    tpu.vector_store %arg7[%c0_6, %c0_7], %7 {strides = array<i32>} : memref<256x64xf32, #tpu.memory_space<vmem>>, vector<256x64xf32>,
    %c1_i32 = arith.constant 1 : i32
    %9 = arith.cmpi eq, %arg1, %c1_i32 : i32
    %10 = arith.extui %9 : i1 to i32
    %c0_i32_8 = arith.constant 0 : i32
    %11 = arith.cmpi ne, %10, %c0_i32_8 : i32
    scf.if %11 {
      %c0_9 = arith.constant 0 : index
      %c0_10 = arith.constant 0 : index
      %12 = vector.load %arg7[%c0_9, %c0_10] : memref<256x64xf32, #tpu.memory_space<vmem>>, vector<256x64xf32>
      %c0_11 = arith.constant 0 : index
      %c0_12 = arith.constant 0 : index
      %13 = vector.load %arg4[%c0_11, %c0_12] : memref<1x64xf32, #tpu.memory_space<vmem>>, vector<1x64xf32>
      %14 = vector.broadcast %13 : vector<1x64xf32> to vector<256x64xf32>
      %15 = arith.addf %12, %14 : vector<256x64xf32>
      %cst_13 = arith.constant 0.000000e+00 : f32
      %16 = vector.broadcast %cst_13 : f32 to vector<256x64xf32>
      %17 = arith.maximumf %15, %16 : vector<256x64xf32>
      %18 = arith.truncf %17 : vector<256x64xf32> to vector<256x64xbf16>
      %c0_14 = arith.constant 0 : index
      %c0_15 = arith.constant 0 : index
      %19 = vector.load %arg5[%c0_14, %c0_15] : memref<64x128xbf16, #tpu.memory_space<vmem>>, vector<64x128xbf16>
      %cst_16 = arith.constant dense<0.000000e+00> : vector<256x128xf32>
      %20 = tpu.matmul %18, %19, %cst_16 {dimension_numbers = #tpu.dot_dimension_numbers<[1], [0], [0], [1], [0, 0, 1, 1], [], []>} : vector<256x64xbf16>, vector<64x128xbf16>, vector<256x128xf32> -> vector<256x128xf32>
      %21 = arith.truncf %20 : vector<256x128xf32> to vector<256x128xbf16>
      %c0_17 = arith.constant 0 : index
      %c0_18 = arith.constant 0 : index
      %22 = vector.load %arg6[%c0_17, %c0_18] : memref<256x128xbf16, #tpu.memory_space<vmem>>, vector<256x128xbf16>
      tpu.vector_store %arg6[%c0_17, %c0_18], %21 {strides = array<i32>} : memref<256x128xbf16, #tpu.memory_space<vmem>>, vector<256x128xbf16>,
    } else {
    }
    return
  }
  func.func @transform_0(%arg0: i32, %arg1: i32) -> (i32, i32) {
    %c0_i32 = arith.constant 0 : i32
    return %arg0, %arg1 : i32, i32
  }
  func.func @transform_1(%arg0: i32, %arg1: i32) -> (i32, i32) {
    %c0_i32 = arith.constant 0 : i32
    %c0_i32_0 = arith.constant 0 : i32
    return %arg1, %c0_i32 : i32, i32
  }
  func.func @transform_2(%arg0: i32, %arg1: i32) -> (i32, i32) {
    %c0_i32 = arith.constant 0 : i32
    %c0_i32_0 = arith.constant 0 : i32
    %c0_i32_1 = arith.constant 0 : i32
    return %c0_i32, %c0_i32_0 : i32, i32
  }
  func.func @transform_3(%arg0: i32, %arg1: i32) -> (i32, i32) {
    %c0_i32 = arith.constant 0 : i32
    %c0_i32_0 = arith.constant 0 : i32
    %c0_i32_1 = arith.constant 0 : i32
    return %c0_i32, %c0_i32_0 : i32, i32
  }
  func.func @transform_4(%arg0: i32, %arg1: i32) -> (i32, i32) {
    %c0_i32 = arith.constant 0 : i32
    %c0_i32_0 = arith.constant 0 : i32
    return %arg0, %c0_i32 : i32, i32
  }
}

module attributes {stable_mosaic.version = 11 : i64} {
  func.func @_agg2_kernel(%arg0: i32, %arg1: i32, %arg2: memref<256x256xbf16, #tpu.memory_space<vmem>>, %arg3: memref<256x128xbf16, #tpu.memory_space<vmem>>, %arg4: memref<1x128xf32, #tpu.memory_space<vmem>>, %arg5: memref<256x128xf32, #tpu.memory_space<vmem>>, %arg6: memref<256x128xf32, #tpu.memory_space<vmem>>) attributes {dimension_semantics = [#tpu.dimension_semantics<parallel>, #tpu.dimension_semantics<arbitrary>], iteration_bounds = array<i64: 2, 2>, scalar_prefetch = 0 : i64, scratch_operands = 1 : i64, tpu.core_type = #tpu.core_type<tc>, window_params = [{transform_indices = @transform_0, window_bounds = array<i64: 256, 256>}, {transform_indices = @transform_1, window_bounds = array<i64: 256, 128>}, {pipeline_mode = #tpu.pipeline_mode<synchronous>, transform_indices = @transform_2, window_bounds = array<i64: 1, 128>}, {transform_indices = @transform_3, window_bounds = array<i64: 256, 128>}]} {
    %c0_i32 = arith.constant 0 : i32
    %0 = arith.cmpi eq, %arg1, %c0_i32 : i32
    %1 = arith.extui %0 : i1 to i32
    %c0_i32_0 = arith.constant 0 : i32
    %2 = arith.cmpi ne, %1, %c0_i32_0 : i32
    scf.if %2 {
      %cst_9 = arith.constant 0.000000e+00 : f32
      %12 = vector.broadcast %cst_9 : f32 to vector<256x128xf32>
      %c0_10 = arith.constant 0 : index
      %c0_11 = arith.constant 0 : index
      %13 = vector.load %arg6[%c0_10, %c0_11] : memref<256x128xf32, #tpu.memory_space<vmem>>, vector<256x128xf32>
      tpu.vector_store %arg6[%c0_10, %c0_11], %12 {strides = array<i32>} : memref<256x128xf32, #tpu.memory_space<vmem>>, vector<256x128xf32>,
    } else {
    }
    %c0 = arith.constant 0 : index
    %c0_1 = arith.constant 0 : index
    %3 = vector.load %arg6[%c0, %c0_1] : memref<256x128xf32, #tpu.memory_space<vmem>>, vector<256x128xf32>
    %c0_2 = arith.constant 0 : index
    %c0_3 = arith.constant 0 : index
    %4 = vector.load %arg2[%c0_2, %c0_3] : memref<256x256xbf16, #tpu.memory_space<vmem>>, vector<256x256xbf16>
    %c0_4 = arith.constant 0 : index
    %c0_5 = arith.constant 0 : index
    %5 = vector.load %arg3[%c0_4, %c0_5] : memref<256x128xbf16, #tpu.memory_space<vmem>>, vector<256x128xbf16>
    %cst = arith.constant dense<0.000000e+00> : vector<256x128xf32>
    %6 = tpu.matmul %4, %5, %cst {dimension_numbers = #tpu.dot_dimension_numbers<[1], [0], [0], [1], [0, 0, 1, 1], [], []>} : vector<256x256xbf16>, vector<256x128xbf16>, vector<256x128xf32> -> vector<256x128xf32>
    %7 = arith.addf %3, %6 : vector<256x128xf32>
    %c0_6 = arith.constant 0 : index
    %c0_7 = arith.constant 0 : index
    %8 = vector.load %arg6[%c0_6, %c0_7] : memref<256x128xf32, #tpu.memory_space<vmem>>, vector<256x128xf32>
    tpu.vector_store %arg6[%c0_6, %c0_7], %7 {strides = array<i32>} : memref<256x128xf32, #tpu.memory_space<vmem>>, vector<256x128xf32>,
    %c1_i32 = arith.constant 1 : i32
    %9 = arith.cmpi eq, %arg1, %c1_i32 : i32
    %10 = arith.extui %9 : i1 to i32
    %c0_i32_8 = arith.constant 0 : i32
    %11 = arith.cmpi ne, %10, %c0_i32_8 : i32
    scf.if %11 {
      %c0_9 = arith.constant 0 : index
      %c0_10 = arith.constant 0 : index
      %12 = vector.load %arg6[%c0_9, %c0_10] : memref<256x128xf32, #tpu.memory_space<vmem>>, vector<256x128xf32>
      %c0_11 = arith.constant 0 : index
      %c0_12 = arith.constant 0 : index
      %13 = vector.load %arg4[%c0_11, %c0_12] : memref<1x128xf32, #tpu.memory_space<vmem>>, vector<1x128xf32>
      %14 = vector.broadcast %13 : vector<1x128xf32> to vector<256x128xf32>
      %15 = arith.addf %12, %14 : vector<256x128xf32>
      %16 = tpu.iota {dimensions = array<i32: 1>} : vector<256x128xi32>
      %c10_i32 = arith.constant 10 : i32
      %17 = vector.broadcast %c10_i32 : i32 to vector<256x128xi32>
      %18 = arith.cmpi slt, %16, %17 : vector<256x128xi32>
      %cst_13 = arith.constant -1.000000e+30 : f32
      %19 = vector.broadcast %cst_13 : f32 to vector<256x128xf32>
      %20 = arith.select %18, %15, %19 : vector<256x128xi1>, vector<256x128xf32>
      %cst_14 = arith.constant dense<0xFF800000> : vector<256xf32>
      %21 = vector.multi_reduction <maximumf>, %20, %cst_14 [1] : vector<256x128xf32> to vector<256xf32>
      %22 = vector.shape_cast %21 : vector<256xf32> to vector<256x1xf32>
      %23 = vector.broadcast %22 : vector<256x1xf32> to vector<256x128xf32>
      %24 = arith.subf %15, %23 : vector<256x128xf32>
      %25 = math.exp %24 : vector<256x128xf32>
      %cst_15 = arith.constant 0.000000e+00 : f32
      %26 = vector.broadcast %cst_15 : f32 to vector<256x128xf32>
      %27 = arith.select %18, %25, %26 : vector<256x128xi1>, vector<256x128xf32>
      %cst_16 = arith.constant dense<0.000000e+00> : vector<256xf32>
      %28 = vector.multi_reduction <add>, %27, %cst_16 [1] : vector<256x128xf32> to vector<256xf32>
      %29 = vector.shape_cast %28 : vector<256xf32> to vector<256x1xf32>
      %30 = math.log %29 : vector<256x1xf32>
      %31 = vector.broadcast %30 : vector<256x1xf32> to vector<256x128xf32>
      %32 = arith.subf %24, %31 : vector<256x128xf32>
      %cst_17 = arith.constant 0.000000e+00 : f32
      %33 = vector.broadcast %cst_17 : f32 to vector<256x128xf32>
      %34 = arith.select %18, %32, %33 : vector<256x128xi1>, vector<256x128xf32>
      %c0_18 = arith.constant 0 : index
      %c0_19 = arith.constant 0 : index
      %35 = vector.load %arg5[%c0_18, %c0_19] : memref<256x128xf32, #tpu.memory_space<vmem>>, vector<256x128xf32>
      tpu.vector_store %arg5[%c0_18, %c0_19], %34 {strides = array<i32>} : memref<256x128xf32, #tpu.memory_space<vmem>>, vector<256x128xf32>,
    } else {
    }
    return
  }
  func.func @transform_0(%arg0: i32, %arg1: i32) -> (i32, i32) {
    %c0_i32 = arith.constant 0 : i32
    return %arg0, %arg1 : i32, i32
  }
  func.func @transform_1(%arg0: i32, %arg1: i32) -> (i32, i32) {
    %c0_i32 = arith.constant 0 : i32
    %c0_i32_0 = arith.constant 0 : i32
    return %arg1, %c0_i32 : i32, i32
  }
  func.func @transform_2(%arg0: i32, %arg1: i32) -> (i32, i32) {
    %c0_i32 = arith.constant 0 : i32
    %c0_i32_0 = arith.constant 0 : i32
    %c0_i32_1 = arith.constant 0 : i32
    return %c0_i32, %c0_i32_0 : i32, i32
  }
  func.func @transform_3(%arg0: i32, %arg1: i32) -> (i32, i32) {
    %c0_i32 = arith.constant 0 : i32
    %c0_i32_0 = arith.constant 0 : i32
    return %arg0, %c0_i32 : i32, i32
  }
}

</mosaic_0001>

<bundles_post_ra>
// kernel: gcn_forward.3
= control target key start
LH: loop header
LB: loop body
LE: loop exit
PB: predicated region body
PF: predicated region fallthrough
CT: control target
= control target key end

     0   :  { %s1481_s9 = smov 0   ;;  %s1483_s10 = smov 0   ;;  %s1730_s0 = inlined_call_operand.vmem [shape: bf16[512,256], index: 0, kind: input, shape index: {}]   ;;  %s1731_s1 = inlined_call_operand.vmem [shape: bf16[256,64], index: 1, kind: input, shape index: {}]   ;;  %s1732_s2 = inlined_call_operand.vmem [shape: bf16[512,64], index: 2, kind: output, shape index: {}]  }
   0x1   :  { %s1485_s11 = smov 0  }
   0x2 LB: > { %s24_s12 = sadd.s32 1, %s1459_s10  ;;  %p1103_p0 = scmp.ge.s32.totalorder %s1463_s11, 1  ;;  %s1463_s11 = sphi %s1485_s11, %s12_s11   ;;  %s1459_s10 = sphi %s1483_s10, %s1734_s10   ;;  %s1455_s9 = sphi %s1481_s9, %s1733_s9  }
   0x3   : > { %p26_p1 = scmp.ge.s32.totalorder %s24_s12, 2  ;;  %p144_p2 = scmp.lt.s32.totalorder %s1463_s11, 3 }
   0x5   : > { %s1736_s12 = smov (%p26_p1, %s24_s12), 0  ;;  %p145_p3 = pnand %p1103_p0, %p144_p2 }
   0x6   : > { %v1377_v0 = vld [vmem:[%s1731_s1 + $0x40] sm:$0xff] (!%p145_p3)   ;;  %s1104_s15 = sshll.u32 (!%p145_p3), %s1455_s9, 5  ;;  %v1379_v2 = vld [vmem:[%s1731_s1 + $0x48] sm:$0xff] (!%p145_p3)   ;;  %v1381_v4 = vld [vmem:[%s1731_s1 + $0x50] sm:$0xff] (!%p145_p3)   ;;  %vm205_vm0 = vcmask (!%p145_p3), 523264   ;;  %v1465_v48 = vmov (!%p145_p3), 0.0  }
   0x7   : > { %148 = sbr.rel (%p145_p3) target bundleno = 328 (0x148), region = 28  ;;  %v1378_v1 = vld [vmem:[%s1731_s1] sm:$0xff] (!%p145_p3)   ;;  %1224 = vmatprep.subr.bf16.mxu0 (!%p145_p3), %v1377_v0  ;;  %1336 = vmatprep.subr.bf16.mxu1 (!%p145_p3), %v1377_v0  ;;  %v1380_v3 = vld [vmem:[%s1731_s1 + $0x8] sm:$0xff] (!%p145_p3)   ;;  %p178_p4 = scmp.lt.s32.totalorder (!%p145_p3), %s1104_s15, 63  ;;  %v1382_v5 = vld [vmem:[%s1731_s1 + $0x10] sm:$0xff] (!%p145_p3)   ;;  %206 = vst.msk [vmem:[#allocation2] sm:$0xff] (!%p145_p3), %vm205_vm0, %v1465_v48 }
   0x8   : > { %1225 = vmatpush3.bf16.msra.mxu0 (!%p145_p3), %v1378_v1  ;;  %1344 = vmatpush3.bf16.msra.mxu1 (!%p145_p3), %v1378_v1  ;;  %v1383_v6 = vld [vmem:[%s1731_s1 + $0x58] sm:$0xff] (!%p145_p3)   ;;  %v1385_v8 = vld [vmem:[%s1731_s1 + $0x60] sm:$0xff] (!%p145_p3)   ;;  %v1387_v10 = vld [vmem:[%s1731_s1 + $0x68] sm:$0xff] (!%p145_p3)   ;;  %207 = vst.msk [vmem:[#allocation2 + $0x8] sm:$0xff] (!%p145_p3), %vm205_vm0, %v1465_v48  ;;  %vm979_vm1 = vcmask (!%p145_p3), 519168  }
   0x9   : > { %1226 = vmatprep.subr.bf16.mxu0 (!%p145_p3), %v1379_v2  ;;  %1337 = vmatprep.subr.bf16.mxu1 (!%p145_p3), %v1379_v2  ;;  %v1384_v7 = vld [vmem:[%s1731_s1 + $0x18] sm:$0xff] (!%p145_p3)   ;;  %v1386_v9 = vld [vmem:[%s1731_s1 + $0x20] sm:$0xff] (!%p145_p3)   ;;  %v1388_v13 = vld [vmem:[%s1731_s1 + $0x28] sm:$0xff] (!%p145_p3)   ;;  %208 = vst.msk [vmem:[#allocation2 + $0x10] sm:$0xff] (!%p145_p3), %vm205_vm0, %v1465_v48 }
   0xa   : > { %v1389_v14 = vld [vmem:[%s1731_s1 + $0x70] sm:$0xff] (!%p145_p3)   ;;  %v1391_v16 = vld [vmem:[%s1731_s1 + $0x78] sm:$0xff] (!%p145_p3)   ;;  %209 = vst.msk [vmem:[#allocation2 + $0x18] sm:$0xff] (!%p145_p3), %vm205_vm0, %v1465_v48  ;;  %210 = vst.msk [vmem:[#allocation2 + $0x20] sm:$0xff] (!%p145_p3), %vm205_vm0, %v1465_v48 }
   0xb   : > { %v1390_v15 = vld [vmem:[%s1731_s1 + $0x30] sm:$0xff] (!%p145_p3)   ;;  %v1392_v17 = vld [vmem:[%s1731_s1 + $0x38] sm:$0xff] (!%p145_p3)   ;;  %211 = vst.msk [vmem:[#allocation2 + $0x28] sm:$0xff] (!%p145_p3), %vm205_vm0, %v1465_v48  ;;  %212 = vst.msk [vmem:[#allocation2 + $0x30] sm:$0xff] (!%p145_p3), %vm205_vm0, %v1465_v48 }
   0xc   : > { %1227 = vmatpush3.bf16.msra.mxu0 (!%p145_p3), %v1380_v3  ;;  %1345 = vmatpush3.bf16.msra.mxu1 (!%p145_p3), %v1380_v3  ;;  %213 = vst.msk [vmem:[#allocation2 + $0x38] sm:$0xff] (!%p145_p3), %vm205_vm0, %v1465_v48  ;;  %214 = vst.msk [vmem:[#allocation2 + $0x40] sm:$0xff] (!%p145_p3), %vm205_vm0, %v1465_v48 }
   0xd   : > { %1228 = vmatprep.subr.bf16.mxu0 (!%p145_p3), %v1381_v4  ;;  %1338 = vmatprep.subr.bf16.mxu1 (!%p145_p3), %v1381_v4  ;;  %215 = vst.msk [vmem:[#allocation2 + $0x48] sm:$0xff] (!%p145_p3), %vm205_vm0, %v1465_v48  ;;  %216 = vst.msk [vmem:[#allocation2 + $0x50] sm:$0xff] (!%p145_p3), %vm205_vm0, %v1465_v48 }
   0xe   : > { %s1738_s15 = smov (!%p178_p4, %s1104_s15), 63  ;;  %217 = vst.msk [vmem:[#allocation2 + $0x58] sm:$0xff] %vm205_vm0, %v1465_v48  ;;  %218 = vst.msk [vmem:[#allocation2 + $0x60] sm:$0xff] %vm205_vm0, %v1465_v48  ;;  %v238_v51 = vld [vmem:[#allocation2] sm:$0xff] }
   0xf   : > { %s1191_s30 = sshll.u32 %s1738_s15, 3  ;;  %219 = vst.msk [vmem:[#allocation2 + $0x68] sm:$0xff] %vm205_vm0, %v1465_v48  ;;  %220 = vst.msk [vmem:[#allocation2 + $0x70] sm:$0xff] %vm205_vm0, %v1465_v48  ;;  %v239_v59 = vld [vmem:[#allocation2 + $0x8] sm:$0xff]  ;;  %s1108_s26 = sshll.u32 %s1738_s15, 2 }
  0x10   : > { %1229 = vmatpush3.bf16.msra.mxu0 %v1382_v5  ;;  %1346 = vmatpush3.bf16.msra.mxu1 %v1382_v5  ;;  %s1532_s7 = scalar_lea.vmem %s1730_s0, %s1191_s30  ;;  %221 = vst.msk [vmem:[#allocation2 + $0x78] sm:$0xff] %vm205_vm0, %v1465_v48  ;;  %222 = vst.msk [vmem:[#allocation2 + $0x80] sm:$0xff] %vm205_vm0, %v1465_v48  ;;  %s1627_s29 = scalar_lea.vmem %s1732_s2, %s1108_s26 }
  0x11   : > { %1230 = vmatprep.subr.bf16.mxu0 %v1383_v6  ;;  %1339 = vmatprep.subr.bf16.mxu1 %v1383_v6  ;;  %v1395_v11 = vld [vmem:[%s1532_s7 + $0x4] ss:$8 sps:$4 sm:$0xff]   ;;  %v1393_v18 = vld [vmem:[%s1532_s7] ss:$8 sps:$4 sm:$0xff]   ;;  %v1399_v20 = vld [vmem:[%s1532_s7 + $0x14] ss:$8 sps:$4 sm:$0xff]  }
  0x12   : > { %v1398_v12 = vld [vmem:[%s1532_s7 + $0x84] ss:$8 sps:$4 sm:$0xff]   ;;  %622 = vmatprep.mubr.bf16.mxu0 %v1395_v11  ;;  %v1396_v19 = vld [vmem:[%s1532_s7 + $0x80] ss:$8 sps:$4 sm:$0xff]   ;;  %v1401_v21 = vld [vmem:[%s1532_s7 + $0x94] ss:$8 sps:$4 sm:$0xff]  }
  0x13   : > { %686 = vmatprep.mubr.bf16.mxu1 %v1398_v12  ;;  %v1403_v22 = vld [vmem:[%s1532_s7 + $0x10] ss:$8 sps:$4 sm:$0xff]   ;;  %v1405_v24 = vld [vmem:[%s1532_s7 + $0x24] ss:$8 sps:$4 sm:$0xff]   ;;  %v1409_v26 = vld [vmem:[%s1532_s7 + $0x20] ss:$8 sps:$4 sm:$0xff]  }
  0x14   : > { %1231 = vmatpush3.bf16.msra.mxu0 %v1384_v7  ;;  %1347 = vmatpush3.bf16.msra.mxu1 %v1384_v7  ;;  %v1404_v23 = vld [vmem:[%s1532_s7 + $0x90] ss:$8 sps:$4 sm:$0xff]   ;;  %v1407_v25 = vld [vmem:[%s1532_s7 + $0xa4] ss:$8 sps:$4 sm:$0xff]   ;;  %v1410_v27 = vld [vmem:[%s1532_s7 + $0xa0] ss:$8 sps:$4 sm:$0xff]  }
  0x15   : > { %1232 = vmatprep.subr.bf16.mxu0 %v1385_v8  ;;  %1340 = vmatprep.subr.bf16.mxu1 %v1385_v8  ;;  %v1411_v28 = vld [vmem:[%s1532_s7 + $0x34] ss:$8 sps:$4 sm:$0xff]   ;;  %v1415_v30 = vld [vmem:[%s1532_s7 + $0x30] ss:$8 sps:$4 sm:$0xff]   ;;  %v1417_v32 = vld [vmem:[%s1532_s7 + $0x44] ss:$8 sps:$4 sm:$0xff]  }
  0x16   : > { %v1413_v29 = vld [vmem:[%s1532_s7 + $0xb4] ss:$8 sps:$4 sm:$0xff]   ;;  %v1416_v31 = vld [vmem:[%s1532_s7 + $0xb0] ss:$8 sps:$4 sm:$0xff]   ;;  %v1419_v33 = vld [vmem:[%s1532_s7 + $0xc4] ss:$8 sps:$4 sm:$0xff]  }
  0x17   : > { %v1421_v34 = vld [vmem:[%s1532_s7 + $0x40] ss:$8 sps:$4 sm:$0xff]   ;;  %v1423_v36 = vld [vmem:[%s1532_s7 + $0x54] ss:$8 sps:$4 sm:$0xff]   ;;  %v1427_v38 = vld [vmem:[%s1532_s7 + $0x50] ss:$8 sps:$4 sm:$0xff]  }
  0x18   : > { %1233 = vmatpush3.bf16.msra.mxu0 %v1386_v9  ;;  %1348 = vmatpush3.bf16.msra.mxu1 %v1386_v9  ;;  %v1422_v35 = vld [vmem:[%s1532_s7 + $0xc0] ss:$8 sps:$4 sm:$0xff]   ;;  %v1425_v37 = vld [vmem:[%s1532_s7 + $0xd4] ss:$8 sps:$4 sm:$0xff]   ;;  %v1428_v39 = vld [vmem:[%s1532_s7 + $0xd0] ss:$8 sps:$4 sm:$0xff]  }
  0x19   : > { %1234 = vmatprep.subr.bf16.mxu0 %v1387_v10  ;;  %1341 = vmatprep.subr.bf16.mxu1 %v1387_v10  ;;  %v1429_v40 = vld [vmem:[%s1532_s7 + $0x64] ss:$8 sps:$4 sm:$0xff]   ;;  %v1433_v42 = vld [vmem:[%s1532_s7 + $0x60] ss:$8 sps:$4 sm:$0xff]   ;;  %v1435_v44 = vld [vmem:[%s1532_s7 + $0x74] ss:$8 sps:$4 sm:$0xff]  }
  0x1a   : > { %v1431_v41 = vld [vmem:[%s1532_s7 + $0xe4] ss:$8 sps:$4 sm:$0xff]   ;;  %v1434_v43 = vld [vmem:[%s1532_s7 + $0xe0] ss:$8 sps:$4 sm:$0xff]   ;;  %v1437_v45 = vld [vmem:[%s1532_s7 + $0xf4] ss:$8 sps:$4 sm:$0xff]  }
  0x1b   : > { %v1439_v46 = vld [vmem:[%s1532_s7 + $0x70] ss:$8 sps:$4 sm:$0xff]   ;;  %223 = vst.msk [vmem:[#allocation2 + $0x88] sm:$0xff] %vm205_vm0, %v1465_v48  ;;  %224 = vst.msk [vmem:[#allocation2 + $0x90] sm:$0xff] %vm205_vm0, %v1465_v48  ;;  %v254_v53 = vld [vmem:[#allocation2 + $0x80] sm:$0xff] }
  0x1c   : > { %1235 = vmatpush3.bf16.msra.mxu0 %v1388_v13  ;;  %1349 = vmatpush3.bf16.msra.mxu1 %v1388_v13  ;;  %v1440_v47 = vld [vmem:[%s1532_s7 + $0xf0] ss:$8 sps:$4 sm:$0xff]   ;;  %225 = vst.msk [vmem:[#allocation2 + $0x98] sm:$0xff] %vm205_vm0, %v1465_v48  ;;  %226 = vst.msk [vmem:[#allocation2 + $0xa0] sm:$0xff] %vm205_vm0, %v1465_v48 }
  0x1d   : > { %1236 = vmatprep.subr.bf16.mxu0 %v1389_v14  ;;  %1342 = vmatprep.subr.bf16.mxu1 %v1389_v14  ;;  %227 = vst.msk [vmem:[#allocation2 + $0xa8] sm:$0xff] %vm205_vm0, %v1465_v48  ;;  %228 = vst.msk [vmem:[#allocation2 + $0xb0] sm:$0xff] %vm205_vm0, %v1465_v48  ;;  %v240_v7 = vld [vmem:[#allocation2 + $0x10] sm:$0xff] }
  0x1e   : > { %229 = vst.msk [vmem:[#allocation2 + $0xb8] sm:$0xff] %vm205_vm0, %v1465_v48  ;;  %230 = vst.msk [vmem:[#allocation2 + $0xc0] sm:$0xff] %vm205_vm0, %v1465_v48 }
  0x1f   : > { %231 = vst.msk [vmem:[#allocation2 + $0xc8] sm:$0xff] %vm205_vm0, %v1465_v48  ;;  %232 = vst.msk [vmem:[#allocation2 + $0xd0] sm:$0xff] %vm205_vm0, %v1465_v48 }
  0x20   : > { %1237 = vmatpush3.bf16.msra.mxu0 %v1390_v15  ;;  %1350 = vmatpush3.bf16.msra.mxu1 %v1390_v15  ;;  %233 = vst.msk [vmem:[#allocation2 + $0xd8] sm:$0xff] %vm205_vm0, %v1465_v48  ;;  %234 = vst.msk [vmem:[#allocation2 + $0xe0] sm:$0xff] %vm205_vm0, %v1465_v48  ;;  %v241_v15 = vld [vmem:[#allocation2 + $0x18] sm:$0xff] }
  0x21   : > { %1238 = vmatprep.subr.bf16.mxu0 %v1391_v16  ;;  %1343 = vmatprep.subr.bf16.mxu1 %v1391_v16  ;;  %235 = vst.msk [vmem:[#allocation2 + $0xe8] sm:$0xff] %vm205_vm0, %v1465_v48  ;;  %236 = vst.msk [vmem:[#allocation2 + $0xf0] sm:$0xff] %vm205_vm0, %v1465_v48 }
  0x22   : > { %237 = vst.msk [vmem:[#allocation2 + $0xf8] sm:$0xff] %vm205_vm0, %v1465_v48  ;;  %v255_v61 = vld [vmem:[#allocation2 + $0x88] sm:$0xff]  ;;  %v256_v9 = vld [vmem:[#allocation2 + $0x90] sm:$0xff] }
  0x24   : > { %1239 = vmatpush3.bf16.msra.mxu0 %v1392_v17  ;;  %1351 = vmatpush3.bf16.msra.mxu1 %v1392_v17  ;;  %v257_v17 = vld [vmem:[#allocation2 + $0x98] sm:$0xff] }
  0x27   : > { %623 = vmatmul.mubr.bf16.vlgmr.msra.gmra.mrb[0].mxu0 %v1393_v18  ;;  %687 = vmatmul.mubr.bf16.vlgmr.msra.gmra.mrb[0].mxu1 %v1396_v19 }
  0x28   : > { %630 = vmatprep.mubr.bf16.mxu0 %v1399_v20  ;;  %694 = vmatprep.mubr.bf16.mxu1 %v1401_v21 }
  0x2f   : > { %631 = vmatmul.mubr.bf16.gmra.mrb[4].mxu0 %v1403_v22  ;;  %695 = vmatmul.mubr.bf16.gmra.mrb[4].mxu1 %v1404_v23 }
  0x30   : > { %638 = vmatprep.mubr.bf16.mxu0 %v1405_v24  ;;  %702 = vmatprep.mubr.bf16.mxu1 %v1407_v25 }
  0x37   : > { %639 = vmatmul.mubr.bf16.gmra.mrb[8].mxu0 %v1409_v26  ;;  %703 = vmatmul.mubr.bf16.gmra.mrb[8].mxu1 %v1410_v27 }
  0x38   : > { %646 = vmatprep.mubr.bf16.mxu0 %v1411_v28  ;;  %710 = vmatprep.mubr.bf16.mxu1 %v1413_v29 }
  0x3f   : > { %647 = vmatmul.mubr.bf16.gmra.mrb[12].mxu0 %v1415_v30  ;;  %711 = vmatmul.mubr.bf16.gmra.mrb[12].mxu1 %v1416_v31 }
  0x40   : > { %654 = vmatprep.mubr.bf16.mxu0 %v1417_v32  ;;  %718 = vmatprep.mubr.bf16.mxu1 %v1419_v33 }
  0x47   : > { %655 = vmatmul.mubr.bf16.gmra.mrb[16].mxu0 %v1421_v34  ;;  %719 = vmatmul.mubr.bf16.gmra.mrb[16].mxu1 %v1422_v35  ;;  %v242_v35 = vld [vmem:[#allocation2 + $0x20] sm:$0xff] }
  0x48   : > { %662 = vmatprep.mubr.bf16.mxu0 %v1423_v36  ;;  %726 = vmatprep.mubr.bf16.mxu1 %v1425_v37  ;;  %v258_v37 = vld [vmem:[#allocation2 + $0xa0] sm:$0xff] }
  0x4f   : > { %663 = vmatmul.mubr.bf16.gmra.mrb[20].mxu0 %v1427_v38  ;;  %727 = vmatmul.mubr.bf16.gmra.mrb[20].mxu1 %v1428_v39 }
  0x50   : > { %670 = vmatprep.mubr.bf16.mxu0 %v1429_v40  ;;  %734 = vmatprep.mubr.bf16.mxu1 %v1431_v41 }
  0x57   : > { %671 = vmatmul.mubr.bf16.gmra.mrb[24].mxu0 %v1433_v42  ;;  %735 = vmatmul.mubr.bf16.gmra.mrb[24].mxu1 %v1434_v43  ;;  %v243_v43 = vld [vmem:[#allocation2 + $0x28] sm:$0xff] }
  0x58   : > { %678 = vmatprep.mubr.bf16.mxu0 %v1435_v44  ;;  %742 = vmatprep.mubr.bf16.mxu1 %v1437_v45  ;;  %v259_v45 = vld [vmem:[#allocation2 + $0xa8] sm:$0xff] }
  0x5f   : > { %679 = vmatmul.mubr.bf16.gmra.mrb[28].mxu0 %v1439_v46  ;;  %743 = vmatmul.mubr.bf16.gmra.mrb[28].mxu1 %v1440_v47 }
  0xfa   : > { %v1240_v49 = vpop.f32.mrb[0].mxu0  ;;  %v1288_v50 = vpop.f32.mrb[0].mxu1 }
  0xfb   : > { %v1241_v52 = vpop.f32.mrb[1].mxu0  ;;  %v1289_v54 = vpop.f32.mrb[1].mxu1 }
  0xfc   : > { %v1242_v55 = vadd.f32 %v1241_v52, %v1240_v49  ;;  %v1290_v56 = vadd.f32 %v1289_v54, %v1288_v50  ;;  %v1243_v57 = vpop.f32.mrb[2].mxu0  ;;  %v1291_v58 = vpop.f32.mrb[2].mxu1 }
  0xfd   : > { %v1244_v60 = vpop.f32.mrb[3].mxu0  ;;  %v1292_v62 = vpop.f32.mrb[3].mxu1 }
  0xfe   : > { %v751_v63 = vadd.f32 %v1242_v55, %v238_v51  ;;  %v767_v0 = vadd.f32 %v1290_v56, %v254_v53  ;;  %v1245_v1 = vadd.f32 %v1244_v60, %v1243_v57  ;;  %v1293_v2 = vadd.f32 %v1292_v62, %v1291_v58 }
 0x100   : > { %784 = vst.msk [vmem:[#allocation2] sm:$0xff] %vm205_vm0, %v751_v63  ;;  %800 = vst.msk [vmem:[#allocation2 + $0x80] sm:$0xff] %vm205_vm0, %v767_v0  ;;  %v752_v3 = vadd.f32 %v1245_v1, %v239_v59  ;;  %v768_v4 = vadd.f32 %v1293_v2, %v255_v61  ;;  %v244_v63 = vld [vmem:[#allocation2 + $0x30] sm:$0xff] }
 0x101   : > { %v260_v1 = vld [vmem:[#allocation2 + $0xb0] sm:$0xff] }
 0x102   : > { %785 = vst.msk [vmem:[#allocation2 + $0x8] sm:$0xff] %vm205_vm0, %v752_v3  ;;  %801 = vst.msk [vmem:[#allocation2 + $0x88] sm:$0xff] %vm205_vm0, %v768_v4  ;;  %v1246_v5 = vpop.f32.mrb[4].mxu0  ;;  %v1294_v6 = vpop.f32.mrb[4].mxu1 }
 0x103   : > { %v1247_v8 = vpop.f32.mrb[5].mxu0  ;;  %v1295_v10 = vpop.f32.mrb[5].mxu1 }
 0x104   : > { %v1248_v11 = vadd.f32 %v1247_v8, %v1246_v5  ;;  %v1296_v12 = vadd.f32 %v1295_v10, %v1294_v6  ;;  %v1249_v13 = vpop.f32.mrb[6].mxu0  ;;  %v1297_v14 = vpop.f32.mrb[6].mxu1 }
 0x105   : > { %v1250_v16 = vpop.f32.mrb[7].mxu0  ;;  %v1298_v18 = vpop.f32.mrb[7].mxu1 }
 0x106   : > { %v753_v19 = vadd.f32 %v1248_v11, %v240_v7  ;;  %v769_v20 = vadd.f32 %v1296_v12, %v256_v9  ;;  %v1251_v21 = vadd.f32 %v1250_v16, %v1249_v13  ;;  %v1299_v22 = vadd.f32 %v1298_v18, %v1297_v14  ;;  %v245_v7 = vld [vmem:[#allocation2 + $0x38] sm:$0xff] }
 0x107   : > { %v819_v23 = vld [vmem:[#allocation2] sm:$0xff]  ;;  %v261_v9 = vld [vmem:[#allocation2 + $0xb8] sm:$0xff] }
 0x108   : > { %v835_v24 = vld [vmem:[#allocation2 + $0x80] sm:$0xff]  ;;  %v1192_v25 = vpack.c.bf16 %v819_v23, %v819_v23  ;;  %786 = vst.msk [vmem:[#allocation2 + $0x10] sm:$0xff] %vm205_vm0, %v753_v19  ;;  %802 = vst.msk [vmem:[#allocation2 + $0x90] sm:$0xff] %vm205_vm0, %v769_v20  ;;  %v754_v27 = vadd.f32 %v1251_v21, %v241_v15  ;;  %v770_v28 = vadd.f32 %v1299_v22, %v257_v17 }
 0x109   : > { %v1208_v26 = vpack.c.bf16 %v835_v24, %v835_v24  ;;  %v820_v29 = vld [vmem:[#allocation2 + $0x8] sm:$0xff] }
 0x10a   : > { %v836_v30 = vld [vmem:[#allocation2 + $0x88] sm:$0xff]  ;;  %980 = vst.msk [vmem:[%s1627_s29] sm:$0xf] %vm979_vm1, %v1192_v25  ;;  %v1193_v31 = vpack.c.bf16 %v820_v29, %v820_v29  ;;  %v1252_v33 = vpop.f32.mrb[8].mxu0  ;;  %v1300_v34 = vpop.f32.mrb[8].mxu1  ;;  %v262_v29 = vld [vmem:[#allocation2 + $0xc0] sm:$0xff] }
 0x10b   : > { %996 = vst.msk [vmem:[%s1627_s29 + $0x40] sm:$0xf] %vm979_vm1, %v1208_v26  ;;  %v1209_v32 = vpack.c.bf16 %v836_v30, %v836_v30  ;;  %v1253_v36 = vpop.f32.mrb[9].mxu0  ;;  %v1301_v38 = vpop.f32.mrb[9].mxu1 }
 0x10c   : > { %787 = vst.msk [vmem:[#allocation2 + $0x18] sm:$0xff] %vm205_vm0, %v754_v27  ;;  %803 = vst.msk [vmem:[#allocation2 + $0x98] sm:$0xff] %vm205_vm0, %v770_v28  ;;  %v1254_v39 = vadd.f32 %v1253_v36, %v1252_v33  ;;  %v1302_v40 = vadd.f32 %v1301_v38, %v1300_v34  ;;  %v1255_v41 = vpop.f32.mrb[10].mxu0  ;;  %v1303_v42 = vpop.f32.mrb[10].mxu1  ;;  %v246_v27 = vld [vmem:[#allocation2 + $0x40] sm:$0xff] }
 0x10d   : > { %981 = vst.msk [vmem:[%s1627_s29 + $0x4] sm:$0xf] %vm979_vm1, %v1193_v31  ;;  %997 = vst.msk [vmem:[%s1627_s29 + $0x44] sm:$0xf] %vm979_vm1, %v1209_v32  ;;  %v1256_v44 = vpop.f32.mrb[11].mxu0  ;;  %v1304_v46 = vpop.f32.mrb[11].mxu1 }
 0x10e   : > { %v755_v47 = vadd.f32 %v1254_v39, %v242_v35  ;;  %v771_v48 = vadd.f32 %v1302_v40, %v258_v37  ;;  %v1257_v49 = vadd.f32 %v1256_v44, %v1255_v41  ;;  %v1305_v50 = vadd.f32 %v1304_v46, %v1303_v42  ;;  %v247_v35 = vld [vmem:[#allocation2 + $0x48] sm:$0xff] }
 0x10f   : > { %v821_v51 = vld [vmem:[#allocation2 + $0x10] sm:$0xff]  ;;  %v263_v37 = vld [vmem:[#allocation2 + $0xc8] sm:$0xff] }
 0x110   : > { %v837_v52 = vld [vmem:[#allocation2 + $0x90] sm:$0xff]  ;;  %v1194_v53 = vpack.c.bf16 %v821_v51, %v821_v51  ;;  %788 = vst.msk [vmem:[#allocation2 + $0x20] sm:$0xff] %vm205_vm0, %v755_v47  ;;  %804 = vst.msk [vmem:[#allocation2 + $0xa0] sm:$0xff] %vm205_vm0, %v771_v48  ;;  %v756_v55 = vadd.f32 %v1257_v49, %v243_v43  ;;  %v772_v56 = vadd.f32 %v1305_v50, %v259_v45 }
 0x111   : > { %v1210_v54 = vpack.c.bf16 %v837_v52, %v837_v52 }
 0x112   : > { %982 = vst.msk [vmem:[%s1627_s29 + $0x8] sm:$0xf] %vm979_vm1, %v1194_v53  ;;  %v1258_v61 = vpop.f32.mrb[12].mxu0  ;;  %v1306_v62 = vpop.f32.mrb[12].mxu1 }
 0x113   : > { %v822_v57 = vld [vmem:[#allocation2 + $0x18] sm:$0xff]  ;;  %998 = vst.msk [vmem:[%s1627_s29 + $0x48] sm:$0xf] %vm979_vm1, %v1210_v54  ;;  %v1259_v0 = vpop.f32.mrb[13].mxu0  ;;  %v1307_v2 = vpop.f32.mrb[13].mxu1 }
 0x114   : > { %v838_v58 = vld [vmem:[#allocation2 + $0x98] sm:$0xff]  ;;  %v1195_v59 = vpack.c.bf16 %v822_v57, %v822_v57  ;;  %789 = vst.msk [vmem:[#allocation2 + $0x28] sm:$0xff] %vm205_vm0, %v756_v55  ;;  %805 = vst.msk [vmem:[#allocation2 + $0xa8] sm:$0xff] %vm205_vm0, %v772_v56  ;;  %v1260_v3 = vadd.f32 %v1259_v0, %v1258_v61  ;;  %v1308_v4 = vadd.f32 %v1307_v2, %v1306_v62  ;;  %v1261_v5 = vpop.f32.mrb[14].mxu0  ;;  %v1309_v6 = vpop.f32.mrb[14].mxu1  ;;  %v248_v55 = vld [vmem:[#allocation2 + $0x50] sm:$0xff] }
 0x115   : > { %v1211_v60 = vpack.c.bf16 %v838_v58, %v838_v58  ;;  %v1262_v8 = vpop.f32.mrb[15].mxu0  ;;  %v1310_v10 = vpop.f32.mrb[15].mxu1  ;;  %v264_v57 = vld [vmem:[#allocation2 + $0xd0] sm:$0xff] }
 0x116   : > { %983 = vst.msk [vmem:[%s1627_s29 + $0xc] sm:$0xf] %vm979_vm1, %v1195_v59  ;;  %v757_v11 = vadd.f32 %v1260_v3, %v244_v63  ;;  %v773_v12 = vadd.f32 %v1308_v4, %v260_v1  ;;  %v1263_v13 = vadd.f32 %v1262_v8, %v1261_v5  ;;  %v1311_v14 = vadd.f32 %v1310_v10, %v1309_v6  ;;  %v249_v63 = vld [vmem:[#allocation2 + $0x58] sm:$0xff] }
 0x117   : > { %999 = vst.msk [vmem:[%s1627_s29 + $0x4c] sm:$0xf] %vm979_vm1, %v1211_v60  ;;  %v823_v15 = vld [vmem:[#allocation2 + $0x20] sm:$0xff]  ;;  %v265_v1 = vld [vmem:[#allocation2 + $0xd8] sm:$0xff] }
 0x118   : > { %v839_v16 = vld [vmem:[#allocation2 + $0xa0] sm:$0xff]  ;;  %v1196_v17 = vpack.c.bf16 %v823_v15, %v823_v15  ;;  %790 = vst.msk [vmem:[#allocation2 + $0x30] sm:$0xff] %vm205_vm0, %v757_v11  ;;  %806 = vst.msk [vmem:[#allocation2 + $0xb0] sm:$0xff] %vm205_vm0, %v773_v12  ;;  %v758_v19 = vadd.f32 %v1263_v13, %v245_v7  ;;  %v774_v20 = vadd.f32 %v1311_v14, %v261_v9 }
 0x119   : > { %v1212_v18 = vpack.c.bf16 %v839_v16, %v839_v16 }
 0x11a   : > { %984 = vst.msk [vmem:[%s1627_s29 + $0x10] sm:$0xf] %vm979_vm1, %v1196_v17  ;;  %v1264_v25 = vpop.f32.mrb[16].mxu0  ;;  %v1312_v26 = vpop.f32.mrb[16].mxu1 }
 0x11b   : > { %v824_v21 = vld [vmem:[#allocation2 + $0x28] sm:$0xff]  ;;  %1000 = vst.msk [vmem:[%s1627_s29 + $0x50] sm:$0xf] %vm979_vm1, %v1212_v18  ;;  %v1265_v28 = vpop.f32.mrb[17].mxu0  ;;  %v1313_v30 = vpop.f32.mrb[17].mxu1 }
 0x11c   : > { %v840_v22 = vld [vmem:[#allocation2 + $0xa8] sm:$0xff]  ;;  %v1197_v23 = vpack.c.bf16 %v824_v21, %v824_v21  ;;  %791 = vst.msk [vmem:[#allocation2 + $0x38] sm:$0xff] %vm205_vm0, %v758_v19  ;;  %807 = vst.msk [vmem:[#allocation2 + $0xb8] sm:$0xff] %vm205_vm0, %v774_v20  ;;  %v1266_v31 = vadd.f32 %v1265_v28, %v1264_v25  ;;  %v1314_v32 = vadd.f32 %v1313_v30, %v1312_v26  ;;  %v1267_v33 = vpop.f32.mrb[18].mxu0  ;;  %v1315_v34 = vpop.f32.mrb[18].mxu1  ;;  %v250_v19 = vld [vmem:[#allocation2 + $0x60] sm:$0xff] }
 0x11d   : > { %v1213_v24 = vpack.c.bf16 %v840_v22, %v840_v22  ;;  %v1268_v36 = vpop.f32.mrb[19].mxu0  ;;  %v1316_v38 = vpop.f32.mrb[19].mxu1  ;;  %v266_v21 = vld [vmem:[#allocation2 + $0xe0] sm:$0xff] }
 0x11e   : > { %985 = vst.msk [vmem:[%s1627_s29 + $0x14] sm:$0xf] %vm979_vm1, %v1197_v23  ;;  %v759_v39 = vadd.f32 %v1266_v31, %v246_v27  ;;  %v775_v40 = vadd.f32 %v1314_v32, %v262_v29  ;;  %v1269_v41 = vadd.f32 %v1268_v36, %v1267_v33  ;;  %v1317_v42 = vadd.f32 %v1316_v38, %v1315_v34  ;;  %v251_v27 = vld [vmem:[#allocation2 + $0x68] sm:$0xff] }
 0x11f   : > { %1001 = vst.msk [vmem:[%s1627_s29 + $0x54] sm:$0xf] %vm979_vm1, %v1213_v24  ;;  %v825_v43 = vld [vmem:[#allocation2 + $0x30] sm:$0xff]  ;;  %v267_v29 = vld [vmem:[#allocation2 + $0xe8] sm:$0xff] }
 0x120   : > { %v841_v44 = vld [vmem:[#allocation2 + $0xb0] sm:$0xff]  ;;  %v1198_v45 = vpack.c.bf16 %v825_v43, %v825_v43  ;;  %792 = vst.msk [vmem:[#allocation2 + $0x40] sm:$0xff] %vm205_vm0, %v759_v39  ;;  %808 = vst.msk [vmem:[#allocation2 + $0xc0] sm:$0xff] %vm205_vm0, %v775_v40  ;;  %v760_v47 = vadd.f32 %v1269_v41, %v247_v35  ;;  %v776_v48 = vadd.f32 %v1317_v42, %v263_v37 }
 0x121   : > { %v1214_v46 = vpack.c.bf16 %v841_v44, %v841_v44 }
 0x122   : > { %986 = vst.msk [vmem:[%s1627_s29 + $0x18] sm:$0xf] %vm979_vm1, %v1198_v45  ;;  %v1270_v53 = vpop.f32.mrb[20].mxu0  ;;  %v1318_v54 = vpop.f32.mrb[20].mxu1 }
 0x123   : > { %v826_v49 = vld [vmem:[#allocation2 + $0x38] sm:$0xff]  ;;  %1002 = vst.msk [vmem:[%s1627_s29 + $0x58] sm:$0xf] %vm979_vm1, %v1214_v46  ;;  %v1271_v56 = vpop.f32.mrb[21].mxu0  ;;  %v1319_v58 = vpop.f32.mrb[21].mxu1 }
 0x124   : > { %v842_v50 = vld [vmem:[#allocation2 + $0xb8] sm:$0xff]  ;;  %v1199_v51 = vpack.c.bf16 %v826_v49, %v826_v49  ;;  %793 = vst.msk [vmem:[#allocation2 + $0x48] sm:$0xff] %vm205_vm0, %v760_v47  ;;  %809 = vst.msk [vmem:[#allocation2 + $0xc8] sm:$0xff] %vm205_vm0, %v776_v48  ;;  %v1272_v59 = vadd.f32 %v1271_v56, %v1270_v53  ;;  %v1320_v60 = vadd.f32 %v1319_v58, %v1318_v54  ;;  %v1273_v61 = vpop.f32.mrb[22].mxu0  ;;  %v1321_v62 = vpop.f32.mrb[22].mxu1  ;;  %v252_v47 = vld [vmem:[#allocation2 + $0x70] sm:$0xff] }
 0x125   : > { %v1215_v52 = vpack.c.bf16 %v842_v50, %v842_v50  ;;  %v1274_v0 = vpop.f32.mrb[23].mxu0  ;;  %v1322_v2 = vpop.f32.mrb[23].mxu1  ;;  %v268_v49 = vld [vmem:[#allocation2 + $0xf0] sm:$0xff] }
 0x126   : > { %987 = vst.msk [vmem:[%s1627_s29 + $0x1c] sm:$0xf] %vm979_vm1, %v1199_v51  ;;  %v761_v3 = vadd.f32 %v1272_v59, %v248_v55  ;;  %v777_v4 = vadd.f32 %v1320_v60, %v264_v57  ;;  %v1275_v5 = vadd.f32 %v1274_v0, %v1273_v61  ;;  %v1323_v6 = vadd.f32 %v1322_v2, %v1321_v62  ;;  %v253_v55 = vld [vmem:[#allocation2 + $0x78] sm:$0xff] }
 0x127   : > { %1003 = vst.msk [vmem:[%s1627_s29 + $0x5c] sm:$0xf] %vm979_vm1, %v1215_v52  ;;  %v827_v7 = vld [vmem:[#allocation2 + $0x40] sm:$0xff]  ;;  %v269_v57 = vld [vmem:[#allocation2 + $0xf8] sm:$0xff] }
 0x128   : > { %v843_v8 = vld [vmem:[#allocation2 + $0xc0] sm:$0xff]  ;;  %v1200_v9 = vpack.c.bf16 %v827_v7, %v827_v7  ;;  %794 = vst.msk [vmem:[#allocation2 + $0x50] sm:$0xff] %vm205_vm0, %v761_v3  ;;  %810 = vst.msk [vmem:[#allocation2 + $0xd0] sm:$0xff] %vm205_vm0, %v777_v4  ;;  %v762_v11 = vadd.f32 %v1275_v5, %v249_v63  ;;  %v778_v12 = vadd.f32 %v1323_v6, %v265_v1 }
 0x129   : > { %v1216_v10 = vpack.c.bf16 %v843_v8, %v843_v8 }
 0x12a   : > { %988 = vst.msk [vmem:[%s1627_s29 + $0x20] sm:$0xf] %vm979_vm1, %v1200_v9  ;;  %v1276_v17 = vpop.f32.mrb[24].mxu0  ;;  %v1324_v18 = vpop.f32.mrb[24].mxu1 }
 0x12b   : > { %v828_v13 = vld [vmem:[#allocation2 + $0x48] sm:$0xff]  ;;  %1004 = vst.msk [vmem:[%s1627_s29 + $0x60] sm:$0xf] %vm979_vm1, %v1216_v10  ;;  %v1277_v20 = vpop.f32.mrb[25].mxu0  ;;  %v1325_v22 = vpop.f32.mrb[25].mxu1 }
 0x12c   : > { %v844_v14 = vld [vmem:[#allocation2 + $0xc8] sm:$0xff]  ;;  %v1201_v15 = vpack.c.bf16 %v828_v13, %v828_v13  ;;  %795 = vst.msk [vmem:[#allocation2 + $0x58] sm:$0xff] %vm205_vm0, %v762_v11  ;;  %811 = vst.msk [vmem:[#allocation2 + $0xd8] sm:$0xff] %vm205_vm0, %v778_v12  ;;  %v1278_v23 = vadd.f32 %v1277_v20, %v1276_v17  ;;  %v1326_v24 = vadd.f32 %v1325_v22, %v1324_v18  ;;  %v1279_v25 = vpop.f32.mrb[26].mxu0  ;;  %v1327_v26 = vpop.f32.mrb[26].mxu1 }
 0x12d   : > { %v1217_v16 = vpack.c.bf16 %v844_v14, %v844_v14  ;;  %v1280_v28 = vpop.f32.mrb[27].mxu0  ;;  %v1328_v30 = vpop.f32.mrb[27].mxu1 }
 0x12e   : > { %989 = vst.msk [vmem:[%s1627_s29 + $0x24] sm:$0xf] %vm979_vm1, %v1201_v15  ;;  %v763_v31 = vadd.f32 %v1278_v23, %v250_v19  ;;  %v779_v32 = vadd.f32 %v1326_v24, %v266_v21  ;;  %v1281_v33 = vadd.f32 %v1280_v28, %v1279_v25  ;;  %v1329_v34 = vadd.f32 %v1328_v30, %v1327_v26 }
 0x12f   : > { %1005 = vst.msk [vmem:[%s1627_s29 + $0x64] sm:$0xf] %vm979_vm1, %v1217_v16  ;;  %v829_v35 = vld [vmem:[#allocation2 + $0x50] sm:$0xff] }
 0x130   : > { %v845_v36 = vld [vmem:[#allocation2 + $0xd0] sm:$0xff]  ;;  %v1202_v37 = vpack.c.bf16 %v829_v35, %v829_v35  ;;  %796 = vst.msk [vmem:[#allocation2 + $0x60] sm:$0xff] %vm205_vm0, %v763_v31  ;;  %812 = vst.msk [vmem:[#allocation2 + $0xe0] sm:$0xff] %vm205_vm0, %v779_v32  ;;  %v764_v39 = vadd.f32 %v1281_v33, %v251_v27  ;;  %v780_v40 = vadd.f32 %v1329_v34, %v267_v29 }
 0x131   : > { %v1218_v38 = vpack.c.bf16 %v845_v36, %v845_v36 }
 0x132   : > { %990 = vst.msk [vmem:[%s1627_s29 + $0x28] sm:$0xf] %vm979_vm1, %v1202_v37  ;;  %v1282_v45 = vpop.f32.mrb[28].mxu0  ;;  %v1330_v46 = vpop.f32.mrb[28].mxu1 }
 0x133   : > { %v830_v41 = vld [vmem:[#allocation2 + $0x58] sm:$0xff]  ;;  %1006 = vst.msk [vmem:[%s1627_s29 + $0x68] sm:$0xf] %vm979_vm1, %v1218_v38  ;;  %v1283_v48 = vpop.f32.mrb[29].mxu0  ;;  %v1331_v50 = vpop.f32.mrb[29].mxu1 }
 0x134   : > { %v846_v42 = vld [vmem:[#allocation2 + $0xd8] sm:$0xff]  ;;  %v1203_v43 = vpack.c.bf16 %v830_v41, %v830_v41  ;;  %797 = vst.msk [vmem:[#allocation2 + $0x68] sm:$0xff] %vm205_vm0, %v764_v39  ;;  %813 = vst.msk [vmem:[#allocation2 + $0xe8] sm:$0xff] %vm205_vm0, %v780_v40  ;;  %v1284_v51 = vadd.f32 %v1283_v48, %v1282_v45  ;;  %v1332_v52 = vadd.f32 %v1331_v50, %v1330_v46  ;;  %v1285_v53 = vpop.f32.mrb[30].mxu0  ;;  %v1333_v54 = vpop.f32.mrb[30].mxu1 }
 0x135   : > { %v1219_v44 = vpack.c.bf16 %v846_v42, %v846_v42  ;;  %v1286_v56 = vpop.f32.mrb[31].mxu0  ;;  %v1334_v58 = vpop.f32.mrb[31].mxu1 }
 0x136   : > { %991 = vst.msk [vmem:[%s1627_s29 + $0x2c] sm:$0xf] %vm979_vm1, %v1203_v43  ;;  %v765_v59 = vadd.f32 %v1284_v51, %v252_v47  ;;  %v781_v60 = vadd.f32 %v1332_v52, %v268_v49  ;;  %v1287_v61 = vadd.f32 %v1286_v56, %v1285_v53  ;;  %v1335_v62 = vadd.f32 %v1334_v58, %v1333_v54 }
 0x137   : > { %1007 = vst.msk [vmem:[%s1627_s29 + $0x6c] sm:$0xf] %vm979_vm1, %v1219_v44  ;;  %v831_v63 = vld [vmem:[#allocation2 + $0x60] sm:$0xff] }
 0x138   : > { %v847_v0 = vld [vmem:[#allocation2 + $0xe0] sm:$0xff]  ;;  %v1204_v1 = vpack.c.bf16 %v831_v63, %v831_v63  ;;  %798 = vst.msk [vmem:[#allocation2 + $0x70] sm:$0xff] %vm205_vm0, %v765_v59  ;;  %814 = vst.msk [vmem:[#allocation2 + $0xf0] sm:$0xff] %vm205_vm0, %v781_v60  ;;  %v766_v3 = vadd.f32 %v1287_v61, %v253_v55  ;;  %v782_v4 = vadd.f32 %v1335_v62, %v269_v57 }
 0x139   : > { %v1220_v2 = vpack.c.bf16 %v847_v0, %v847_v0 }
 0x13a   : > { %992 = vst.msk [vmem:[%s1627_s29 + $0x30] sm:$0xf] %vm979_vm1, %v1204_v1 }
 0x13b   : > { %v832_v5 = vld [vmem:[#allocation2 + $0x68] sm:$0xff]  ;;  %1008 = vst.msk [vmem:[%s1627_s29 + $0x70] sm:$0xf] %vm979_vm1, %v1220_v2 }
 0x13c   : > { %v848_v6 = vld [vmem:[#allocation2 + $0xe8] sm:$0xff]  ;;  %v1205_v7 = vpack.c.bf16 %v832_v5, %v832_v5  ;;  %799 = vst.msk [vmem:[#allocation2 + $0x78] sm:$0xff] %vm205_vm0, %v766_v3  ;;  %815 = vst.msk [vmem:[#allocation2 + $0xf8] sm:$0xff] %vm205_vm0, %v782_v4 }
 0x13d   : > { %v1221_v8 = vpack.c.bf16 %v848_v6, %v848_v6 }
 0x13e   : > { %993 = vst.msk [vmem:[%s1627_s29 + $0x34] sm:$0xf] %vm979_vm1, %v1205_v7 }
 0x13f   : > { %1009 = vst.msk [vmem:[%s1627_s29 + $0x74] sm:$0xf] %vm979_vm1, %v1221_v8  ;;  %v833_v9 = vld [vmem:[#allocation2 + $0x70] sm:$0xff] }
 0x140   : > { %v849_v10 = vld [vmem:[#allocation2 + $0xf0] sm:$0xff]  ;;  %v1206_v11 = vpack.c.bf16 %v833_v9, %v833_v9 }
 0x141   : > { %v1222_v12 = vpack.c.bf16 %v849_v10, %v849_v10 }
 0x142   : > { %994 = vst.msk [vmem:[%s1627_s29 + $0x38] sm:$0xf] %vm979_vm1, %v1206_v11 }
 0x143   : > { %v834_v13 = vld [vmem:[#allocation2 + $0x78] sm:$0xff]  ;;  %1010 = vst.msk [vmem:[%s1627_s29 + $0x78] sm:$0xf] %vm979_vm1, %v1222_v12 }
 0x144   : > { %v850_v14 = vld [vmem:[#allocation2 + $0xf8] sm:$0xff]  ;;  %v1207_v15 = vpack.c.bf16 %v834_v13, %v834_v13 }
 0x145   : > { %v1223_v16 = vpack.c.bf16 %v850_v14, %v850_v14 }
 0x146   : > { %995 = vst.msk [vmem:[%s1627_s29 + $0x3c] sm:$0xf] %vm979_vm1, %v1207_v15 }
 0x147   : > { %1011 = vst.msk [vmem:[%s1627_s29 + $0x7c] sm:$0xf] %vm979_vm1, %v1223_v16 }
 0x148 PF: > { %s12_s11 = sadd.s32 1, %s1463_s11   ;;  %s1733_s9 = smov %s1459_s10 }
 0x149   : > { %p9_p5 = scmp.ge.s32.totalorder %s12_s11, 4   ;;  %s1734_s10 = smov %s1736_s12 }
 0x14b   :  { %11 = sbr.rel (!%p9_p5) target bundleno = 2 (0x2), region = 69 }

// kernel: gcn_forward.5
= control target key start
LH: loop header
LB: loop body
LE: loop exit
PB: predicated region body
PF: predicated region fallthrough
CT: control target
= control target key end

     0   :  { %s2124_s12 = smov 0   ;;  %s2126_s13 = smov 0   ;;  %s2860_s0 = inlined_call_operand.vmem [shape: bf16[512,512], index: 0, kind: input, shape index: {}]   ;;  %s2861_s1 = inlined_call_operand.vmem [shape: bf16[512,128], index: 1, kind: input, shape index: {}]   ;;  %s2862_s2 = inlined_call_operand.vmem [shape: f32[1,128], index: 2, kind: input, shape index: {}]   ;;  %s2863_s3 = inlined_call_operand.vmem [shape: f32[512,128], index: 3, kind: output, shape index: {}]  }
   0x1   :  { %s2128_s14 = smov 0   ;;  %s2130_s15 = smov 0  }
   0x2   :  { %s2132_s16 = smov 0   ;;  %s2134_s17 = smov 0  }
   0x3   :  { %s2136_s18 = smov 0  }
   0x4 LB: > { %s22_s19 = sadd.s32 1, %s2093_s16  ;;  %s25_s20 = sadd.s32 1, %s2097_s17  ;;  %s2101_s18 = sphi %s2136_s18, %s13_s18   ;;  %s2097_s17 = sphi %s2134_s17, %s2869_s17   ;;  %s2093_s16 = sphi %s2132_s16, %s2868_s16   ;;  %s2089_s15 = sphi %s2130_s15, %s2867_s15   ;;  %s2085_s14 = sphi %s2128_s14, %s2866_s14   ;;  %s2081_s13 = sphi %s2126_s13, %s2865_s13   ;;  %s2077_s12 = sphi %s2124_s12, %s2864_s12  }
   0x5   : > { %p23_p0 = scmp.ge.s32.totalorder %s22_s19, 2  ;;  %p41_p1 = scmp.ne.s32.totalorder %s2081_s13, %s2077_s12 }
   0x6   : > { %p42_p2 = scmp.eq.s32.totalorder %s2101_s18, 0  ;;  %s34_s24 = sadd.s32 1, %s2081_s13 }
   0x7   : > { %s2871_s19 = smov (%p23_p0, %s22_s19), 0  ;;  %s2873_s20 = smov (!%p23_p0, %s25_s20), %s2097_s17 }
   0x8   : > { %p43_p3 = por %p42_p2, %p41_p1  ;;  %p27_p4 = scmp.ge.s32.totalorder %s2873_s20, 2 }
   0x9   : > { %s30_s21 = ssub.s32 %s2093_s16, %s2871_s19  ;;  %p1604_p6 = scmp.ge.s32.totalorder %s2101_s18, 4 }
   0xa   : > { %s2875_s20 = smov (%p27_p4, %s2873_s20), 0 }
   0xb   : > { %s29_s22 = ssub.s32 %s2097_s17, %s2875_s20  ;;  %143 = sbr.rel (%p1604_p6) target bundleno = 41 (0x29), region = 20 }
   0xc   : > { %s31_s23 = sor.u32 %s30_s21, %s29_s22 }
   0xd   : > { %p32_p5 = scmp.eq.s32.totalorder %s31_s23, 0 }
   0xf   : > { %s2175_s25 = scalar_select %p32_p5, %s2081_s13, %s34_s24  }
  0x12   : > { %146 = sbr.rel (!%p43_p3) target bundleno = 41 (0x29), region = 24  ;;  %s148_s26 = sand.u32 (%p43_p3), 1, %s2081_s13  }
  0x13   : > { %s1607_s27 = sshll.u32 (%p43_p3), %s2093_s16, 1  ;;  %s1605_s28 = sshll.u32 (%p43_p3), %s148_s26, 8 }
  0x14   : > { %s1669_s29 = sshll.u32 (%p43_p3), %s2097_s17, 7  ;;  %s2189_s8 = scalar_lea.vmem (%p43_p3), [#allocation3], %s1605_s28 }
  0x15   : > { %s154_s30 = sadd.s32 (%p43_p3), %s1669_s29, %s1607_s27 }
  0x16   : > { %s1609_s4 = sshll.u32 (%p43_p3), %s154_s30, 2 }
  0x17   : > { %s2184_s7 = scalar_lea.vmem (%p43_p3), %s2860_s0, %s1609_s4 }
  0x18   : > { %v246_v0 = vld [vmem:[%s2184_s7] sm:$0xff] (%p43_p3)  ;;  %v248_v1 = vld [vmem:[%s2184_s7 + $0x10] sm:$0xff] (%p43_p3) }
  0x19   : > { %v250_v2 = vld [vmem:[%s2184_s7 + $0x20] sm:$0xff]  ;;  %247 = vst [vmem:[%s2189_s8] sm:$0xff] %v246_v0  ;;  %249 = vst [vmem:[%s2189_s8 + $0x8] sm:$0xff] %v248_v1  ;;  %v252_v3 = vld [vmem:[%s2184_s7 + $0x30] sm:$0xff] }
  0x1a   : > { %251 = vst [vmem:[%s2189_s8 + $0x10] sm:$0xff] %v250_v2  ;;  %v254_v4 = vld [vmem:[%s2184_s7 + $0x40] sm:$0xff]  ;;  %v256_v5 = vld [vmem:[%s2184_s7 + $0x50] sm:$0xff]  ;;  %253 = vst [vmem:[%s2189_s8 + $0x18] sm:$0xff] %v252_v3 }
  0x1b   : > { %255 = vst [vmem:[%s2189_s8 + $0x20] sm:$0xff] %v254_v4  ;;  %257 = vst [vmem:[%s2189_s8 + $0x28] sm:$0xff] %v256_v5  ;;  %v258_v6 = vld [vmem:[%s2184_s7 + $0x60] sm:$0xff]  ;;  %v260_v7 = vld [vmem:[%s2184_s7 + $0x70] sm:$0xff] }
  0x1c   : > { %v262_v8 = vld [vmem:[%s2184_s7 + $0x80] sm:$0xff]  ;;  %259 = vst [vmem:[%s2189_s8 + $0x30] sm:$0xff] %v258_v6  ;;  %261 = vst [vmem:[%s2189_s8 + $0x38] sm:$0xff] %v260_v7  ;;  %v264_v9 = vld [vmem:[%s2184_s7 + $0x90] sm:$0xff] }
  0x1d   : > { %263 = vst [vmem:[%s2189_s8 + $0x40] sm:$0xff] %v262_v8  ;;  %v266_v10 = vld [vmem:[%s2184_s7 + $0xa0] sm:$0xff]  ;;  %v268_v11 = vld [vmem:[%s2184_s7 + $0xb0] sm:$0xff]  ;;  %265 = vst [vmem:[%s2189_s8 + $0x48] sm:$0xff] %v264_v9 }
  0x1e   : > { %267 = vst [vmem:[%s2189_s8 + $0x50] sm:$0xff] %v266_v10  ;;  %269 = vst [vmem:[%s2189_s8 + $0x58] sm:$0xff] %v268_v11  ;;  %v270_v12 = vld [vmem:[%s2184_s7 + $0xc0] sm:$0xff]  ;;  %v272_v13 = vld [vmem:[%s2184_s7 + $0xd0] sm:$0xff] }
  0x1f   : > { %v274_v14 = vld [vmem:[%s2184_s7 + $0xe0] sm:$0xff]  ;;  %271 = vst [vmem:[%s2189_s8 + $0x60] sm:$0xff] %v270_v12  ;;  %273 = vst [vmem:[%s2189_s8 + $0x68] sm:$0xff] %v272_v13  ;;  %v276_v15 = vld [vmem:[%s2184_s7 + $0xf0] sm:$0xff] }
  0x20   : > { %275 = vst [vmem:[%s2189_s8 + $0x70] sm:$0xff] %v274_v14  ;;  %v278_v16 = vld [vmem:[%s2184_s7 + $0x100] sm:$0xff]  ;;  %v280_v17 = vld [vmem:[%s2184_s7 + $0x110] sm:$0xff]  ;;  %277 = vst [vmem:[%s2189_s8 + $0x78] sm:$0xff] %v276_v15 }
  0x21   : > { %279 = vst [vmem:[%s2189_s8 + $0x80] sm:$0xff] %v278_v16  ;;  %281 = vst [vmem:[%s2189_s8 + $0x88] sm:$0xff] %v280_v17  ;;  %v282_v18 = vld [vmem:[%s2184_s7 + $0x120] sm:$0xff]  ;;  %v284_v19 = vld [vmem:[%s2184_s7 + $0x130] sm:$0xff] }
  0x22   : > { %v286_v20 = vld [vmem:[%s2184_s7 + $0x140] sm:$0xff]  ;;  %283 = vst [vmem:[%s2189_s8 + $0x90] sm:$0xff] %v282_v18  ;;  %285 = vst [vmem:[%s2189_s8 + $0x98] sm:$0xff] %v284_v19  ;;  %v288_v21 = vld [vmem:[%s2184_s7 + $0x150] sm:$0xff] }
  0x23   : > { %287 = vst [vmem:[%s2189_s8 + $0xa0] sm:$0xff] %v286_v20  ;;  %v290_v22 = vld [vmem:[%s2184_s7 + $0x160] sm:$0xff]  ;;  %v292_v23 = vld [vmem:[%s2184_s7 + $0x170] sm:$0xff]  ;;  %289 = vst [vmem:[%s2189_s8 + $0xa8] sm:$0xff] %v288_v21 }
  0x24   : > { %291 = vst [vmem:[%s2189_s8 + $0xb0] sm:$0xff] %v290_v22  ;;  %293 = vst [vmem:[%s2189_s8 + $0xb8] sm:$0xff] %v292_v23  ;;  %v294_v24 = vld [vmem:[%s2184_s7 + $0x180] sm:$0xff]  ;;  %v296_v25 = vld [vmem:[%s2184_s7 + $0x190] sm:$0xff] }
  0x25   : > { %v298_v26 = vld [vmem:[%s2184_s7 + $0x1a0] sm:$0xff]  ;;  %295 = vst [vmem:[%s2189_s8 + $0xc0] sm:$0xff] %v294_v24  ;;  %297 = vst [vmem:[%s2189_s8 + $0xc8] sm:$0xff] %v296_v25  ;;  %v300_v27 = vld [vmem:[%s2184_s7 + $0x1b0] sm:$0xff] }
  0x26   : > { %299 = vst [vmem:[%s2189_s8 + $0xd0] sm:$0xff] %v298_v26  ;;  %v302_v28 = vld [vmem:[%s2184_s7 + $0x1c0] sm:$0xff]  ;;  %v304_v29 = vld [vmem:[%s2184_s7 + $0x1d0] sm:$0xff]  ;;  %301 = vst [vmem:[%s2189_s8 + $0xd8] sm:$0xff] %v300_v27 }
  0x27   : > { %303 = vst [vmem:[%s2189_s8 + $0xe0] sm:$0xff] %v302_v28  ;;  %305 = vst [vmem:[%s2189_s8 + $0xe8] sm:$0xff] %v304_v29  ;;  %v306_v30 = vld [vmem:[%s2184_s7 + $0x1e0] sm:$0xff]  ;;  %v308_v31 = vld [vmem:[%s2184_s7 + $0x1f0] sm:$0xff] }
  0x28   : > { %307 = vst [vmem:[%s2189_s8 + $0xf0] sm:$0xff] %v306_v30  ;;  %309 = vst [vmem:[%s2189_s8 + $0xf8] sm:$0xff] %v308_v31 }
  0x29 PF: > { %p1610_p7 = scmp.ge.s32.totalorder %s2101_s18, 1  ;;  %p323_p8 = scmp.lt.s32.totalorder %s2101_s18, 5 }
  0x2b   : > { %p324_p9 = pnand %p1610_p7, %p323_p8 }
  0x2c   : > { %s330_s9 = sand.u32 (!%p324_p9), 1, %s2077_s12   ;;  %s1612_s10 = sshll.u32 (!%p324_p9), %s2085_s14, 5 }
  0x2d   : > { %327 = sbr.rel (%p324_p9) target bundleno = 744 (0x2e8), region = 66  ;;  %s1611_s11 = sshll.u32 (!%p324_p9), %s330_s9, 8 }
  0x2e   : > { %p361_p10 = scmp.lt.s32.totalorder (!%p324_p9), %s1612_s10, 63  ;;  %s1614_s21 = sshll.u32 (!%p324_p9), %s2089_s15, 5 }
  0x2f   : > { %p367_p11 = scmp.lt.s32.totalorder (!%p324_p9), %s1614_s21, 63  ;;  %s2267_s12 = scalar_lea.vmem (!%p324_p9), [#allocation3], %s1611_s11 }
  0x30   : > { %p1616_p12 = scmp.ne.s32.totalorder (!%p324_p9), %s2085_s14, 0 }
  0x34   : > { %s2877_s10 = smov (!%p361_p10, %s1612_s10), 63  ;;  %s2879_s21 = smov (!%p367_p11, %s1614_s21), 63 }
  0x35   : > { %s1613_s22 = sshll.u32 %s2877_s10, 2  ;;  %s1615_s27 = sshll.u32 %s2879_s21, 3  ;;  %v2103_v32 = vmov (!%p1616_p12), 0.0  }
  0x36   : > { %s2260_s26 = scalar_lea.vmem %s2861_s1, %s1613_s22  ;;  %s2265_s30 = scalar_lea.vmem %s2863_s3, %s1615_s27  ;;  %377 = vst [vmem:[#allocation2] sm:$0xff] (!%p1616_p12), %v2103_v32  ;;  %378 = vst [vmem:[#allocation2 + $0x8] sm:$0xff] (!%p1616_p12), %v2103_v32 }
  0x37   : > { %376 = sbr.rel (%p1616_p12) target bundleno = 70 (0x46), region = 74  ;;  %379 = vst [vmem:[#allocation2 + $0x10] sm:$0xff] (!%p1616_p12), %v2103_v32  ;;  %380 = vst [vmem:[#allocation2 + $0x18] sm:$0xff] (!%p1616_p12), %v2103_v32 }
  0x38   : > { %381 = vst [vmem:[#allocation2 + $0x20] sm:$0xff] (!%p1616_p12), %v2103_v32  ;;  %382 = vst [vmem:[#allocation2 + $0x28] sm:$0xff] (!%p1616_p12), %v2103_v32 }
  0x39   : > { %383 = vst [vmem:[#allocation2 + $0x30] sm:$0xff] (!%p1616_p12), %v2103_v32  ;;  %384 = vst [vmem:[#allocation2 + $0x38] sm:$0xff] (!%p1616_p12), %v2103_v32 }
  0x3a   : > { %385 = vst [vmem:[#allocation2 + $0x40] sm:$0xff] (!%p1616_p12), %v2103_v32  ;;  %386 = vst [vmem:[#allocation2 + $0x48] sm:$0xff] (!%p1616_p12), %v2103_v32 }
  0x3b   : > { %387 = vst [vmem:[#allocation2 + $0x50] sm:$0xff] (!%p1616_p12), %v2103_v32  ;;  %388 = vst [vmem:[#allocation2 + $0x58] sm:$0xff] (!%p1616_p12), %v2103_v32 }
  0x3c   : > { %389 = vst [vmem:[#allocation2 + $0x60] sm:$0xff] (!%p1616_p12), %v2103_v32  ;;  %390 = vst [vmem:[#allocation2 + $0x68] sm:$0xff] (!%p1616_p12), %v2103_v32 }
  0x3d   : > { %391 = vst [vmem:[#allocation2 + $0x70] sm:$0xff] (!%p1616_p12), %v2103_v32  ;;  %392 = vst [vmem:[#allocation2 + $0x78] sm:$0xff] (!%p1616_p12), %v2103_v32 }
  0x3e   : > { %393 = vst [vmem:[#allocation2 + $0x80] sm:$0xff] %v2103_v32  ;;  %394 = vst [vmem:[#allocation2 + $0x88] sm:$0xff] %v2103_v32 }
  0x3f   : > { %395 = vst [vmem:[#allocation2 + $0x90] sm:$0xff] %v2103_v32  ;;  %396 = vst [vmem:[#allocation2 + $0x98] sm:$0xff] %v2103_v32 }
  0x40   : > { %397 = vst [vmem:[#allocation2 + $0xa0] sm:$0xff] %v2103_v32  ;;  %398 = vst [vmem:[#allocation2 + $0xa8] sm:$0xff] %v2103_v32 }
  0x41   : > { %399 = vst [vmem:[#allocation2 + $0xb0] sm:$0xff] %v2103_v32  ;;  %400 = vst [vmem:[#allocation2 + $0xb8] sm:$0xff] %v2103_v32 }
  0x42   : > { %401 = vst [vmem:[#allocation2 + $0xc0] sm:$0xff] %v2103_v32  ;;  %402 = vst [vmem:[#allocation2 + $0xc8] sm:$0xff] %v2103_v32 }
  0x43   : > { %403 = vst [vmem:[#allocation2 + $0xd0] sm:$0xff] %v2103_v32  ;;  %404 = vst [vmem:[#allocation2 + $0xd8] sm:$0xff] %v2103_v32 }
  0x44   : > { %405 = vst [vmem:[#allocation2 + $0xe0] sm:$0xff] %v2103_v32  ;;  %406 = vst [vmem:[#allocation2 + $0xe8] sm:$0xff] %v2103_v32 }
  0x45   : > { %407 = vst [vmem:[#allocation2 + $0xf0] sm:$0xff] %v2103_v32  ;;  %408 = vst [vmem:[#allocation2 + $0xf8] sm:$0xff] %v2103_v32 }
  0x46 PF: > { %v1855_v33 = vld [vmem:[%s2260_s26 + $0x40] sm:$0xff]   ;;  %v1857_v35 = vld [vmem:[%s2260_s26 + $0x48] sm:$0xff]   ;;  %v1859_v37 = vld [vmem:[%s2260_s26 + $0x50] sm:$0xff]   ;;  %p1665_p13 = scmp.ne.s32.totalorder %s2085_s14, 1 }
  0x47   : > { %v1856_v34 = vld [vmem:[%s2260_s26] sm:$0xff]   ;;  %1670 = vmatprep.subr.bf16.mxu0 %v1855_v33  ;;  %1782 = vmatprep.subr.bf16.mxu1 %v1855_v33  ;;  %v1858_v36 = vld [vmem:[%s2260_s26 + $0x8] sm:$0xff]   ;;  %v1860_v38 = vld [vmem:[%s2260_s26 + $0x10] sm:$0xff]  }
  0x48   : > { %1671 = vmatpush3.bf16.msra.mxu0 %v1856_v34  ;;  %1790 = vmatpush3.bf16.msra.mxu1 %v1856_v34  ;;  %v1861_v39 = vld [vmem:[%s2260_s26 + $0x58] sm:$0xff]   ;;  %v1863_v41 = vld [vmem:[%s2260_s26 + $0x60] sm:$0xff]   ;;  %v1865_v43 = vld [vmem:[%s2260_s26 + $0x68] sm:$0xff]  }
  0x49   : > { %1672 = vmatprep.subr.bf16.mxu0 %v1857_v35  ;;  %1783 = vmatprep.subr.bf16.mxu1 %v1857_v35  ;;  %v1862_v40 = vld [vmem:[%s2260_s26 + $0x18] sm:$0xff]   ;;  %v1864_v42 = vld [vmem:[%s2260_s26 + $0x20] sm:$0xff]   ;;  %v1866_v46 = vld [vmem:[%s2260_s26 + $0x28] sm:$0xff]  }
  0x4a   : > { %v1873_v44 = vld [vmem:[%s2267_s12 + $0x4] ss:$8 sps:$4 sm:$0xff]   ;;  %v1867_v47 = vld [vmem:[%s2260_s26 + $0x70] sm:$0xff]   ;;  %v1869_v49 = vld [vmem:[%s2260_s26 + $0x78] sm:$0xff]  }
  0x4b   : > { %v1876_v45 = vld [vmem:[%s2267_s12 + $0x84] ss:$8 sps:$4 sm:$0xff]   ;;  %793 = vmatprep.mubr.bf16.mxu0 %v1873_v44  ;;  %v1868_v48 = vld [vmem:[%s2260_s26 + $0x30] sm:$0xff]   ;;  %v1870_v50 = vld [vmem:[%s2260_s26 + $0x38] sm:$0xff]  }
  0x4c   : > { %1673 = vmatpush3.bf16.msra.mxu0 %v1858_v36  ;;  %1791 = vmatpush3.bf16.msra.mxu1 %v1858_v36  ;;  %v1871_v51 = vld [vmem:[%s2267_s12] ss:$8 sps:$4 sm:$0xff]   ;;  %v1877_v53 = vld [vmem:[%s2267_s12 + $0x14] ss:$8 sps:$4 sm:$0xff]   ;;  %v1881_v55 = vld [vmem:[%s2267_s12 + $0x10] ss:$8 sps:$4 sm:$0xff]  }
  0x4d   : > { %1674 = vmatprep.subr.bf16.mxu0 %v1859_v37  ;;  %1784 = vmatprep.subr.bf16.mxu1 %v1859_v37  ;;  %v1874_v52 = vld [vmem:[%s2267_s12 + $0x80] ss:$8 sps:$4 sm:$0xff]   ;;  %v1879_v54 = vld [vmem:[%s2267_s12 + $0x94] ss:$8 sps:$4 sm:$0xff]   ;;  %v1882_v56 = vld [vmem:[%s2267_s12 + $0x90] ss:$8 sps:$4 sm:$0xff]  }
  0x4e   : > { %857 = vmatprep.mubr.bf16.mxu1 %v1876_v45  ;;  %v1883_v57 = vld [vmem:[%s2267_s12 + $0x24] ss:$8 sps:$4 sm:$0xff]   ;;  %v1887_v59 = vld [vmem:[%s2267_s12 + $0x20] ss:$8 sps:$4 sm:$0xff]   ;;  %v1889_v61 = vld [vmem:[%s2267_s12 + $0x34] ss:$8 sps:$4 sm:$0xff]  }
  0x4f   : > { %v1885_v58 = vld [vmem:[%s2267_s12 + $0xa4] ss:$8 sps:$4 sm:$0xff]   ;;  %v1888_v60 = vld [vmem:[%s2267_s12 + $0xa0] ss:$8 sps:$4 sm:$0xff]   ;;  %v1891_v62 = vld [vmem:[%s2267_s12 + $0xb4] ss:$8 sps:$4 sm:$0xff]  }
  0x50   : > { %1675 = vmatpush3.bf16.msra.mxu0 %v1860_v38  ;;  %1792 = vmatpush3.bf16.msra.mxu1 %v1860_v38  ;;  %v1893_v63 = vld [vmem:[%s2267_s12 + $0x30] ss:$8 sps:$4 sm:$0xff]   ;;  %v1895_v1 = vld [vmem:[%s2267_s12 + $0x44] ss:$8 sps:$4 sm:$0xff]   ;;  %v1899_v3 = vld [vmem:[%s2267_s12 + $0x40] ss:$8 sps:$4 sm:$0xff]  }
  0x51   : > { %1676 = vmatprep.subr.bf16.mxu0 %v1861_v39  ;;  %1785 = vmatprep.subr.bf16.mxu1 %v1861_v39  ;;  %v1894_v0 = vld [vmem:[%s2267_s12 + $0xb0] ss:$8 sps:$4 sm:$0xff]   ;;  %v1897_v2 = vld [vmem:[%s2267_s12 + $0xc4] ss:$8 sps:$4 sm:$0xff]   ;;  %v1900_v4 = vld [vmem:[%s2267_s12 + $0xc0] ss:$8 sps:$4 sm:$0xff]  }
  0x52   : > { %v1901_v5 = vld [vmem:[%s2267_s12 + $0x54] ss:$8 sps:$4 sm:$0xff]   ;;  %v1905_v7 = vld [vmem:[%s2267_s12 + $0x50] ss:$8 sps:$4 sm:$0xff]   ;;  %v1907_v9 = vld [vmem:[%s2267_s12 + $0x64] ss:$8 sps:$4 sm:$0xff]  }
  0x53   : > { %v1903_v6 = vld [vmem:[%s2267_s12 + $0xd4] ss:$8 sps:$4 sm:$0xff]   ;;  %v1906_v8 = vld [vmem:[%s2267_s12 + $0xd0] ss:$8 sps:$4 sm:$0xff]   ;;  %v1909_v10 = vld [vmem:[%s2267_s12 + $0xe4] ss:$8 sps:$4 sm:$0xff]  }
  0x54   : > { %1677 = vmatpush3.bf16.msra.mxu0 %v1862_v40  ;;  %1793 = vmatpush3.bf16.msra.mxu1 %v1862_v40  ;;  %v1911_v11 = vld [vmem:[%s2267_s12 + $0x60] ss:$8 sps:$4 sm:$0xff]   ;;  %v1913_v13 = vld [vmem:[%s2267_s12 + $0x74] ss:$8 sps:$4 sm:$0xff]   ;;  %v1917_v15 = vld [vmem:[%s2267_s12 + $0x70] ss:$8 sps:$4 sm:$0xff]  }
  0x55   : > { %1678 = vmatprep.subr.bf16.mxu0 %v1863_v41  ;;  %1786 = vmatprep.subr.bf16.mxu1 %v1863_v41  ;;  %v1912_v12 = vld [vmem:[%s2267_s12 + $0xe0] ss:$8 sps:$4 sm:$0xff]   ;;  %v1915_v14 = vld [vmem:[%s2267_s12 + $0xf4] ss:$8 sps:$4 sm:$0xff]   ;;  %v1918_v16 = vld [vmem:[%s2267_s12 + $0xf0] ss:$8 sps:$4 sm:$0xff]  }
  0x56   : > { %v409_v19 = vld [vmem:[#allocation2] sm:$0xff]  ;;  %v410_v27 = vld [vmem:[#allocation2 + $0x8] sm:$0xff]  ;;  %v411_v39 = vld [vmem:[#allocation2 + $0x10] sm:$0xff] }
  0x57   : > { %v425_v21 = vld [vmem:[#allocation2 + $0x80] sm:$0xff]  ;;  %v426_v29 = vld [vmem:[#allocation2 + $0x88] sm:$0xff]  ;;  %v427_v41 = vld [vmem:[#allocation2 + $0x90] sm:$0xff] }
  0x58   : > { %1679 = vmatpush3.bf16.msra.mxu0 %v1864_v42  ;;  %1794 = vmatpush3.bf16.msra.mxu1 %v1864_v42 }
  0x59   : > { %1680 = vmatprep.subr.bf16.mxu0 %v1865_v43  ;;  %1787 = vmatprep.subr.bf16.mxu1 %v1865_v43 }
  0x5c   : > { %1681 = vmatpush3.bf16.msra.mxu0 %v1866_v46  ;;  %1795 = vmatpush3.bf16.msra.mxu1 %v1866_v46 }
  0x5d   : > { %1682 = vmatprep.subr.bf16.mxu0 %v1867_v47  ;;  %1788 = vmatprep.subr.bf16.mxu1 %v1867_v47  ;;  %v412_v47 = vld [vmem:[#allocation2 + $0x18] sm:$0xff] }
  0x60   : > { %1683 = vmatpush3.bf16.msra.mxu0 %v1868_v48  ;;  %1796 = vmatpush3.bf16.msra.mxu1 %v1868_v48 }
  0x61   : > { %1684 = vmatprep.subr.bf16.mxu0 %v1869_v49  ;;  %1789 = vmatprep.subr.bf16.mxu1 %v1869_v49  ;;  %v428_v49 = vld [vmem:[#allocation2 + $0x98] sm:$0xff] }
  0x64   : > { %1685 = vmatpush3.bf16.msra.mxu0 %v1870_v50  ;;  %1797 = vmatpush3.bf16.msra.mxu1 %v1870_v50 }
  0x67   : > { %794 = vmatmul.mubr.bf16.vlgmr.msra.gmra.mrb[0].mxu0 %v1871_v51  ;;  %858 = vmatmul.mubr.bf16.vlgmr.msra.gmra.mrb[0].mxu1 %v1874_v52 }
  0x68   : > { %801 = vmatprep.mubr.bf16.mxu0 %v1877_v53  ;;  %865 = vmatprep.mubr.bf16.mxu1 %v1879_v54 }
  0x6f   : > { %802 = vmatmul.mubr.bf16.gmra.mrb[4].mxu0 %v1881_v55  ;;  %866 = vmatmul.mubr.bf16.gmra.mrb[4].mxu1 %v1882_v56 }
  0x70   : > { %809 = vmatprep.mubr.bf16.mxu0 %v1883_v57  ;;  %873 = vmatprep.mubr.bf16.mxu1 %v1885_v58 }
  0x77   : > { %810 = vmatmul.mubr.bf16.gmra.mrb[8].mxu0 %v1887_v59  ;;  %874 = vmatmul.mubr.bf16.gmra.mrb[8].mxu1 %v1888_v60  ;;  %v413_v59 = vld [vmem:[#allocation2 + $0x20] sm:$0xff] }
  0x78   : > { %817 = vmatprep.mubr.bf16.mxu0 %v1889_v61  ;;  %881 = vmatprep.mubr.bf16.mxu1 %v1891_v62  ;;  %v429_v61 = vld [vmem:[#allocation2 + $0xa0] sm:$0xff] }
  0x7f   : > { %818 = vmatmul.mubr.bf16.gmra.mrb[12].mxu0 %v1893_v63  ;;  %882 = vmatmul.mubr.bf16.gmra.mrb[12].mxu1 %v1894_v0 }
  0x80   : > { %825 = vmatprep.mubr.bf16.mxu0 %v1895_v1  ;;  %889 = vmatprep.mubr.bf16.mxu1 %v1897_v2 }
  0x87   : > { %826 = vmatmul.mubr.bf16.gmra.mrb[16].mxu0 %v1899_v3  ;;  %890 = vmatmul.mubr.bf16.gmra.mrb[16].mxu1 %v1900_v4  ;;  %v414_v3 = vld [vmem:[#allocation2 + $0x28] sm:$0xff] }
  0x88   : > { %833 = vmatprep.mubr.bf16.mxu0 %v1901_v5  ;;  %897 = vmatprep.mubr.bf16.mxu1 %v1903_v6  ;;  %v430_v5 = vld [vmem:[#allocation2 + $0xa8] sm:$0xff] }
  0x8f   : > { %834 = vmatmul.mubr.bf16.gmra.mrb[20].mxu0 %v1905_v7  ;;  %898 = vmatmul.mubr.bf16.gmra.mrb[20].mxu1 %v1906_v8 }
  0x90   : > { %841 = vmatprep.mubr.bf16.mxu0 %v1907_v9  ;;  %905 = vmatprep.mubr.bf16.mxu1 %v1909_v10 }
  0x97   : > { %842 = vmatmul.mubr.bf16.gmra.mrb[24].mxu0 %v1911_v11  ;;  %906 = vmatmul.mubr.bf16.gmra.mrb[24].mxu1 %v1912_v12 }
  0x98   : > { %849 = vmatprep.mubr.bf16.mxu0 %v1913_v13  ;;  %913 = vmatprep.mubr.bf16.mxu1 %v1915_v14 }
  0x9f   : > { %850 = vmatmul.mubr.bf16.gmra.mrb[28].mxu0 %v1917_v15  ;;  %914 = vmatmul.mubr.bf16.gmra.mrb[28].mxu1 %v1918_v16  ;;  %v415_v15 = vld [vmem:[#allocation2 + $0x30] sm:$0xff] }
 0x13a   : > { %v1686_v17 = vpop.f32.mrb[0].mxu0  ;;  %v1734_v18 = vpop.f32.mrb[0].mxu1 }
 0x13b   : > { %v1687_v20 = vpop.f32.mrb[1].mxu0  ;;  %v1735_v22 = vpop.f32.mrb[1].mxu1 }
 0x13c   : > { %v1688_v23 = vadd.f32 %v1687_v20, %v1686_v17  ;;  %v1736_v24 = vadd.f32 %v1735_v22, %v1734_v18  ;;  %v1689_v25 = vpop.f32.mrb[2].mxu0  ;;  %v1737_v26 = vpop.f32.mrb[2].mxu1  ;;  %v431_v17 = vld [vmem:[#allocation2 + $0xb0] sm:$0xff] }
 0x13d   : > { %v1690_v28 = vpop.f32.mrb[3].mxu0  ;;  %v1738_v30 = vpop.f32.mrb[3].mxu1 }
 0x13e   : > { %v922_v31 = vadd.f32 %v1688_v23, %v409_v19  ;;  %v938_v32 = vadd.f32 %v1736_v24, %v425_v21  ;;  %v1691_v33 = vadd.f32 %v1690_v28, %v1689_v25  ;;  %v1739_v34 = vadd.f32 %v1738_v30, %v1737_v26  ;;  %v416_v23 = vld [vmem:[#allocation2 + $0x38] sm:$0xff] }
 0x13f   : > { %v432_v25 = vld [vmem:[#allocation2 + $0xb8] sm:$0xff] }
 0x140   : > { %954 = vst [vmem:[#allocation2] sm:$0xff] %v922_v31  ;;  %970 = vst [vmem:[#allocation2 + $0x80] sm:$0xff] %v938_v32  ;;  %v923_v35 = vadd.f32 %v1691_v33, %v410_v27  ;;  %v939_v36 = vadd.f32 %v1739_v34, %v426_v29 }
 0x142   : > { %955 = vst [vmem:[#allocation2 + $0x8] sm:$0xff] %v923_v35  ;;  %971 = vst [vmem:[#allocation2 + $0x88] sm:$0xff] %v939_v36  ;;  %v1692_v37 = vpop.f32.mrb[4].mxu0  ;;  %v1740_v38 = vpop.f32.mrb[4].mxu1  ;;  %v417_v35 = vld [vmem:[#allocation2 + $0x40] sm:$0xff] }
 0x143   : > { %v1693_v40 = vpop.f32.mrb[5].mxu0  ;;  %v1741_v42 = vpop.f32.mrb[5].mxu1 }
 0x144   : > { %v1694_v43 = vadd.f32 %v1693_v40, %v1692_v37  ;;  %v1742_v44 = vadd.f32 %v1741_v42, %v1740_v38  ;;  %v1695_v45 = vpop.f32.mrb[6].mxu0  ;;  %v1743_v46 = vpop.f32.mrb[6].mxu1  ;;  %v433_v37 = vld [vmem:[#allocation2 + $0xc0] sm:$0xff] }
 0x145   : > { %v1696_v48 = vpop.f32.mrb[7].mxu0  ;;  %v1744_v50 = vpop.f32.mrb[7].mxu1 }
 0x146   : > { %v924_v51 = vadd.f32 %v1694_v43, %v411_v39  ;;  %v940_v52 = vadd.f32 %v1742_v44, %v427_v41  ;;  %v1697_v53 = vadd.f32 %v1696_v48, %v1695_v45  ;;  %v1745_v54 = vadd.f32 %v1744_v50, %v1743_v46  ;;  %v418_v43 = vld [vmem:[#allocation2 + $0x48] sm:$0xff] }
 0x147   : > { %v434_v45 = vld [vmem:[#allocation2 + $0xc8] sm:$0xff] }
 0x148   : > { %956 = vst [vmem:[#allocation2 + $0x10] sm:$0xff] %v924_v51  ;;  %972 = vst [vmem:[#allocation2 + $0x90] sm:$0xff] %v940_v52  ;;  %v925_v55 = vadd.f32 %v1697_v53, %v412_v47  ;;  %v941_v56 = vadd.f32 %v1745_v54, %v428_v49 }
 0x14a   : > { %957 = vst [vmem:[#allocation2 + $0x18] sm:$0xff] %v925_v55  ;;  %973 = vst [vmem:[#allocation2 + $0x98] sm:$0xff] %v941_v56  ;;  %v1698_v57 = vpop.f32.mrb[8].mxu0  ;;  %v1746_v58 = vpop.f32.mrb[8].mxu1  ;;  %v419_v55 = vld [vmem:[#allocation2 + $0x50] sm:$0xff] }
 0x14b   : > { %v1699_v60 = vpop.f32.mrb[9].mxu0  ;;  %v1747_v62 = vpop.f32.mrb[9].mxu1 }
 0x14c   : > { %v1700_v63 = vadd.f32 %v1699_v60, %v1698_v57  ;;  %v1748_v0 = vadd.f32 %v1747_v62, %v1746_v58  ;;  %v1701_v1 = vpop.f32.mrb[10].mxu0  ;;  %v1749_v2 = vpop.f32.mrb[10].mxu1  ;;  %v435_v57 = vld [vmem:[#allocation2 + $0xd0] sm:$0xff] }
 0x14d   : > { %v1702_v4 = vpop.f32.mrb[11].mxu0  ;;  %v1750_v6 = vpop.f32.mrb[11].mxu1 }
 0x14e   : > { %v926_v7 = vadd.f32 %v1700_v63, %v413_v59  ;;  %v942_v8 = vadd.f32 %v1748_v0, %v429_v61  ;;  %v1703_v9 = vadd.f32 %v1702_v4, %v1701_v1  ;;  %v1751_v10 = vadd.f32 %v1750_v6, %v1749_v2  ;;  %v420_v63 = vld [vmem:[#allocation2 + $0x58] sm:$0xff] }
 0x14f   : > { %v436_v1 = vld [vmem:[#allocation2 + $0xd8] sm:$0xff] }
 0x150   : > { %958 = vst [vmem:[#allocation2 + $0x20] sm:$0xff] %v926_v7  ;;  %974 = vst [vmem:[#allocation2 + $0xa0] sm:$0xff] %v942_v8  ;;  %v927_v11 = vadd.f32 %v1703_v9, %v414_v3  ;;  %v943_v12 = vadd.f32 %v1751_v10, %v430_v5 }
 0x152   : > { %959 = vst [vmem:[#allocation2 + $0x28] sm:$0xff] %v927_v11  ;;  %975 = vst [vmem:[#allocation2 + $0xa8] sm:$0xff] %v943_v12  ;;  %v1704_v13 = vpop.f32.mrb[12].mxu0  ;;  %v1752_v14 = vpop.f32.mrb[12].mxu1  ;;  %v421_v11 = vld [vmem:[#allocation2 + $0x60] sm:$0xff] }
 0x153   : > { %v1705_v16 = vpop.f32.mrb[13].mxu0  ;;  %v1753_v18 = vpop.f32.mrb[13].mxu1 }
 0x154   : > { %v1706_v19 = vadd.f32 %v1705_v16, %v1704_v13  ;;  %v1754_v20 = vadd.f32 %v1753_v18, %v1752_v14  ;;  %v1707_v21 = vpop.f32.mrb[14].mxu0  ;;  %v1755_v22 = vpop.f32.mrb[14].mxu1  ;;  %v437_v13 = vld [vmem:[#allocation2 + $0xe0] sm:$0xff] }
 0x155   : > { %v1708_v24 = vpop.f32.mrb[15].mxu0  ;;  %v1756_v26 = vpop.f32.mrb[15].mxu1 }
 0x156   : > { %v928_v27 = vadd.f32 %v1706_v19, %v415_v15  ;;  %v944_v28 = vadd.f32 %v1754_v20, %v431_v17  ;;  %v1709_v29 = vadd.f32 %v1708_v24, %v1707_v21  ;;  %v1757_v30 = vadd.f32 %v1756_v26, %v1755_v22  ;;  %v422_v19 = vld [vmem:[#allocation2 + $0x68] sm:$0xff] }
 0x157   : > { %v438_v21 = vld [vmem:[#allocation2 + $0xe8] sm:$0xff] }
 0x158   : > { %960 = vst [vmem:[#allocation2 + $0x30] sm:$0xff] %v928_v27  ;;  %976 = vst [vmem:[#allocation2 + $0xb0] sm:$0xff] %v944_v28  ;;  %v929_v31 = vadd.f32 %v1709_v29, %v416_v23  ;;  %v945_v32 = vadd.f32 %v1757_v30, %v432_v25 }
 0x15a   : > { %961 = vst [vmem:[#allocation2 + $0x38] sm:$0xff] %v929_v31  ;;  %977 = vst [vmem:[#allocation2 + $0xb8] sm:$0xff] %v945_v32  ;;  %v1710_v33 = vpop.f32.mrb[16].mxu0  ;;  %v1758_v34 = vpop.f32.mrb[16].mxu1  ;;  %v423_v31 = vld [vmem:[#allocation2 + $0x70] sm:$0xff] }
 0x15b   : > { %v1711_v36 = vpop.f32.mrb[17].mxu0  ;;  %v1759_v38 = vpop.f32.mrb[17].mxu1 }
 0x15c   : > { %v1712_v39 = vadd.f32 %v1711_v36, %v1710_v33  ;;  %v1760_v40 = vadd.f32 %v1759_v38, %v1758_v34  ;;  %v1713_v41 = vpop.f32.mrb[18].mxu0  ;;  %v1761_v42 = vpop.f32.mrb[18].mxu1  ;;  %v439_v33 = vld [vmem:[#allocation2 + $0xf0] sm:$0xff] }
 0x15d   : > { %v1714_v44 = vpop.f32.mrb[19].mxu0  ;;  %v1762_v46 = vpop.f32.mrb[19].mxu1 }
 0x15e   : > { %v930_v47 = vadd.f32 %v1712_v39, %v417_v35  ;;  %v946_v48 = vadd.f32 %v1760_v40, %v433_v37  ;;  %v1715_v49 = vadd.f32 %v1714_v44, %v1713_v41  ;;  %v1763_v50 = vadd.f32 %v1762_v46, %v1761_v42  ;;  %v424_v39 = vld [vmem:[#allocation2 + $0x78] sm:$0xff] }
 0x15f   : > { %v440_v41 = vld [vmem:[#allocation2 + $0xf8] sm:$0xff] }
 0x160   : > { %962 = vst [vmem:[#allocation2 + $0x40] sm:$0xff] %v930_v47  ;;  %978 = vst [vmem:[#allocation2 + $0xc0] sm:$0xff] %v946_v48  ;;  %v931_v51 = vadd.f32 %v1715_v49, %v418_v43  ;;  %v947_v52 = vadd.f32 %v1763_v50, %v434_v45  ;;  %v990_v49 = vld [vmem:[#allocation2] sm:$0xff] (!%p1665_p13) }
 0x161   : > { %v2322_v50 = vld [vmem:[%s2862_s2] ss:$0 sm:$0xff] (!%p1665_p13) }
 0x162   : > { %963 = vst [vmem:[#allocation2 + $0x48] sm:$0xff] %v931_v51  ;;  %979 = vst [vmem:[#allocation2 + $0xc8] sm:$0xff] %v947_v52  ;;  %v1716_v53 = vpop.f32.mrb[20].mxu0  ;;  %v1764_v54 = vpop.f32.mrb[20].mxu1  ;;  %v1061_v51 = vlaneseq (!%p1665_p13)  ;;  %v992_v52 = vld [vmem:[#allocation2 + $0x10] sm:$0xff] (!%p1665_p13) }
 0x163   : > { %v1717_v56 = vpop.f32.mrb[21].mxu0  ;;  %v1765_v58 = vpop.f32.mrb[21].mxu1 }
 0x164   : > { %v1718_v59 = vadd.f32 %v1717_v56, %v1716_v53  ;;  %v1766_v60 = vadd.f32 %v1765_v58, %v1764_v54  ;;  %v1719_v61 = vpop.f32.mrb[22].mxu0  ;;  %v1767_v62 = vpop.f32.mrb[22].mxu1  ;;  %v2325_v53 = vadd.f32 (!%p1665_p13), %v2322_v50, %v990_v49  ;;  %v2328_v54 = vadd.f32 (!%p1665_p13), %v2322_v50, %v992_v52  ;;  %v993_v56 = vld [vmem:[#allocation2 + $0x18] sm:$0xff] (!%p1665_p13) }
 0x165   : > { %v1720_v0 = vpop.f32.mrb[23].mxu0  ;;  %v1768_v2 = vpop.f32.mrb[23].mxu1 }
 0x166   : > { %v932_v3 = vadd.f32 %v1718_v59, %v419_v55  ;;  %v948_v4 = vadd.f32 %v1766_v60, %v435_v57  ;;  %v1721_v5 = vadd.f32 %v1720_v0, %v1719_v61  ;;  %v1769_v6 = vadd.f32 %v1768_v2, %v1767_v62  ;;  %v991_v55 = vld [vmem:[#allocation2 + $0x8] sm:$0xff] (!%p1665_p13)  ;;  %v994_v60 = vld [vmem:[#allocation2 + $0x20] sm:$0xff] (!%p1665_p13) }
 0x167   : > { %v2330_v57 = vand.u32 (!%p1665_p13), 127, %v1061_v51  ;;  %v2333_v58 = vadd.f32 (!%p1665_p13), %v2322_v50, %v991_v55  ;;  %v2336_v59 = vadd.f32 (!%p1665_p13), %v2322_v50, %v993_v56  ;;  %v995_v61 = vld [vmem:[#allocation2 + $0x28] sm:$0xff] (!%p1665_p13)  ;;  %v2352_v2 = vadd.f32 (!%p1665_p13), %v2322_v50, %v994_v60  ;;  %v1012_v55 = vld [vmem:[#allocation2 + $0xb0] sm:$0xff] (!%p1665_p13)  ;;  %v1013_v56 = vld [vmem:[#allocation2 + $0xb8] sm:$0xff] (!%p1665_p13) }
 0x168   : > { %964 = vst [vmem:[#allocation2 + $0x50] sm:$0xff] %v932_v3  ;;  %980 = vst [vmem:[#allocation2 + $0xd0] sm:$0xff] %v948_v4  ;;  %v933_v7 = vadd.f32 %v1721_v5, %v420_v63  ;;  %v949_v8 = vadd.f32 %v1769_v6, %v436_v1  ;;  %v2355_v3 = vadd.f32 (!%p1665_p13), %v2322_v50, %v995_v61  ;;  %v996_v4 = vld [vmem:[#allocation2 + $0x30] sm:$0xff] (!%p1665_p13)  ;;  %v997_v5 = vld [vmem:[#allocation2 + $0x38] sm:$0xff] (!%p1665_p13) }
 0x169   : > { %vm1063_vm0 = vcmp.lt.s32.totalorder (!%p1665_p13), %v2330_v57, 10 }
 0x16a   : > { %965 = vst [vmem:[#allocation2 + $0x58] sm:$0xff] %v933_v7  ;;  %981 = vst [vmem:[#allocation2 + $0xd8] sm:$0xff] %v949_v8  ;;  %v1722_v9 = vpop.f32.mrb[24].mxu0  ;;  %v1770_v10 = vpop.f32.mrb[24].mxu1  ;;  %v1064_v62 = vsel (!%p1665_p13), %vm1063_vm0, %v2325_v53, -1e+30  ;;  %v2364_v8 = vadd.f32 (!%p1665_p13), %v2322_v50, %v996_v4 }
 0x16b   : > { %v1723_v12 = vpop.f32.mrb[25].mxu0  ;;  %v1771_v14 = vpop.f32.mrb[25].mxu1  ;;  %v1066_v63 = vsel (!%p1665_p13), %vm1063_vm0, %v2328_v54, -1e+30  ;;  %1096 = vmax.xlane.f32.xlu0 (!%p1665_p13), %v1064_v62  ;;  %v1065_v0 = vsel (!%p1665_p13), %vm1063_vm0, %v2333_v58, -1e+30  ;;  %v2460_v62 = vadd.f32 (!%p1665_p13), %v2322_v50, %v1012_v55 }
 0x16c   : > { %v1724_v15 = vadd.f32 %v1723_v12, %v1722_v9  ;;  %v1772_v16 = vadd.f32 %v1771_v14, %v1770_v10  ;;  %v1725_v17 = vpop.f32.mrb[26].mxu0  ;;  %v1773_v18 = vpop.f32.mrb[26].mxu1  ;;  %1100 = vmax.xlane.f32.xlu1 (!%p1665_p13), %v1066_v63  ;;  %v1067_v1 = vsel (!%p1665_p13), %vm1063_vm0, %v2336_v59, -1e+30  ;;  %v1068_v6 = vsel (!%p1665_p13), %vm1063_vm0, %v2352_v2, -1e+30 }
 0x16d   : > { %v1726_v20 = vpop.f32.mrb[27].mxu0  ;;  %v1774_v22 = vpop.f32.mrb[27].mxu1  ;;  %v1069_v7 = vsel (!%p1665_p13), %vm1063_vm0, %v2355_v3, -1e+30  ;;  %v2367_v9 = vadd.f32 (!%p1665_p13), %v2322_v50, %v997_v5  ;;  %v998_v10 = vld [vmem:[#allocation2 + $0x40] sm:$0xff] (!%p1665_p13)  ;;  %v2463_v63 = vadd.f32 (!%p1665_p13), %v2322_v50, %v1013_v56 }
 0x16e   : > { %v934_v23 = vadd.f32 %v1724_v15, %v421_v11  ;;  %v950_v24 = vadd.f32 %v1772_v16, %v437_v13  ;;  %v1727_v25 = vadd.f32 %v1726_v20, %v1725_v17  ;;  %v1775_v26 = vadd.f32 %v1774_v22, %v1773_v18  ;;  %v999_v11 = vld [vmem:[#allocation2 + $0x48] sm:$0xff] (!%p1665_p13) }
 0x16f   : > { %1098 = vmax.xlane.f32.xlu0 (!%p1665_p13), %v1065_v0  ;;  %v1070_v12 = vsel (!%p1665_p13), %vm1063_vm0, %v2364_v8, -1e+30  ;;  %v1071_v13 = vsel (!%p1665_p13), %vm1063_vm0, %v2367_v9, -1e+30  ;;  %v2376_v14 = vadd.f32 (!%p1665_p13), %v2322_v50, %v998_v10  ;;  %v2379_v15 = vadd.f32 (!%p1665_p13), %v2322_v50, %v999_v11  ;;  %v1000_v16 = vld [vmem:[#allocation2 + $0x50] sm:$0xff] (!%p1665_p13)  ;;  %v1014_v0 = vld [vmem:[#allocation2 + $0xc0] sm:$0xff] (!%p1665_p13) }
 0x170   : > { %966 = vst [vmem:[#allocation2 + $0x60] sm:$0xff] %v934_v23  ;;  %982 = vst [vmem:[#allocation2 + $0xe0] sm:$0xff] %v950_v24  ;;  %v935_v27 = vadd.f32 %v1727_v25, %v422_v19  ;;  %v951_v28 = vadd.f32 %v1775_v26, %v438_v21  ;;  %1102 = vmax.xlane.f32.xlu1 (!%p1665_p13), %v1067_v1  ;;  %v2388_v20 = vadd.f32 (!%p1665_p13), %v2322_v50, %v1000_v16  ;;  %v1015_v1 = vld [vmem:[#allocation2 + $0xc8] sm:$0xff] (!%p1665_p13)  ;;  %v1016_v10 = vld [vmem:[#allocation2 + $0xd0] sm:$0xff] (!%p1665_p13) }
 0x171   : > { %v1001_v17 = vld [vmem:[#allocation2 + $0x58] sm:$0xff] (!%p1665_p13)  ;;  %v1072_v18 = vsel (!%p1665_p13), %vm1063_vm0, %v2376_v14, -1e+30  ;;  %v1073_v19 = vsel (!%p1665_p13), %vm1063_vm0, %v2379_v15, -1e+30  ;;  %v2484_v16 = vadd.f32 (!%p1665_p13), %v2322_v50, %v1016_v10 }
 0x172   : > { %967 = vst [vmem:[#allocation2 + $0x68] sm:$0xff] %v935_v27  ;;  %983 = vst [vmem:[#allocation2 + $0xe8] sm:$0xff] %v951_v28  ;;  %v1728_v29 = vpop.f32.mrb[28].mxu0  ;;  %v1776_v30 = vpop.f32.mrb[28].mxu1  ;;  %v2391_v21 = vadd.f32 (!%p1665_p13), %v2322_v50, %v1001_v17  ;;  %v1074_v24 = vsel (!%p1665_p13), %vm1063_vm0, %v2388_v20, -1e+30 }
 0x173   : > { %v1729_v32 = vpop.f32.mrb[29].mxu0  ;;  %v1777_v34 = vpop.f32.mrb[29].mxu1  ;;  %1104 = vmax.xlane.f32.xlu0 (!%p1665_p13), %v1068_v6  ;;  %v1086_v4 = vsel (!%p1665_p13), %vm1063_vm0, %v2460_v62, -1e+30  ;;  %v1087_v5 = vsel (!%p1665_p13), %vm1063_vm0, %v2463_v63, -1e+30  ;;  %v2472_v6 = vadd.f32 (!%p1665_p13), %v2322_v50, %v1014_v0 }
 0x174   : > { %v1730_v35 = vadd.f32 %v1729_v32, %v1728_v29  ;;  %v1778_v36 = vadd.f32 %v1777_v34, %v1776_v30  ;;  %v1731_v37 = vpop.f32.mrb[30].mxu0  ;;  %v1779_v38 = vpop.f32.mrb[30].mxu1  ;;  %989 = sbr.rel (%p1665_p13) target bundleno = 744 (0x2e8), region = 78  ;;  %1106 = vmax.xlane.f32.xlu1 (!%p1665_p13), %v1069_v7  ;;  %v1075_v25 = vsel (!%p1665_p13), %vm1063_vm0, %v2391_v21, -1e+30  ;;  %v1006_v34 = vld [vmem:[#allocation2 + $0x80] sm:$0xff] (!%p1665_p13)  ;;  %v2475_v7 = vadd.f32 (!%p1665_p13), %v2322_v50, %v1015_v1 }
 0x175   : > { %v1732_v40 = vpop.f32.mrb[31].mxu0  ;;  %v1780_v42 = vpop.f32.mrb[31].mxu1  ;;  %v1017_v11 = vld [vmem:[#allocation2 + $0xd8] sm:$0xff] (!%p1665_p13) }
 0x176   : > { %v936_v43 = vadd.f32 %v1730_v35, %v423_v31  ;;  %v952_v44 = vadd.f32 %v1778_v36, %v439_v33  ;;  %v1733_v45 = vadd.f32 %v1732_v40, %v1731_v37  ;;  %v1781_v46 = vadd.f32 %v1780_v42, %v1779_v38  ;;  %v1007_v35 = vld [vmem:[#allocation2 + $0x88] sm:$0xff] (!%p1665_p13)  ;;  %v1008_v40 = vld [vmem:[#allocation2 + $0x90] sm:$0xff] (!%p1665_p13) }
 0x177   : > { %1108 = vmax.xlane.f32.xlu0 (!%p1665_p13), %v1070_v12  ;;  %v1002_v22 = vld [vmem:[#allocation2 + $0x60] sm:$0xff] (!%p1665_p13)  ;;  %v2424_v38 = vadd.f32 (!%p1665_p13), %v2322_v50, %v1006_v34  ;;  %v1088_v12 = vsel (!%p1665_p13), %vm1063_vm0, %v2472_v6, -1e+30  ;;  %v2487_v17 = vadd.f32 (!%p1665_p13), %v2322_v50, %v1017_v11 }
 0x178   : > { %968 = vst [vmem:[#allocation2 + $0x70] sm:$0xff] %v936_v43  ;;  %984 = vst [vmem:[#allocation2 + $0xf0] sm:$0xff] %v952_v44  ;;  %v937_v47 = vadd.f32 %v1733_v45, %v424_v39  ;;  %v953_v48 = vadd.f32 %v1781_v46, %v440_v41  ;;  %1110 = vmax.xlane.f32.xlu1 (!%p1665_p13), %v1071_v13  ;;  %v2400_v26 = vadd.f32 (!%p1665_p13), %v2322_v50, %v1002_v22  ;;  %v1009_v41 = vld [vmem:[#allocation2 + $0x98] sm:$0xff] (!%p1665_p13)  ;;  %v1010_v46 = vld [vmem:[#allocation2 + $0xa0] sm:$0xff] (!%p1665_p13) }
 0x179   : > { %v1003_v23 = vld [vmem:[#allocation2 + $0x68] sm:$0xff] (!%p1665_p13)  ;;  %v2427_v39 = vadd.f32 (!%p1665_p13), %v2322_v50, %v1007_v35  ;;  %v1080_v42 = vsel (!%p1665_p13), %vm1063_vm0, %v2424_v38, -1e+30  ;;  %v2436_v44 = vadd.f32 (!%p1665_p13), %v2322_v50, %v1008_v40  ;;  %v2439_v45 = vadd.f32 (!%p1665_p13), %v2322_v50, %v1009_v41 }
 0x17a   : > { %969 = vst [vmem:[#allocation2 + $0x78] sm:$0xff] %v937_v47  ;;  %985 = vst [vmem:[#allocation2 + $0xf8] sm:$0xff] %v953_v48  ;;  %v2403_v27 = vadd.f32 (!%p1665_p13), %v2322_v50, %v1003_v23  ;;  %v1076_v30 = vsel (!%p1665_p13), %vm1063_vm0, %v2400_v26, -1e+30  ;;  %v1011_v47 = vld [vmem:[#allocation2 + $0xa8] sm:$0xff] (!%p1665_p13)  ;;  %v2448_v51 = vadd.f32 (!%p1665_p13), %v2322_v50, %v1010_v46 }
 0x17b   : > { %1112 = vmax.xlane.f32.xlu0 %v1072_v18  ;;  %v1081_v43 = vsel %vm1063_vm0, %v2427_v39, -1e+30  ;;  %v1082_v48 = vsel %vm1063_vm0, %v2436_v44, -1e+30  ;;  %v1083_v49 = vsel %vm1063_vm0, %v2439_v45, -1e+30  ;;  %v2451_v52 = vadd.f32 %v2322_v50, %v1011_v47 }
 0x17c   : > { %1114 = vmax.xlane.f32.xlu1 %v1073_v19  ;;  %v1077_v31 = vsel %vm1063_vm0, %v2403_v27, -1e+30  ;;  %v1084_v60 = vsel %vm1063_vm0, %v2448_v51, -1e+30  ;;  %v1089_v13 = vsel %vm1063_vm0, %v2475_v7, -1e+30 }
 0x17d   : > { %v1085_v61 = vsel %vm1063_vm0, %v2451_v52, -1e+30  ;;  %v1018_v18 = vld [vmem:[#allocation2 + $0xe0] sm:$0xff]  ;;  %v1019_v19 = vld [vmem:[#allocation2 + $0xe8] sm:$0xff]  ;;  %v1090_v22 = vsel %vm1063_vm0, %v2484_v16, -1e+30 }
 0x17e   : > { %v1091_v23 = vsel %vm1063_vm0, %v2487_v17, -1e+30 }
 0x17f   : > { %v1004_v28 = vld [vmem:[#allocation2 + $0x70] sm:$0xff]  ;;  %1116 = vmax.xlane.f32.xlu0 %v1074_v24  ;;  %v2496_v24 = vadd.f32 %v2322_v50, %v1018_v18 }
 0x180   : > { %1118 = vmax.xlane.f32.xlu1 %v1075_v25  ;;  %v2412_v32 = vadd.f32 %v2322_v50, %v1004_v28  ;;  %v2499_v25 = vadd.f32 %v2322_v50, %v1019_v19  ;;  %v1020_v28 = vld [vmem:[#allocation2 + $0xf0] sm:$0xff] }
 0x181   : > { %v1005_v29 = vld [vmem:[#allocation2 + $0x78] sm:$0xff]  ;;  %v2508_v34 = vadd.f32 %v2322_v50, %v1020_v28 }
 0x182   : > { %v2415_v33 = vadd.f32 %v2322_v50, %v1005_v29  ;;  %v1078_v36 = vsel %vm1063_vm0, %v2412_v32, -1e+30  ;;  %v1021_v29 = vld [vmem:[#allocation2 + $0xf8] sm:$0xff] }
 0x183   : > { %1120 = vmax.xlane.f32.xlu0 %v1076_v30  ;;  %v1092_v30 = vsel %vm1063_vm0, %v2496_v24, -1e+30  ;;  %v2511_v35 = vadd.f32 %v2322_v50, %v1021_v29 }
 0x184   : > { %1122 = vmax.xlane.f32.xlu1 %v1077_v31  ;;  %v1079_v37 = vsel %vm1063_vm0, %v2415_v33, -1e+30  ;;  %v1093_v31 = vsel %vm1063_vm0, %v2499_v25, -1e+30 }
 0x187   : > { %1124 = vmax.xlane.f32.xlu0 %v1078_v36  ;;  %v1094_v36 = vsel %vm1063_vm0, %v2508_v34, -1e+30 }
 0x188   : > { %1126 = vmax.xlane.f32.xlu1 %v1079_v37  ;;  %v1095_v37 = vsel %vm1063_vm0, %v2511_v35, -1e+30 }
 0x18b   : > { %1128 = vmax.xlane.f32.xlu0 %v1080_v42 }
 0x18c   : > { %1130 = vmax.xlane.f32.xlu1 %v1081_v43 }
 0x18f   : > { %1132 = vmax.xlane.f32.xlu0 %v1082_v48 }
 0x190   : > { %1134 = vmax.xlane.f32.xlu1 %v1083_v49 }
 0x193   : > { %1136 = vmax.xlane.f32.xlu0 %v1084_v60 }
 0x194   : > { %1138 = vmax.xlane.f32.xlu1 %v1085_v61 }
 0x197   : > { %1140 = vmax.xlane.f32.xlu0 %v1086_v4 }
 0x198   : > { %1142 = vmax.xlane.f32.xlu1 %v1087_v5 }
 0x19b   : > { %1144 = vmax.xlane.f32.xlu0 %v1088_v12 }
 0x19c   : > { %1146 = vmax.xlane.f32.xlu1 %v1089_v13 }
 0x19f   : > { %1148 = vmax.xlane.f32.xlu0 %v1090_v22 }
 0x1a0   : > { %1150 = vmax.xlane.f32.xlu1 %v1091_v23 }
 0x1a3   : > { %1152 = vmax.xlane.f32.xlu0 %v1092_v30 }
 0x1a4   : > { %1154 = vmax.xlane.f32.xlu1 %v1093_v31 }
 0x1a7   : > { %1156 = vmax.xlane.f32.xlu0 %v1094_v36 }
 0x1a8   : > { %1158 = vmax.xlane.f32.xlu1 %v1095_v37 }
 0x1f8   : > { %v1097_v40 = vpop.xlane.xlu0 %1096 }
 0x1f9   : > { %v1101_v41 = vpop.xlane.xlu1 %1100  ;;  %v2520_v42 = vsub.f32 %v2325_v53, %v1097_v40 }
 0x1fa   : > { %v2523_v50 = vsub.f32 %v2328_v54, %v1101_v41 }
 0x1fb   : > { %v1192_v43 = vmul.f32 1.442695, %v2520_v42 }
 0x1fc   : > { %v1196_v46 = vmul.f32 1.442695, %v2523_v50  ;;  %v1099_v47 = vpop.xlane.xlu0 %1098 }
 0x1fd   : > { %v1103_v48 = vpop.xlane.xlu1 %1102  ;;  %1919 = vpow2.f32 %v1192_v43  ;;  %v2528_v49 = vsub.f32 %v2333_v58, %v1099_v47 }
 0x1fe   : > { %v2531_v55 = vsub.f32 %v2336_v59, %v1103_v48  ;;  %1921 = vpow2.f32 %v1196_v46 }
 0x1ff   : > { %v1194_v53 = vmul.f32 1.442695, %v2528_v49 }
 0x200   : > { %v1198_v56 = vmul.f32 1.442695, %v2531_v55  ;;  %v1105_v54 = vpop.xlane.xlu0 %1104 }
 0x201   : > { %v1107_v60 = vpop.xlane.xlu1 %1106  ;;  %1923 = vpow2.f32 %v1194_v53  ;;  %v2536_v61 = vsub.f32 %v2352_v2, %v1105_v54 }
 0x202   : > { %v2539_v0 = vsub.f32 %v2355_v3, %v1107_v60  ;;  %1925 = vpow2.f32 %v1198_v56 }
 0x203   : > { %v1200_v58 = vmul.f32 1.442695, %v2536_v61 }
 0x204   : > { %v1202_v59 = vmul.f32 1.442695, %v2539_v0  ;;  %v1109_v1 = vpop.xlane.xlu0 %1108 }
 0x205   : > { %v1111_v4 = vpop.xlane.xlu1 %1110  ;;  %1927 = vpow2.f32 %v1200_v58  ;;  %v2544_v5 = vsub.f32 %v2364_v8, %v1109_v1 }
 0x206   : > { %v2547_v10 = vsub.f32 %v2367_v9, %v1111_v4  ;;  %1929 = vpow2.f32 %v1202_v59 }
 0x207   : > { %v1920_v2 = vpop.eup %1919  ;;  %v1204_v11 = vmul.f32 1.442695, %v2544_v5 }
 0x208   : > { %v1206_v3 = vmul.f32 1.442695, %v2547_v10  ;;  %v1922_v12 = vpop.eup %1921  ;;  %v1113_v13 = vpop.xlane.xlu0 %1112  ;;  %v1256_v18 = vsel %vm1063_vm0, %v1920_v2, 0.0 }
 0x209   : > { %v1115_v19 = vpop.xlane.xlu1 %1114  ;;  %1931 = vpow2.f32 %v1204_v11  ;;  %v2554_v22 = vsub.f32 %v2376_v14, %v1113_v13  ;;  %1288 = vadd.xlane.f32.xlu0 %v1256_v18  ;;  %v1258_v9 = vsel %vm1063_vm0, %v1922_v12, 0.0 }
 0x20a   : > { %v2557_v8 = vsub.f32 %v2379_v15, %v1115_v19  ;;  %1933 = vpow2.f32 %v1206_v3 }
 0x20b   : > { %v1924_v23 = vpop.eup %1923  ;;  %v1208_v28 = vmul.f32 1.442695, %v2554_v22 }
 0x20c   : > { %v1210_v29 = vmul.f32 1.442695, %v2557_v8  ;;  %v1926_v30 = vpop.eup %1925  ;;  %v1117_v31 = vpop.xlane.xlu0 %1116  ;;  %v1257_v36 = vsel %vm1063_vm0, %v1924_v23, 0.0 }
 0x20d   : > { %v1119_v14 = vpop.xlane.xlu1 %1118  ;;  %1935 = vpow2.f32 %v1208_v28  ;;  %v2566_v37 = vsub.f32 %v2388_v20, %v1117_v31  ;;  %1292 = vadd.xlane.f32.xlu0 %v1258_v9  ;;  %1290 = vadd.xlane.f32.xlu1 %v1257_v36  ;;  %v1259_v40 = vsel %vm1063_vm0, %v1926_v30, 0.0 }
 0x20e   : > { %v2569_v15 = vsub.f32 %v2391_v21, %v1119_v14  ;;  %1937 = vpow2.f32 %v1210_v29 }
 0x20f   : > { %v1928_v41 = vpop.eup %1927  ;;  %v1212_v43 = vmul.f32 1.442695, %v2566_v37 }
 0x210   : > { %v1214_v46 = vmul.f32 1.442695, %v2569_v15  ;;  %v1930_v47 = vpop.eup %1929  ;;  %v1121_v48 = vpop.xlane.xlu0 %1120  ;;  %v1260_v20 = vsel %vm1063_vm0, %v1928_v41, 0.0 }
 0x211   : > { %v1123_v53 = vpop.xlane.xlu1 %1122  ;;  %1939 = vpow2.f32 %v1212_v43  ;;  %v2578_v56 = vsub.f32 %v2400_v26, %v1121_v48  ;;  %1294 = vadd.xlane.f32.xlu1 %v1259_v40  ;;  %1296 = vadd.xlane.f32.xlu0 %v1260_v20  ;;  %v1261_v54 = vsel %vm1063_vm0, %v1930_v47, 0.0 }
 0x212   : > { %v2581_v21 = vsub.f32 %v2403_v27, %v1123_v53  ;;  %1941 = vpow2.f32 %v1214_v46 }
 0x213   : > { %v1932_v60 = vpop.eup %1931  ;;  %v1216_v58 = vmul.f32 1.442695, %v2578_v56 }
 0x214   : > { %v1218_v59 = vmul.f32 1.442695, %v2581_v21  ;;  %v1934_v1 = vpop.eup %1933  ;;  %v1125_v4 = vpop.xlane.xlu0 %1124  ;;  %v1262_v26 = vsel %vm1063_vm0, %v1932_v60, 0.0 }
 0x215   : > { %v1127_v2 = vpop.xlane.xlu1 %1126  ;;  %1943 = vpow2.f32 %v1216_v58  ;;  %v2590_v11 = vsub.f32 %v2412_v32, %v1125_v4  ;;  %1298 = vadd.xlane.f32.xlu1 %v1261_v54  ;;  %1300 = vadd.xlane.f32.xlu0 %v1262_v26  ;;  %v1263_v3 = vsel %vm1063_vm0, %v1934_v1, 0.0 }
 0x216   : > { %v2593_v27 = vsub.f32 %v2415_v33, %v1127_v2  ;;  %1945 = vpow2.f32 %v1218_v59 }
 0x217   : > { %v1936_v12 = vpop.eup %1935  ;;  %v1220_v13 = vmul.f32 1.442695, %v2590_v11 }
 0x218   : > { %v1222_v18 = vmul.f32 1.442695, %v2593_v27  ;;  %v1938_v19 = vpop.eup %1937  ;;  %v1129_v9 = vpop.xlane.xlu0 %1128  ;;  %v1264_v32 = vsel %vm1063_vm0, %v1936_v12, 0.0 }
 0x219   : > { %v1131_v23 = vpop.xlane.xlu1 %1130  ;;  %1947 = vpow2.f32 %v1220_v13  ;;  %v2602_v28 = vsub.f32 %v2424_v38, %v1129_v9  ;;  %1302 = vadd.xlane.f32.xlu1 %v1263_v3  ;;  %1304 = vadd.xlane.f32.xlu0 %v1264_v32  ;;  %v1265_v29 = vsel %vm1063_vm0, %v1938_v19, 0.0 }
 0x21a   : > { %v2605_v33 = vsub.f32 %v2427_v39, %v1131_v23  ;;  %1949 = vpow2.f32 %v1222_v18 }
 0x21b   : > { %v1940_v30 = vpop.eup %1939  ;;  %v1224_v31 = vmul.f32 1.442695, %v2602_v28 }
 0x21c   : > { %v1226_v36 = vmul.f32 1.442695, %v2605_v33  ;;  %v1942_v14 = vpop.eup %1941  ;;  %v1133_v40 = vpop.xlane.xlu0 %1132  ;;  %v1266_v38 = vsel %vm1063_vm0, %v1940_v30, 0.0 }
 0x21d   : > { %v1135_v41 = vpop.xlane.xlu1 %1134  ;;  %1951 = vpow2.f32 %v1224_v31  ;;  %v2614_v43 = vsub.f32 %v2436_v44, %v1133_v40  ;;  %1306 = vadd.xlane.f32.xlu1 %v1265_v29  ;;  %1308 = vadd.xlane.f32.xlu0 %v1266_v38  ;;  %v1267_v46 = vsel %vm1063_vm0, %v1942_v14, 0.0 }
 0x21e   : > { %v2617_v39 = vsub.f32 %v2439_v45, %v1135_v41  ;;  %1953 = vpow2.f32 %v1226_v36 }
 0x21f   : > { %v1944_v47 = vpop.eup %1943  ;;  %v1228_v48 = vmul.f32 1.442695, %v2614_v43 }
 0x220   : > { %v1230_v20 = vmul.f32 1.442695, %v2617_v39  ;;  %v1946_v53 = vpop.eup %1945  ;;  %v1137_v54 = vpop.xlane.xlu0 %1136  ;;  %v1268_v44 = vsel %vm1063_vm0, %v1944_v47, 0.0 }
 0x221   : > { %v1139_v60 = vpop.xlane.xlu1 %1138  ;;  %1955 = vpow2.f32 %v1228_v48  ;;  %v2626_v58 = vsub.f32 %v2448_v51, %v1137_v54  ;;  %1310 = vadd.xlane.f32.xlu1 %v1267_v46  ;;  %1312 = vadd.xlane.f32.xlu0 %v1268_v44  ;;  %v1269_v59 = vsel %vm1063_vm0, %v1946_v53, 0.0 }
 0x222   : > { %v2629_v45 = vsub.f32 %v2451_v52, %v1139_v60  ;;  %1957 = vpow2.f32 %v1230_v20 }
 0x223   : > { %v1948_v1 = vpop.eup %1947  ;;  %v1232_v4 = vmul.f32 1.442695, %v2626_v58 }
 0x224   : > { %v1234_v26 = vmul.f32 1.442695, %v2629_v45  ;;  %v1950_v2 = vpop.eup %1949  ;;  %v1141_v3 = vpop.xlane.xlu0 %1140  ;;  %v1270_v51 = vsel %vm1063_vm0, %v1948_v1, 0.0 }
 0x225   : > { %v1143_v12 = vpop.xlane.xlu1 %1142  ;;  %1959 = vpow2.f32 %v1232_v4  ;;  %v2638_v13 = vsub.f32 %v2460_v62, %v1141_v3  ;;  %1314 = vadd.xlane.f32.xlu1 %v1269_v59  ;;  %1316 = vadd.xlane.f32.xlu0 %v1270_v51  ;;  %v1271_v18 = vsel %vm1063_vm0, %v1950_v2, 0.0 }
 0x226   : > { %v2641_v52 = vsub.f32 %v2463_v63, %v1143_v12  ;;  %1961 = vpow2.f32 %v1234_v26 }
 0x227   : > { %v1952_v19 = vpop.eup %1951  ;;  %v1236_v9 = vmul.f32 1.442695, %v2638_v13 }
 0x228   : > { %v1238_v32 = vmul.f32 1.442695, %v2641_v52  ;;  %v1954_v23 = vpop.eup %1953  ;;  %v1145_v29 = vpop.xlane.xlu0 %1144  ;;  %v1272_v62 = vsel %vm1063_vm0, %v1952_v19, 0.0 }
 0x229   : > { %v1147_v30 = vpop.xlane.xlu1 %1146  ;;  %1963 = vpow2.f32 %v1236_v9  ;;  %v2650_v31 = vsub.f32 %v2472_v6, %v1145_v29  ;;  %1318 = vadd.xlane.f32.xlu1 %v1271_v18  ;;  %1320 = vadd.xlane.f32.xlu0 %v1272_v62  ;;  %v1273_v36 = vsel %vm1063_vm0, %v1954_v23, 0.0 }
 0x22a   : > { %v2653_v63 = vsub.f32 %v2475_v7, %v1147_v30  ;;  %1965 = vpow2.f32 %v1238_v32 }
 0x22b   : > { %v1956_v14 = vpop.eup %1955  ;;  %v1240_v40 = vmul.f32 1.442695, %v2650_v31 }
 0x22c   : > { %v1242_v38 = vmul.f32 1.442695, %v2653_v63  ;;  %v1958_v41 = vpop.eup %1957  ;;  %v1149_v46 = vpop.xlane.xlu0 %1148  ;;  %v1274_v6 = vsel %vm1063_vm0, %v1956_v14, 0.0 }
 0x22d   : > { %v1151_v47 = vpop.xlane.xlu1 %1150  ;;  %1967 = vpow2.f32 %v1240_v40  ;;  %v2662_v48 = vsub.f32 %v2484_v16, %v1149_v46  ;;  %1322 = vadd.xlane.f32.xlu1 %v1273_v36  ;;  %1324 = vadd.xlane.f32.xlu0 %v1274_v6  ;;  %v1275_v20 = vsel %vm1063_vm0, %v1958_v41, 0.0 }
 0x22e   : > { %v2665_v7 = vsub.f32 %v2487_v17, %v1151_v47  ;;  %1969 = vpow2.f32 %v1242_v38 }
 0x22f   : > { %v1960_v53 = vpop.eup %1959  ;;  %v1244_v54 = vmul.f32 1.442695, %v2662_v48 }
 0x230   : > { %v1246_v44 = vmul.f32 1.442695, %v2665_v7  ;;  %v1962_v60 = vpop.eup %1961  ;;  %v1153_v59 = vpop.xlane.xlu0 %1152  ;;  %v1276_v16 = vsel %vm1063_vm0, %v1960_v53, 0.0 }
 0x231   : > { %v1155_v1 = vpop.xlane.xlu1 %1154  ;;  %1971 = vpow2.f32 %v1244_v54  ;;  %v2674_v4 = vsub.f32 %v2496_v24, %v1153_v59  ;;  %1326 = vadd.xlane.f32.xlu1 %v1275_v20  ;;  %1328 = vadd.xlane.f32.xlu0 %v1276_v16  ;;  %v1277_v26 = vsel %vm1063_vm0, %v1962_v60, 0.0 }
 0x232   : > { %v2677_v17 = vsub.f32 %v2499_v25, %v1155_v1  ;;  %1973 = vpow2.f32 %v1246_v44 }
 0x233   : > { %v1964_v2 = vpop.eup %1963  ;;  %v1248_v3 = vmul.f32 1.442695, %v2674_v4 }
 0x234   : > { %v1250_v51 = vmul.f32 1.442695, %v2677_v17  ;;  %v1966_v12 = vpop.eup %1965  ;;  %v1157_v18 = vpop.xlane.xlu0 %1156  ;;  %v1278_v24 = vsel %vm1063_vm0, %v1964_v2, 0.0 }
 0x235   : > { %v1159_v19 = vpop.xlane.xlu1 %1158  ;;  %1975 = vpow2.f32 %v1248_v3  ;;  %v2686_v9 = vsub.f32 %v2508_v34, %v1157_v18  ;;  %1330 = vadd.xlane.f32.xlu1 %v1277_v26  ;;  %1332 = vadd.xlane.f32.xlu0 %v1278_v24  ;;  %v1279_v32 = vsel %vm1063_vm0, %v1966_v12, 0.0 }
 0x236   : > { %v2689_v25 = vsub.f32 %v2511_v35, %v1159_v19  ;;  %1977 = vpow2.f32 %v1250_v51 }
 0x237   : > { %v1968_v23 = vpop.eup %1967  ;;  %v1252_v29 = vmul.f32 1.442695, %v2686_v9 }
 0x238   : > { %v1254_v62 = vmul.f32 1.442695, %v2689_v25  ;;  %v1970_v30 = vpop.eup %1969  ;;  %v1280_v36 = vsel %vm1063_vm0, %v1968_v23, 0.0 }
 0x239   : > { %1979 = vpow2.f32 %v1252_v29  ;;  %1334 = vadd.xlane.f32.xlu1 %v1279_v32  ;;  %1336 = vadd.xlane.f32.xlu0 %v1280_v36  ;;  %v1281_v34 = vsel %vm1063_vm0, %v1970_v30, 0.0 }
 0x23a   : > { %1981 = vpow2.f32 %v1254_v62 }
 0x23b   : > { %v1972_v35 = vpop.eup %1971 }
 0x23c   : > { %v1974_v14 = vpop.eup %1973  ;;  %v1282_v40 = vsel %vm1063_vm0, %v1972_v35, 0.0 }
 0x23d   : > { %1338 = vadd.xlane.f32.xlu1 %v1281_v34  ;;  %1340 = vadd.xlane.f32.xlu0 %v1282_v40  ;;  %v1283_v38 = vsel %vm1063_vm0, %v1974_v14, 0.0 }
 0x23f   : > { %v1976_v41 = vpop.eup %1975 }
 0x240   : > { %v1978_v46 = vpop.eup %1977  ;;  %v1284_v6 = vsel %vm1063_vm0, %v1976_v41, 0.0 }
 0x241   : > { %1342 = vadd.xlane.f32.xlu1 %v1283_v38  ;;  %1344 = vadd.xlane.f32.xlu0 %v1284_v6  ;;  %v1285_v47 = vsel %vm1063_vm0, %v1978_v46, 0.0 }
 0x243   : > { %v1980_v20 = vpop.eup %1979 }
 0x244   : > { %v1982_v53 = vpop.eup %1981  ;;  %v1286_v54 = vsel %vm1063_vm0, %v1980_v20, 0.0 }
 0x245   : > { %1346 = vadd.xlane.f32.xlu1 %v1285_v47  ;;  %1348 = vadd.xlane.f32.xlu0 %v1286_v54  ;;  %v1287_v44 = vsel %vm1063_vm0, %v1982_v53, 0.0 }
 0x249   : > { %1350 = vadd.xlane.f32.xlu1 %v1287_v44 }
 0x296   : > { %v1289_v60 = vpop.xlane.xlu0 %1288 }
 0x297   : > { %1983 = vlog2.f32 %v1289_v60 }
 0x29a   : > { %v1291_v59 = vpop.xlane.xlu1 %1290  ;;  %v1293_v16 = vpop.xlane.xlu0 %1292 }
 0x29b   : > { %1985 = vlog2.f32 %v1291_v59 }
 0x29c   : > { %1987 = vlog2.f32 %v1293_v16 }
 0x29e   : > { %v1295_v1 = vpop.xlane.xlu1 %1294  ;;  %v1297_v26 = vpop.xlane.xlu0 %1296 }
 0x29f   : > { %1989 = vlog2.f32 %v1295_v1 }
 0x2a0   : > { %1991 = vlog2.f32 %v1297_v26 }
 0x2a1   : > { %v1984_v2 = vpop.eup %1983 }
 0x2a2   : > { %v1353_v3 = vmul.f32 0.6931472, %v1984_v2  ;;  %v1299_v51 = vpop.xlane.xlu1 %1298  ;;  %v1301_v12 = vpop.xlane.xlu0 %1300 }
 0x2a3   : > { %1993 = vlog2.f32 %v1299_v51 }
 0x2a4   : > { %v1416_v18 = vsub.f32 %v2520_v42, %v1353_v3  ;;  %1995 = vlog2.f32 %v1301_v12 }
 0x2a5   : > { %v1986_v24 = vpop.eup %1985 }
 0x2a6   : > { %v1988_v19 = vpop.eup %1987  ;;  %v1448_v32 = vsel %vm1063_vm0, %v1416_v18, 0.0  ;;  %v1355_v23 = vmul.f32 0.6931472, %v1986_v24  ;;  %v1303_v29 = vpop.xlane.xlu1 %1302 }
 0x2a7   : > { %v1305_v62 = vpop.xlane.xlu0 %1304  ;;  %1480 = vst [vmem:[%s2265_s30] sm:$0xff] %v1448_v32  ;;  %v1357_v30 = vmul.f32 0.6931472, %v1988_v19  ;;  %1997 = vlog2.f32 %v1303_v29 }
 0x2a8   : > { %v1417_v36 = vsub.f32 %v2528_v49, %v1355_v23  ;;  %1999 = vlog2.f32 %v1305_v62 }
 0x2a9   : > { %v1990_v34 = vpop.eup %1989  ;;  %v1418_v42 = vsub.f32 %v2523_v50, %v1357_v30 }
 0x2aa   : > { %v1992_v35 = vpop.eup %1991  ;;  %v1449_v14 = vsel %vm1063_vm0, %v1417_v36, 0.0  ;;  %v1359_v40 = vmul.f32 0.6931472, %v1990_v34  ;;  %v1307_v38 = vpop.xlane.xlu1 %1306 }
 0x2ab   : > { %v1309_v41 = vpop.xlane.xlu0 %1308  ;;  %1481 = vst [vmem:[%s2265_s30 + $0x8] sm:$0xff] %v1449_v14  ;;  %v1450_v46 = vsel %vm1063_vm0, %v1418_v42, 0.0  ;;  %v1361_v6 = vmul.f32 0.6931472, %v1992_v35  ;;  %2001 = vlog2.f32 %v1307_v38 }
 0x2ac   : > { %1482 = vst [vmem:[%s2265_s30 + $0x10] sm:$0xff] %v1450_v46  ;;  %v1419_v49 = vsub.f32 %v2531_v55, %v1359_v40  ;;  %2003 = vlog2.f32 %v1309_v41 }
 0x2ad   : > { %v1994_v50 = vpop.eup %1993  ;;  %v1420_v47 = vsub.f32 %v2536_v61, %v1361_v6 }
 0x2ae   : > { %v1996_v20 = vpop.eup %1995  ;;  %v1451_v53 = vsel %vm1063_vm0, %v1419_v49, 0.0  ;;  %v1363_v54 = vmul.f32 0.6931472, %v1994_v50  ;;  %v1311_v44 = vpop.xlane.xlu1 %1310 }
 0x2af   : > { %v1313_v60 = vpop.xlane.xlu0 %1312  ;;  %1483 = vst [vmem:[%s2265_s30 + $0x18] sm:$0xff] %v1451_v53  ;;  %v1452_v59 = vsel %vm1063_vm0, %v1420_v47, 0.0  ;;  %v1365_v16 = vmul.f32 0.6931472, %v1996_v20  ;;  %2005 = vlog2.f32 %v1311_v44 }
 0x2b0   : > { %1484 = vst [vmem:[%s2265_s30 + $0x20] sm:$0xff] %v1452_v59  ;;  %v1421_v55 = vsub.f32 %v2539_v0, %v1363_v54  ;;  %2007 = vlog2.f32 %v1313_v60 }
 0x2b1   : > { %v1998_v61 = vpop.eup %1997  ;;  %v1422_v1 = vsub.f32 %v2544_v5, %v1365_v16 }
 0x2b2   : > { %v2000_v26 = vpop.eup %1999  ;;  %v1453_v2 = vsel %vm1063_vm0, %v1421_v55, 0.0  ;;  %v1367_v3 = vmul.f32 0.6931472, %v1998_v61  ;;  %v1315_v51 = vpop.xlane.xlu1 %1314 }
 0x2b3   : > { %v1317_v12 = vpop.xlane.xlu0 %1316  ;;  %1485 = vst [vmem:[%s2265_s30 + $0x28] sm:$0xff] %v1453_v2  ;;  %v1454_v18 = vsel %vm1063_vm0, %v1422_v1, 0.0  ;;  %v1369_v24 = vmul.f32 0.6931472, %v2000_v26  ;;  %2009 = vlog2.f32 %v1315_v51 }
 0x2b4   : > { %1486 = vst [vmem:[%s2265_s30 + $0x30] sm:$0xff] %v1454_v18  ;;  %v1423_v0 = vsub.f32 %v2547_v10, %v1367_v3  ;;  %2011 = vlog2.f32 %v1317_v12 }
 0x2b5   : > { %v2002_v5 = vpop.eup %2001  ;;  %v1424_v19 = vsub.f32 %v2554_v22, %v1369_v24 }
 0x2b6   : > { %v2004_v32 = vpop.eup %2003  ;;  %v1455_v23 = vsel %vm1063_vm0, %v1423_v0, 0.0  ;;  %v1371_v29 = vmul.f32 0.6931472, %v2002_v5  ;;  %v1319_v62 = vpop.xlane.xlu1 %1318 }
 0x2b7   : > { %v1321_v30 = vpop.xlane.xlu0 %1320  ;;  %1487 = vst [vmem:[%s2265_s30 + $0x38] sm:$0xff] %v1455_v23  ;;  %v1456_v36 = vsel %vm1063_vm0, %v1424_v19, 0.0  ;;  %v1373_v34 = vmul.f32 0.6931472, %v2004_v32  ;;  %2013 = vlog2.f32 %v1319_v62 }
 0x2b8   : > { %1488 = vst [vmem:[%s2265_s30 + $0x40] sm:$0xff] %v1456_v36  ;;  %v1425_v10 = vsub.f32 %v2557_v8, %v1371_v29  ;;  %2015 = vlog2.f32 %v1321_v30 }
 0x2b9   : > { %v2006_v22 = vpop.eup %2005  ;;  %v1426_v42 = vsub.f32 %v2566_v37, %v1373_v34 }
 0x2ba   : > { %v2008_v35 = vpop.eup %2007  ;;  %v1457_v14 = vsel %vm1063_vm0, %v1425_v10, 0.0  ;;  %v1375_v40 = vmul.f32 0.6931472, %v2006_v22  ;;  %v1323_v38 = vpop.xlane.xlu1 %1322 }
 0x2bb   : > { %v1325_v41 = vpop.xlane.xlu0 %1324  ;;  %1489 = vst [vmem:[%s2265_s30 + $0x48] sm:$0xff] %v1457_v14  ;;  %v1458_v46 = vsel %vm1063_vm0, %v1426_v42, 0.0  ;;  %v1377_v6 = vmul.f32 0.6931472, %v2008_v35  ;;  %2017 = vlog2.f32 %v1323_v38 }
 0x2bc   : > { %1490 = vst [vmem:[%s2265_s30 + $0x50] sm:$0xff] %v1458_v46  ;;  %v1427_v8 = vsub.f32 %v2569_v15, %v1375_v40  ;;  %2019 = vlog2.f32 %v1325_v41 }
 0x2bd   : > { %v2010_v37 = vpop.eup %2009  ;;  %v1428_v49 = vsub.f32 %v2578_v56, %v1377_v6 }
 0x2be   : > { %v2012_v50 = vpop.eup %2011  ;;  %v1459_v47 = vsel %vm1063_vm0, %v1427_v8, 0.0  ;;  %v1379_v20 = vmul.f32 0.6931472, %v2010_v37  ;;  %v1327_v53 = vpop.xlane.xlu1 %1326 }
 0x2bf   : > { %v1329_v54 = vpop.xlane.xlu0 %1328  ;;  %1491 = vst [vmem:[%s2265_s30 + $0x58] sm:$0xff] %v1459_v47  ;;  %v1460_v44 = vsel %vm1063_vm0, %v1428_v49, 0.0  ;;  %v1381_v60 = vmul.f32 0.6931472, %v2012_v50  ;;  %2021 = vlog2.f32 %v1327_v53 }
 0x2c0   : > { %1492 = vst [vmem:[%s2265_s30 + $0x60] sm:$0xff] %v1460_v44  ;;  %v1429_v15 = vsub.f32 %v2581_v21, %v1379_v20  ;;  %2023 = vlog2.f32 %v1329_v54 }
 0x2c1   : > { %v2014_v56 = vpop.eup %2013  ;;  %v1430_v59 = vsub.f32 %v2590_v11, %v1381_v60 }
 0x2c2   : > { %v2016_v16 = vpop.eup %2015  ;;  %v1461_v55 = vsel %vm1063_vm0, %v1429_v15, 0.0  ;;  %v1383_v61 = vmul.f32 0.6931472, %v2014_v56  ;;  %v1331_v1 = vpop.xlane.xlu1 %1330 }
 0x2c3   : > { %v1333_v26 = vpop.xlane.xlu0 %1332  ;;  %1493 = vst [vmem:[%s2265_s30 + $0x68] sm:$0xff] %v1461_v55  ;;  %v1462_v2 = vsel %vm1063_vm0, %v1430_v59, 0.0  ;;  %v1385_v3 = vmul.f32 0.6931472, %v2016_v16  ;;  %2025 = vlog2.f32 %v1331_v1 }
 0x2c4   : > { %1494 = vst [vmem:[%s2265_s30 + $0x70] sm:$0xff] %v1462_v2  ;;  %v1431_v21 = vsub.f32 %v2593_v27, %v1383_v61  ;;  %2027 = vlog2.f32 %v1333_v26 }
 0x2c5   : > { %v2018_v11 = vpop.eup %2017  ;;  %v1432_v51 = vsub.f32 %v2602_v28, %v1385_v3 }
 0x2c6   : > { %v2020_v12 = vpop.eup %2019  ;;  %v1463_v18 = vsel %vm1063_vm0, %v1431_v21, 0.0  ;;  %v1387_v24 = vmul.f32 0.6931472, %v2018_v11  ;;  %v1335_v0 = vpop.xlane.xlu1 %1334 }
 0x2c7   : > { %v1337_v5 = vpop.xlane.xlu0 %1336  ;;  %1495 = vst [vmem:[%s2265_s30 + $0x78] sm:$0xff] %v1463_v18  ;;  %v1464_v19 = vsel %vm1063_vm0, %v1432_v51, 0.0  ;;  %v1389_v32 = vmul.f32 0.6931472, %v2020_v12  ;;  %2029 = vlog2.f32 %v1335_v0 }
 0x2c8   : > { %1496 = vst [vmem:[%s2265_s30 + $0x80] sm:$0xff] %v1464_v19  ;;  %v1433_v27 = vsub.f32 %v2605_v33, %v1387_v24  ;;  %2031 = vlog2.f32 %v1337_v5 }
 0x2c9   : > { %v2022_v28 = vpop.eup %2021  ;;  %v1434_v23 = vsub.f32 %v2614_v43, %v1389_v32 }
 0x2ca   : > { %v2024_v29 = vpop.eup %2023  ;;  %v1465_v62 = vsel %vm1063_vm0, %v1433_v27, 0.0  ;;  %v1391_v30 = vmul.f32 0.6931472, %v2022_v28  ;;  %v1339_v36 = vpop.xlane.xlu1 %1338 }
 0x2cb   : > { %v1341_v34 = vpop.xlane.xlu0 %1340  ;;  %1497 = vst [vmem:[%s2265_s30 + $0x88] sm:$0xff] %v1465_v62  ;;  %v1466_v10 = vsel %vm1063_vm0, %v1434_v23, 0.0  ;;  %v1393_v22 = vmul.f32 0.6931472, %v2024_v29  ;;  %2033 = vlog2.f32 %v1339_v36 }
 0x2cc   : > { %1498 = vst [vmem:[%s2265_s30 + $0x90] sm:$0xff] %v1466_v10  ;;  %v1435_v33 = vsub.f32 %v2617_v39, %v1391_v30  ;;  %2035 = vlog2.f32 %v1341_v34 }
 0x2cd   : > { %v2026_v43 = vpop.eup %2025  ;;  %v1436_v42 = vsub.f32 %v2626_v58, %v1393_v22 }
 0x2ce   : > { %v2028_v35 = vpop.eup %2027  ;;  %v1467_v14 = vsel %vm1063_vm0, %v1435_v33, 0.0  ;;  %v1395_v40 = vmul.f32 0.6931472, %v2026_v43  ;;  %v1343_v38 = vpop.xlane.xlu1 %1342 }
 0x2cf   : > { %v1345_v41 = vpop.xlane.xlu0 %1344  ;;  %1499 = vst [vmem:[%s2265_s30 + $0x98] sm:$0xff] %v1467_v14  ;;  %v1468_v46 = vsel %vm1063_vm0, %v1436_v42, 0.0  ;;  %v1397_v6 = vmul.f32 0.6931472, %v2028_v35  ;;  %2037 = vlog2.f32 %v1343_v38 }
 0x2d0   : > { %1500 = vst [vmem:[%s2265_s30 + $0xa0] sm:$0xff] %v1468_v46  ;;  %v1437_v39 = vsub.f32 %v2629_v45, %v1395_v40  ;;  %2039 = vlog2.f32 %v1345_v41 }
 0x2d1   : > { %v2030_v58 = vpop.eup %2029  ;;  %v1438_v8 = vsub.f32 %v2638_v13, %v1397_v6 }
 0x2d2   : > { %v2032_v37 = vpop.eup %2031  ;;  %v1469_v49 = vsel %vm1063_vm0, %v1437_v39, 0.0  ;;  %v1399_v50 = vmul.f32 0.6931472, %v2030_v58  ;;  %v1347_v47 = vpop.xlane.xlu1 %1346 }
 0x2d3   : > { %v1349_v20 = vpop.xlane.xlu0 %1348  ;;  %1501 = vst [vmem:[%s2265_s30 + $0xa8] sm:$0xff] %v1469_v49  ;;  %v1470_v53 = vsel %vm1063_vm0, %v1438_v8, 0.0  ;;  %v1401_v54 = vmul.f32 0.6931472, %v2032_v37  ;;  %2041 = vlog2.f32 %v1347_v47 }
 0x2d4   : > { %1502 = vst [vmem:[%s2265_s30 + $0xb0] sm:$0xff] %v1470_v53  ;;  %v1439_v45 = vsub.f32 %v2641_v52, %v1399_v50  ;;  %2043 = vlog2.f32 %v1349_v20 }
 0x2d5   : > { %v2034_v13 = vpop.eup %2033  ;;  %v1440_v44 = vsub.f32 %v2650_v31, %v1401_v54 }
 0x2d6   : > { %v2036_v60 = vpop.eup %2035  ;;  %v1471_v15 = vsel %vm1063_vm0, %v1439_v45, 0.0  ;;  %v1403_v56 = vmul.f32 0.6931472, %v2034_v13  ;;  %v1351_v59 = vpop.xlane.xlu1 %1350 }
 0x2d7   : > { %1503 = vst [vmem:[%s2265_s30 + $0xb8] sm:$0xff] %v1471_v15  ;;  %v1472_v16 = vsel %vm1063_vm0, %v1440_v44, 0.0  ;;  %v1405_v55 = vmul.f32 0.6931472, %v2036_v60  ;;  %2045 = vlog2.f32 %v1351_v59 }
 0x2d8   : > { %1504 = vst [vmem:[%s2265_s30 + $0xc0] sm:$0xff] %v1472_v16  ;;  %v1441_v52 = vsub.f32 %v2653_v63, %v1403_v56 }
 0x2d9   : > { %v2038_v61 = vpop.eup %2037  ;;  %v1442_v31 = vsub.f32 %v2662_v48, %v1405_v55 }
 0x2da   : > { %v2040_v1 = vpop.eup %2039  ;;  %v1473_v26 = vsel %vm1063_vm0, %v1441_v52, 0.0  ;;  %v1407_v2 = vmul.f32 0.6931472, %v2038_v61 }
 0x2db   : > { %1505 = vst [vmem:[%s2265_s30 + $0xc8] sm:$0xff] %v1473_v26  ;;  %v1474_v3 = vsel %vm1063_vm0, %v1442_v31, 0.0  ;;  %v1409_v21 = vmul.f32 0.6931472, %v2040_v1 }
 0x2dc   : > { %1506 = vst [vmem:[%s2265_s30 + $0xd0] sm:$0xff] %v1474_v3  ;;  %v1443_v11 = vsub.f32 %v2665_v7, %v1407_v2 }
 0x2dd   : > { %v2042_v63 = vpop.eup %2041  ;;  %v1444_v51 = vsub.f32 %v2674_v4, %v1409_v21 }
 0x2de   : > { %v2044_v48 = vpop.eup %2043  ;;  %v1475_v12 = vsel %vm1063_vm0, %v1443_v11, 0.0  ;;  %v1411_v18 = vmul.f32 0.6931472, %v2042_v63 }
 0x2df   : > { %1507 = vst [vmem:[%s2265_s30 + $0xd8] sm:$0xff] %v1475_v12  ;;  %v1476_v24 = vsel %vm1063_vm0, %v1444_v51, 0.0  ;;  %v1413_v0 = vmul.f32 0.6931472, %v2044_v48 }
 0x2e0   : > { %1508 = vst [vmem:[%s2265_s30 + $0xe0] sm:$0xff] %v1476_v24  ;;  %v1445_v5 = vsub.f32 %v2677_v17, %v1411_v18 }
 0x2e1   : > { %v2046_v19 = vpop.eup %2045  ;;  %v1446_v7 = vsub.f32 %v2686_v9, %v1413_v0 }
 0x2e2   : > { %v1477_v4 = vsel %vm1063_vm0, %v1445_v5, 0.0  ;;  %v1415_v32 = vmul.f32 0.6931472, %v2046_v19 }
 0x2e3   : > { %1509 = vst [vmem:[%s2265_s30 + $0xe8] sm:$0xff] %v1477_v4  ;;  %v1478_v27 = vsel %vm1063_vm0, %v1446_v7, 0.0 }
 0x2e4   : > { %1510 = vst [vmem:[%s2265_s30 + $0xf0] sm:$0xff] %v1478_v27  ;;  %v1447_v28 = vsub.f32 %v2689_v25, %v1415_v32 }
 0x2e6   : > { %v1479_v23 = vsel %vm1063_vm0, %v1447_v28, 0.0 }
 0x2e7   : > { %1511 = vst [vmem:[%s2265_s30 + $0xf8] sm:$0xff] %v1479_v23 }
 0x2e8 PF: > { %s13_s18 = sadd.s32 1, %s2101_s18   ;;  %s2864_s12 = smov %s2081_s13 }
 0x2e9   : > { %p10_p0 = scmp.ge.s32.totalorder %s13_s18, 6   ;;  %s2865_s13 = smov %s2175_s25 }
 0x2ea   : > { %s2866_s14 = smov %s2093_s16  ;;  %s2867_s15 = smov %s2097_s17 }
 0x2eb   : > { %s2868_s16 = smov %s2871_s19  ;;  %s2869_s17 = smov %s2875_s20 }
 0x2ec   :  { %12 = sbr.rel (!%p10_p0) target bundleno = 4 (0x4), region = 116 }

// kernel: gcn_forward.4
= control target key start
LH: loop header
LB: loop body
LE: loop exit
PB: predicated region body
PF: predicated region fallthrough
CT: control target
= control target key end

     0   :  { %s2279_s15 = smov 0   ;;  %s2281_s16 = smov 0   ;;  %s2640_s0 = inlined_call_operand.vmem [shape: bf16[512,512], index: 0, kind: input, shape index: {}]   ;;  %s2641_s1 = inlined_call_operand.vmem [shape: bf16[512,64], index: 1, kind: input, shape index: {}]   ;;  %s2642_s2 = inlined_call_operand.vmem [shape: f32[1,64], index: 2, kind: input, shape index: {}]   ;;  %s2643_s3 = inlined_call_operand.vmem [shape: bf16[64,128], index: 3, kind: input, shape index: {}]   ;;  %s2644_s4 = inlined_call_operand.vmem [shape: bf16[512,128], index: 4, kind: output, shape index: {}]  }
   0x1   :  { %s2283_s17 = smov 0   ;;  %s2285_s18 = smov 0  }
   0x2   :  { %s2287_s19 = smov 0   ;;  %s2289_s20 = smov 0  }
   0x3   :  { %s2291_s21 = smov 0  }
   0x4 LB: > { %s23_s22 = sadd.s32 1, %s2243_s19  ;;  %s26_s23 = sadd.s32 1, %s2247_s20  ;;  %s2251_s21 = sphi %s2291_s21, %s14_s21   ;;  %s2247_s20 = sphi %s2289_s20, %s2650_s20   ;;  %s2243_s19 = sphi %s2287_s19, %s2649_s19   ;;  %s2239_s18 = sphi %s2285_s18, %s2648_s18   ;;  %s2235_s17 = sphi %s2283_s17, %s2647_s17   ;;  %s2231_s16 = sphi %s2281_s16, %s2646_s16   ;;  %s2227_s15 = sphi %s2279_s15, %s2645_s15  }
   0x5   : > { %p24_p0 = scmp.ge.s32.totalorder %s23_s22, 2  ;;  %p42_p1 = scmp.ne.s32.totalorder %s2231_s16, %s2227_s15 }
   0x6   : > { %p43_p2 = scmp.eq.s32.totalorder %s2251_s21, 0  ;;  %s35_s27 = sadd.s32 1, %s2231_s16 }
   0x7   : > { %s2652_s22 = smov (%p24_p0, %s23_s22), 0  ;;  %s2654_s23 = smov (!%p24_p0, %s26_s23), %s2247_s20 }
   0x8   : > { %p44_p3 = por %p43_p2, %p42_p1  ;;  %p28_p4 = scmp.ge.s32.totalorder %s2654_s23, 2 }
   0x9   : > { %s31_s24 = ssub.s32 %s2243_s19, %s2652_s22  ;;  %p1631_p6 = scmp.ge.s32.totalorder %s2251_s21, 4 }
   0xa   : > { %s2656_s23 = smov (%p28_p4, %s2654_s23), 0 }
   0xb   : > { %s30_s25 = ssub.s32 %s2247_s20, %s2656_s23  ;;  %168 = sbr.rel (%p1631_p6) target bundleno = 41 (0x29), region = 24 }
   0xc   : > { %s32_s26 = sor.u32 %s31_s24, %s30_s25 }
   0xd   : > { %p33_p5 = scmp.eq.s32.totalorder %s32_s26, 0 }
   0xf   : > { %s2330_s28 = scalar_select %p33_p5, %s2231_s16, %s35_s27  }
  0x12   : > { %171 = sbr.rel (!%p44_p3) target bundleno = 41 (0x29), region = 28  ;;  %s173_s29 = sand.u32 (%p44_p3), 1, %s2231_s16  }
  0x13   : > { %s1634_s30 = sshll.u32 (%p44_p3), %s2243_s19, 1  ;;  %s1632_s5 = sshll.u32 (%p44_p3), %s173_s29, 8 }
  0x14   : > { %s1748_s6 = sshll.u32 (%p44_p3), %s2247_s20, 7  ;;  %s2344_s12 = scalar_lea.vmem (%p44_p3), [#allocation3], %s1632_s5 }
  0x15   : > { %s179_s7 = sadd.s32 (%p44_p3), %s1748_s6, %s1634_s30 }
  0x16   : > { %s1636_s8 = sshll.u32 (%p44_p3), %s179_s7, 2 }
  0x17   : > { %s2339_s11 = scalar_lea.vmem (%p44_p3), %s2640_s0, %s1636_s8 }
  0x18   : > { %v271_v0 = vld [vmem:[%s2339_s11] sm:$0xff] (%p44_p3)  ;;  %v273_v1 = vld [vmem:[%s2339_s11 + $0x10] sm:$0xff] (%p44_p3) }
  0x19   : > { %v275_v2 = vld [vmem:[%s2339_s11 + $0x20] sm:$0xff]  ;;  %272 = vst [vmem:[%s2344_s12] sm:$0xff] %v271_v0  ;;  %274 = vst [vmem:[%s2344_s12 + $0x8] sm:$0xff] %v273_v1  ;;  %v277_v3 = vld [vmem:[%s2339_s11 + $0x30] sm:$0xff] }
  0x1a   : > { %276 = vst [vmem:[%s2344_s12 + $0x10] sm:$0xff] %v275_v2  ;;  %v279_v4 = vld [vmem:[%s2339_s11 + $0x40] sm:$0xff]  ;;  %v281_v5 = vld [vmem:[%s2339_s11 + $0x50] sm:$0xff]  ;;  %278 = vst [vmem:[%s2344_s12 + $0x18] sm:$0xff] %v277_v3 }
  0x1b   : > { %280 = vst [vmem:[%s2344_s12 + $0x20] sm:$0xff] %v279_v4  ;;  %282 = vst [vmem:[%s2344_s12 + $0x28] sm:$0xff] %v281_v5  ;;  %v283_v6 = vld [vmem:[%s2339_s11 + $0x60] sm:$0xff]  ;;  %v285_v7 = vld [vmem:[%s2339_s11 + $0x70] sm:$0xff] }
  0x1c   : > { %v287_v8 = vld [vmem:[%s2339_s11 + $0x80] sm:$0xff]  ;;  %284 = vst [vmem:[%s2344_s12 + $0x30] sm:$0xff] %v283_v6  ;;  %286 = vst [vmem:[%s2344_s12 + $0x38] sm:$0xff] %v285_v7  ;;  %v289_v9 = vld [vmem:[%s2339_s11 + $0x90] sm:$0xff] }
  0x1d   : > { %288 = vst [vmem:[%s2344_s12 + $0x40] sm:$0xff] %v287_v8  ;;  %v291_v10 = vld [vmem:[%s2339_s11 + $0xa0] sm:$0xff]  ;;  %v293_v11 = vld [vmem:[%s2339_s11 + $0xb0] sm:$0xff]  ;;  %290 = vst [vmem:[%s2344_s12 + $0x48] sm:$0xff] %v289_v9 }
  0x1e   : > { %292 = vst [vmem:[%s2344_s12 + $0x50] sm:$0xff] %v291_v10  ;;  %294 = vst [vmem:[%s2344_s12 + $0x58] sm:$0xff] %v293_v11  ;;  %v295_v12 = vld [vmem:[%s2339_s11 + $0xc0] sm:$0xff]  ;;  %v297_v13 = vld [vmem:[%s2339_s11 + $0xd0] sm:$0xff] }
  0x1f   : > { %v299_v14 = vld [vmem:[%s2339_s11 + $0xe0] sm:$0xff]  ;;  %296 = vst [vmem:[%s2344_s12 + $0x60] sm:$0xff] %v295_v12  ;;  %298 = vst [vmem:[%s2344_s12 + $0x68] sm:$0xff] %v297_v13  ;;  %v301_v15 = vld [vmem:[%s2339_s11 + $0xf0] sm:$0xff] }
  0x20   : > { %300 = vst [vmem:[%s2344_s12 + $0x70] sm:$0xff] %v299_v14  ;;  %v303_v16 = vld [vmem:[%s2339_s11 + $0x100] sm:$0xff]  ;;  %v305_v17 = vld [vmem:[%s2339_s11 + $0x110] sm:$0xff]  ;;  %302 = vst [vmem:[%s2344_s12 + $0x78] sm:$0xff] %v301_v15 }
  0x21   : > { %304 = vst [vmem:[%s2344_s12 + $0x80] sm:$0xff] %v303_v16  ;;  %306 = vst [vmem:[%s2344_s12 + $0x88] sm:$0xff] %v305_v17  ;;  %v307_v18 = vld [vmem:[%s2339_s11 + $0x120] sm:$0xff]  ;;  %v309_v19 = vld [vmem:[%s2339_s11 + $0x130] sm:$0xff] }
  0x22   : > { %v311_v20 = vld [vmem:[%s2339_s11 + $0x140] sm:$0xff]  ;;  %308 = vst [vmem:[%s2344_s12 + $0x90] sm:$0xff] %v307_v18  ;;  %310 = vst [vmem:[%s2344_s12 + $0x98] sm:$0xff] %v309_v19  ;;  %v313_v21 = vld [vmem:[%s2339_s11 + $0x150] sm:$0xff] }
  0x23   : > { %312 = vst [vmem:[%s2344_s12 + $0xa0] sm:$0xff] %v311_v20  ;;  %v315_v22 = vld [vmem:[%s2339_s11 + $0x160] sm:$0xff]  ;;  %v317_v23 = vld [vmem:[%s2339_s11 + $0x170] sm:$0xff]  ;;  %314 = vst [vmem:[%s2344_s12 + $0xa8] sm:$0xff] %v313_v21 }
  0x24   : > { %316 = vst [vmem:[%s2344_s12 + $0xb0] sm:$0xff] %v315_v22  ;;  %318 = vst [vmem:[%s2344_s12 + $0xb8] sm:$0xff] %v317_v23  ;;  %v319_v24 = vld [vmem:[%s2339_s11 + $0x180] sm:$0xff]  ;;  %v321_v25 = vld [vmem:[%s2339_s11 + $0x190] sm:$0xff] }
  0x25   : > { %v323_v26 = vld [vmem:[%s2339_s11 + $0x1a0] sm:$0xff]  ;;  %320 = vst [vmem:[%s2344_s12 + $0xc0] sm:$0xff] %v319_v24  ;;  %322 = vst [vmem:[%s2344_s12 + $0xc8] sm:$0xff] %v321_v25  ;;  %v325_v27 = vld [vmem:[%s2339_s11 + $0x1b0] sm:$0xff] }
  0x26   : > { %324 = vst [vmem:[%s2344_s12 + $0xd0] sm:$0xff] %v323_v26  ;;  %v327_v28 = vld [vmem:[%s2339_s11 + $0x1c0] sm:$0xff]  ;;  %v329_v29 = vld [vmem:[%s2339_s11 + $0x1d0] sm:$0xff]  ;;  %326 = vst [vmem:[%s2344_s12 + $0xd8] sm:$0xff] %v325_v27 }
  0x27   : > { %328 = vst [vmem:[%s2344_s12 + $0xe0] sm:$0xff] %v327_v28  ;;  %330 = vst [vmem:[%s2344_s12 + $0xe8] sm:$0xff] %v329_v29  ;;  %v331_v30 = vld [vmem:[%s2339_s11 + $0x1e0] sm:$0xff]  ;;  %v333_v31 = vld [vmem:[%s2339_s11 + $0x1f0] sm:$0xff] }
  0x28   : > { %332 = vst [vmem:[%s2344_s12 + $0xf0] sm:$0xff] %v331_v30  ;;  %334 = vst [vmem:[%s2344_s12 + $0xf8] sm:$0xff] %v333_v31 }
  0x29 PF: > { %p1637_p7 = scmp.ge.s32.totalorder %s2251_s21, 1  ;;  %p348_p8 = scmp.lt.s32.totalorder %s2251_s21, 5 }
  0x2b   : > { %p349_p9 = pnand %p1637_p7, %p348_p8 }
  0x2c   : > { %s355_s13 = sand.u32 (!%p349_p9), 1, %s2227_s15   ;;  %s1639_s14 = sshll.u32 (!%p349_p9), %s2235_s17, 5 }
  0x2d   : > { %352 = sbr.rel (%p349_p9) target bundleno = 621 (0x26d), region = 70  ;;  %s1638_s24 = sshll.u32 (!%p349_p9), %s355_s13, 8 }
  0x2e   : > { %p388_p10 = scmp.lt.s32.totalorder (!%p349_p9), %s1639_s14, 63  ;;  %s1641_s25 = sshll.u32 (!%p349_p9), %s2239_s18, 5 }
  0x2f   : > { %p394_p11 = scmp.lt.s32.totalorder (!%p349_p9), %s1641_s25, 63  ;;  %s2422_s15 = scalar_lea.vmem (!%p349_p9), [#allocation3], %s1638_s24 }
  0x30   : > { %p1643_p12 = scmp.ne.s32.totalorder (!%p349_p9), %s2235_s17, 0 }
  0x34   : > { %s2658_s14 = smov (!%p388_p10, %s1639_s14), 63  ;;  %s2660_s25 = smov (!%p394_p11, %s1641_s25), 63 }
  0x35   : > { %s1640_s26 = sshll.u32 %s2658_s14, 2  ;;  %s1642_s5 = sshll.u32 %s2660_s25, 2  ;;  %vm404_vm0 = vcmask (!%p1643_p12), 523264   ;;  %v2253_v32 = vmov (!%p1643_p12), 0.0  }
  0x36   : > { %s2415_s30 = scalar_lea.vmem %s2641_s1, %s1640_s26  ;;  %s2420_s8 = scalar_lea.vmem %s2644_s4, %s1642_s5  ;;  %405 = vst.msk [vmem:[#allocation2] sm:$0xff] (!%p1643_p12), %vm404_vm0, %v2253_v32  ;;  %406 = vst.msk [vmem:[#allocation2 + $0x8] sm:$0xff] (!%p1643_p12), %vm404_vm0, %v2253_v32 }
  0x37   : > { %403 = sbr.rel (%p1643_p12) target bundleno = 70 (0x46), region = 78  ;;  %407 = vst.msk [vmem:[#allocation2 + $0x10] sm:$0xff] (!%p1643_p12), %vm404_vm0, %v2253_v32  ;;  %408 = vst.msk [vmem:[#allocation2 + $0x18] sm:$0xff] (!%p1643_p12), %vm404_vm0, %v2253_v32 }
  0x38   : > { %409 = vst.msk [vmem:[#allocation2 + $0x20] sm:$0xff] (!%p1643_p12), %vm404_vm0, %v2253_v32  ;;  %410 = vst.msk [vmem:[#allocation2 + $0x28] sm:$0xff] (!%p1643_p12), %vm404_vm0, %v2253_v32 }
  0x39   : > { %411 = vst.msk [vmem:[#allocation2 + $0x30] sm:$0xff] (!%p1643_p12), %vm404_vm0, %v2253_v32  ;;  %412 = vst.msk [vmem:[#allocation2 + $0x38] sm:$0xff] (!%p1643_p12), %vm404_vm0, %v2253_v32 }
  0x3a   : > { %413 = vst.msk [vmem:[#allocation2 + $0x40] sm:$0xff] (!%p1643_p12), %vm404_vm0, %v2253_v32  ;;  %414 = vst.msk [vmem:[#allocation2 + $0x48] sm:$0xff] (!%p1643_p12), %vm404_vm0, %v2253_v32 }
  0x3b   : > { %415 = vst.msk [vmem:[#allocation2 + $0x50] sm:$0xff] (!%p1643_p12), %vm404_vm0, %v2253_v32  ;;  %416 = vst.msk [vmem:[#allocation2 + $0x58] sm:$0xff] (!%p1643_p12), %vm404_vm0, %v2253_v32 }
  0x3c   : > { %417 = vst.msk [vmem:[#allocation2 + $0x60] sm:$0xff] (!%p1643_p12), %vm404_vm0, %v2253_v32  ;;  %418 = vst.msk [vmem:[#allocation2 + $0x68] sm:$0xff] (!%p1643_p12), %vm404_vm0, %v2253_v32 }
  0x3d   : > { %419 = vst.msk [vmem:[#allocation2 + $0x70] sm:$0xff] (!%p1643_p12), %vm404_vm0, %v2253_v32  ;;  %420 = vst.msk [vmem:[#allocation2 + $0x78] sm:$0xff] (!%p1643_p12), %vm404_vm0, %v2253_v32 }
  0x3e   : > { %421 = vst.msk [vmem:[#allocation2 + $0x80] sm:$0xff] %vm404_vm0, %v2253_v32  ;;  %422 = vst.msk [vmem:[#allocation2 + $0x88] sm:$0xff] %vm404_vm0, %v2253_v32 }
  0x3f   : > { %423 = vst.msk [vmem:[#allocation2 + $0x90] sm:$0xff] %vm404_vm0, %v2253_v32  ;;  %424 = vst.msk [vmem:[#allocation2 + $0x98] sm:$0xff] %vm404_vm0, %v2253_v32 }
  0x40   : > { %425 = vst.msk [vmem:[#allocation2 + $0xa0] sm:$0xff] %vm404_vm0, %v2253_v32  ;;  %426 = vst.msk [vmem:[#allocation2 + $0xa8] sm:$0xff] %vm404_vm0, %v2253_v32 }
  0x41   : > { %427 = vst.msk [vmem:[#allocation2 + $0xb0] sm:$0xff] %vm404_vm0, %v2253_v32  ;;  %428 = vst.msk [vmem:[#allocation2 + $0xb8] sm:$0xff] %vm404_vm0, %v2253_v32 }
  0x42   : > { %429 = vst.msk [vmem:[#allocation2 + $0xc0] sm:$0xff] %vm404_vm0, %v2253_v32  ;;  %430 = vst.msk [vmem:[#allocation2 + $0xc8] sm:$0xff] %vm404_vm0, %v2253_v32 }
  0x43   : > { %431 = vst.msk [vmem:[#allocation2 + $0xd0] sm:$0xff] %vm404_vm0, %v2253_v32  ;;  %432 = vst.msk [vmem:[#allocation2 + $0xd8] sm:$0xff] %vm404_vm0, %v2253_v32 }
  0x44   : > { %433 = vst.msk [vmem:[#allocation2 + $0xe0] sm:$0xff] %vm404_vm0, %v2253_v32  ;;  %434 = vst.msk [vmem:[#allocation2 + $0xe8] sm:$0xff] %vm404_vm0, %v2253_v32 }
  0x45   : > { %435 = vst.msk [vmem:[#allocation2 + $0xf0] sm:$0xff] %vm404_vm0, %v2253_v32  ;;  %436 = vst.msk [vmem:[#allocation2 + $0xf8] sm:$0xff] %vm404_vm0, %v2253_v32 }
  0x46 PF: > { %v2129_v33 = vld [vmem:[%s2415_s30 + $0x40] sm:$0xff]   ;;  %v2131_v35 = vld [vmem:[%s2415_s30 + $0x48] sm:$0xff]   ;;  %v2133_v37 = vld [vmem:[%s2415_s30 + $0x50] sm:$0xff]   ;;  %vm982_vm1 = vcmask 523264   ;;  %p1692_p13 = scmp.ne.s32.totalorder %s2235_s17, 1 }
  0x47   : > { %v2130_v34 = vld [vmem:[%s2415_s30] sm:$0xff]   ;;  %1876 = vmatprep.subr.bf16.mxu0 %v2129_v33  ;;  %2048 = vmatprep.subr.bf16.mxu1 %v2129_v33  ;;  %v2132_v36 = vld [vmem:[%s2415_s30 + $0x8] sm:$0xff]   ;;  %v2134_v38 = vld [vmem:[%s2415_s30 + $0x10] sm:$0xff]  }
  0x48   : > { %1877 = vmatpush3.bf16.msra.mxu0 %v2130_v34  ;;  %2056 = vmatpush3.bf16.msra.mxu1 %v2130_v34  ;;  %v2135_v39 = vld [vmem:[%s2415_s30 + $0x58] sm:$0xff]   ;;  %v2137_v41 = vld [vmem:[%s2415_s30 + $0x60] sm:$0xff]   ;;  %v2139_v43 = vld [vmem:[%s2415_s30 + $0x68] sm:$0xff]  }
  0x49   : > { %1878 = vmatprep.subr.bf16.mxu0 %v2131_v35  ;;  %2049 = vmatprep.subr.bf16.mxu1 %v2131_v35  ;;  %v2136_v40 = vld [vmem:[%s2415_s30 + $0x18] sm:$0xff]   ;;  %v2138_v42 = vld [vmem:[%s2415_s30 + $0x20] sm:$0xff]   ;;  %v2140_v46 = vld [vmem:[%s2415_s30 + $0x28] sm:$0xff]  }
  0x4a   : > { %v2147_v44 = vld [vmem:[%s2422_s15 + $0x4] ss:$8 sps:$4 sm:$0xff]   ;;  %v2141_v47 = vld [vmem:[%s2415_s30 + $0x70] sm:$0xff]   ;;  %v2143_v49 = vld [vmem:[%s2415_s30 + $0x78] sm:$0xff]  }
  0x4b   : > { %v2150_v45 = vld [vmem:[%s2422_s15 + $0x84] ss:$8 sps:$4 sm:$0xff]   ;;  %821 = vmatprep.mubr.bf16.mxu0 %v2147_v44  ;;  %v2142_v48 = vld [vmem:[%s2415_s30 + $0x30] sm:$0xff]   ;;  %v2144_v50 = vld [vmem:[%s2415_s30 + $0x38] sm:$0xff]  }
  0x4c   : > { %1879 = vmatpush3.bf16.msra.mxu0 %v2132_v36  ;;  %2057 = vmatpush3.bf16.msra.mxu1 %v2132_v36  ;;  %v2145_v51 = vld [vmem:[%s2422_s15] ss:$8 sps:$4 sm:$0xff]   ;;  %v2151_v53 = vld [vmem:[%s2422_s15 + $0x14] ss:$8 sps:$4 sm:$0xff]   ;;  %v2155_v55 = vld [vmem:[%s2422_s15 + $0x10] ss:$8 sps:$4 sm:$0xff]  }
  0x4d   : > { %1880 = vmatprep.subr.bf16.mxu0 %v2133_v37  ;;  %2050 = vmatprep.subr.bf16.mxu1 %v2133_v37  ;;  %v2148_v52 = vld [vmem:[%s2422_s15 + $0x80] ss:$8 sps:$4 sm:$0xff]   ;;  %v2153_v54 = vld [vmem:[%s2422_s15 + $0x94] ss:$8 sps:$4 sm:$0xff]   ;;  %v2156_v56 = vld [vmem:[%s2422_s15 + $0x90] ss:$8 sps:$4 sm:$0xff]  }
  0x4e   : > { %885 = vmatprep.mubr.bf16.mxu1 %v2150_v45  ;;  %v2157_v57 = vld [vmem:[%s2422_s15 + $0x24] ss:$8 sps:$4 sm:$0xff]   ;;  %v2161_v59 = vld [vmem:[%s2422_s15 + $0x20] ss:$8 sps:$4 sm:$0xff]   ;;  %v2163_v61 = vld [vmem:[%s2422_s15 + $0x34] ss:$8 sps:$4 sm:$0xff]  }
  0x4f   : > { %v2159_v58 = vld [vmem:[%s2422_s15 + $0xa4] ss:$8 sps:$4 sm:$0xff]   ;;  %v2162_v60 = vld [vmem:[%s2422_s15 + $0xa0] ss:$8 sps:$4 sm:$0xff]   ;;  %v2165_v62 = vld [vmem:[%s2422_s15 + $0xb4] ss:$8 sps:$4 sm:$0xff]  }
  0x50   : > { %1881 = vmatpush3.bf16.msra.mxu0 %v2134_v38  ;;  %2058 = vmatpush3.bf16.msra.mxu1 %v2134_v38  ;;  %v2167_v63 = vld [vmem:[%s2422_s15 + $0x30] ss:$8 sps:$4 sm:$0xff]   ;;  %v2169_v1 = vld [vmem:[%s2422_s15 + $0x44] ss:$8 sps:$4 sm:$0xff]   ;;  %v2173_v3 = vld [vmem:[%s2422_s15 + $0x40] ss:$8 sps:$4 sm:$0xff]  }
  0x51   : > { %1882 = vmatprep.subr.bf16.mxu0 %v2135_v39  ;;  %2051 = vmatprep.subr.bf16.mxu1 %v2135_v39  ;;  %v2168_v0 = vld [vmem:[%s2422_s15 + $0xb0] ss:$8 sps:$4 sm:$0xff]   ;;  %v2171_v2 = vld [vmem:[%s2422_s15 + $0xc4] ss:$8 sps:$4 sm:$0xff]   ;;  %v2174_v4 = vld [vmem:[%s2422_s15 + $0xc0] ss:$8 sps:$4 sm:$0xff]  }
  0x52   : > { %v2175_v5 = vld [vmem:[%s2422_s15 + $0x54] ss:$8 sps:$4 sm:$0xff]   ;;  %v2179_v7 = vld [vmem:[%s2422_s15 + $0x50] ss:$8 sps:$4 sm:$0xff]   ;;  %v2181_v9 = vld [vmem:[%s2422_s15 + $0x64] ss:$8 sps:$4 sm:$0xff]  }
  0x53   : > { %v2177_v6 = vld [vmem:[%s2422_s15 + $0xd4] ss:$8 sps:$4 sm:$0xff]   ;;  %v2180_v8 = vld [vmem:[%s2422_s15 + $0xd0] ss:$8 sps:$4 sm:$0xff]   ;;  %v2183_v10 = vld [vmem:[%s2422_s15 + $0xe4] ss:$8 sps:$4 sm:$0xff]  }
  0x54   : > { %1883 = vmatpush3.bf16.msra.mxu0 %v2136_v40  ;;  %2059 = vmatpush3.bf16.msra.mxu1 %v2136_v40  ;;  %v2185_v11 = vld [vmem:[%s2422_s15 + $0x60] ss:$8 sps:$4 sm:$0xff]   ;;  %v2187_v13 = vld [vmem:[%s2422_s15 + $0x74] ss:$8 sps:$4 sm:$0xff]   ;;  %v2191_v15 = vld [vmem:[%s2422_s15 + $0x70] ss:$8 sps:$4 sm:$0xff]  }
  0x55   : > { %1884 = vmatprep.subr.bf16.mxu0 %v2137_v41  ;;  %2052 = vmatprep.subr.bf16.mxu1 %v2137_v41  ;;  %v2186_v12 = vld [vmem:[%s2422_s15 + $0xe0] ss:$8 sps:$4 sm:$0xff]   ;;  %v2189_v14 = vld [vmem:[%s2422_s15 + $0xf4] ss:$8 sps:$4 sm:$0xff]   ;;  %v2192_v16 = vld [vmem:[%s2422_s15 + $0xf0] ss:$8 sps:$4 sm:$0xff]  }
  0x56   : > { %v437_v19 = vld [vmem:[#allocation2] sm:$0xff]  ;;  %v438_v27 = vld [vmem:[#allocation2 + $0x8] sm:$0xff]  ;;  %v439_v39 = vld [vmem:[#allocation2 + $0x10] sm:$0xff] }
  0x57   : > { %v453_v21 = vld [vmem:[#allocation2 + $0x80] sm:$0xff]  ;;  %v454_v29 = vld [vmem:[#allocation2 + $0x88] sm:$0xff]  ;;  %v455_v41 = vld [vmem:[#allocation2 + $0x90] sm:$0xff] }
  0x58   : > { %1885 = vmatpush3.bf16.msra.mxu0 %v2138_v42  ;;  %2060 = vmatpush3.bf16.msra.mxu1 %v2138_v42 }
  0x59   : > { %1886 = vmatprep.subr.bf16.mxu0 %v2139_v43  ;;  %2053 = vmatprep.subr.bf16.mxu1 %v2139_v43 }
  0x5c   : > { %1887 = vmatpush3.bf16.msra.mxu0 %v2140_v46  ;;  %2061 = vmatpush3.bf16.msra.mxu1 %v2140_v46 }
  0x5d   : > { %1888 = vmatprep.subr.bf16.mxu0 %v2141_v47  ;;  %2054 = vmatprep.subr.bf16.mxu1 %v2141_v47  ;;  %v440_v47 = vld [vmem:[#allocation2 + $0x18] sm:$0xff] }
  0x60   : > { %1889 = vmatpush3.bf16.msra.mxu0 %v2142_v48  ;;  %2062 = vmatpush3.bf16.msra.mxu1 %v2142_v48 }
  0x61   : > { %1890 = vmatprep.subr.bf16.mxu0 %v2143_v49  ;;  %2055 = vmatprep.subr.bf16.mxu1 %v2143_v49  ;;  %v456_v49 = vld [vmem:[#allocation2 + $0x98] sm:$0xff] }
  0x64   : > { %1891 = vmatpush3.bf16.msra.mxu0 %v2144_v50  ;;  %2063 = vmatpush3.bf16.msra.mxu1 %v2144_v50 }
  0x67   : > { %822 = vmatmul.mubr.bf16.vlgmr.msra.gmra.mrb[0].mxu0 %v2145_v51  ;;  %886 = vmatmul.mubr.bf16.vlgmr.msra.gmra.mrb[0].mxu1 %v2148_v52 }
  0x68   : > { %829 = vmatprep.mubr.bf16.mxu0 %v2151_v53  ;;  %893 = vmatprep.mubr.bf16.mxu1 %v2153_v54 }
  0x6f   : > { %830 = vmatmul.mubr.bf16.gmra.mrb[4].mxu0 %v2155_v55  ;;  %894 = vmatmul.mubr.bf16.gmra.mrb[4].mxu1 %v2156_v56 }
  0x70   : > { %837 = vmatprep.mubr.bf16.mxu0 %v2157_v57  ;;  %901 = vmatprep.mubr.bf16.mxu1 %v2159_v58 }
  0x77   : > { %838 = vmatmul.mubr.bf16.gmra.mrb[8].mxu0 %v2161_v59  ;;  %902 = vmatmul.mubr.bf16.gmra.mrb[8].mxu1 %v2162_v60  ;;  %v441_v59 = vld [vmem:[#allocation2 + $0x20] sm:$0xff] }
  0x78   : > { %845 = vmatprep.mubr.bf16.mxu0 %v2163_v61  ;;  %909 = vmatprep.mubr.bf16.mxu1 %v2165_v62  ;;  %v457_v61 = vld [vmem:[#allocation2 + $0xa0] sm:$0xff] }
  0x7f   : > { %846 = vmatmul.mubr.bf16.gmra.mrb[12].mxu0 %v2167_v63  ;;  %910 = vmatmul.mubr.bf16.gmra.mrb[12].mxu1 %v2168_v0 }
  0x80   : > { %853 = vmatprep.mubr.bf16.mxu0 %v2169_v1  ;;  %917 = vmatprep.mubr.bf16.mxu1 %v2171_v2 }
  0x87   : > { %854 = vmatmul.mubr.bf16.gmra.mrb[16].mxu0 %v2173_v3  ;;  %918 = vmatmul.mubr.bf16.gmra.mrb[16].mxu1 %v2174_v4  ;;  %v442_v3 = vld [vmem:[#allocation2 + $0x28] sm:$0xff] }
  0x88   : > { %861 = vmatprep.mubr.bf16.mxu0 %v2175_v5  ;;  %925 = vmatprep.mubr.bf16.mxu1 %v2177_v6  ;;  %v458_v5 = vld [vmem:[#allocation2 + $0xa8] sm:$0xff] }
  0x8f   : > { %862 = vmatmul.mubr.bf16.gmra.mrb[20].mxu0 %v2179_v7  ;;  %926 = vmatmul.mubr.bf16.gmra.mrb[20].mxu1 %v2180_v8 }
  0x90   : > { %869 = vmatprep.mubr.bf16.mxu0 %v2181_v9  ;;  %933 = vmatprep.mubr.bf16.mxu1 %v2183_v10 }
  0x97   : > { %870 = vmatmul.mubr.bf16.gmra.mrb[24].mxu0 %v2185_v11  ;;  %934 = vmatmul.mubr.bf16.gmra.mrb[24].mxu1 %v2186_v12 }
  0x98   : > { %877 = vmatprep.mubr.bf16.mxu0 %v2187_v13  ;;  %941 = vmatprep.mubr.bf16.mxu1 %v2189_v14 }
  0x9f   : > { %878 = vmatmul.mubr.bf16.gmra.mrb[28].mxu0 %v2191_v15  ;;  %942 = vmatmul.mubr.bf16.gmra.mrb[28].mxu1 %v2192_v16  ;;  %v443_v15 = vld [vmem:[#allocation2 + $0x30] sm:$0xff] }
 0x13a   : > { %v1892_v17 = vpop.f32.mrb[0].mxu0  ;;  %v1940_v18 = vpop.f32.mrb[0].mxu1 }
 0x13b   : > { %v1893_v20 = vpop.f32.mrb[1].mxu0  ;;  %v1941_v22 = vpop.f32.mrb[1].mxu1 }
 0x13c   : > { %v1894_v23 = vadd.f32 %v1893_v20, %v1892_v17  ;;  %v1942_v24 = vadd.f32 %v1941_v22, %v1940_v18  ;;  %v1895_v25 = vpop.f32.mrb[2].mxu0  ;;  %v1943_v26 = vpop.f32.mrb[2].mxu1  ;;  %v459_v17 = vld [vmem:[#allocation2 + $0xb0] sm:$0xff] }
 0x13d   : > { %v1896_v28 = vpop.f32.mrb[3].mxu0  ;;  %v1944_v30 = vpop.f32.mrb[3].mxu1 }
 0x13e   : > { %v950_v31 = vadd.f32 %v1894_v23, %v437_v19  ;;  %v966_v32 = vadd.f32 %v1942_v24, %v453_v21  ;;  %v1897_v33 = vadd.f32 %v1896_v28, %v1895_v25  ;;  %v1945_v34 = vadd.f32 %v1944_v30, %v1943_v26  ;;  %v444_v23 = vld [vmem:[#allocation2 + $0x38] sm:$0xff] }
 0x13f   : > { %v460_v25 = vld [vmem:[#allocation2 + $0xb8] sm:$0xff] }
 0x140   : > { %983 = vst.msk [vmem:[#allocation2] sm:$0xff] %vm982_vm1, %v950_v31  ;;  %999 = vst.msk [vmem:[#allocation2 + $0x80] sm:$0xff] %vm982_vm1, %v966_v32  ;;  %v951_v35 = vadd.f32 %v1897_v33, %v438_v27  ;;  %v967_v36 = vadd.f32 %v1945_v34, %v454_v29 }
 0x142   : > { %984 = vst.msk [vmem:[#allocation2 + $0x8] sm:$0xff] %vm982_vm1, %v951_v35  ;;  %1000 = vst.msk [vmem:[#allocation2 + $0x88] sm:$0xff] %vm982_vm1, %v967_v36  ;;  %v1898_v37 = vpop.f32.mrb[4].mxu0  ;;  %v1946_v38 = vpop.f32.mrb[4].mxu1  ;;  %v445_v35 = vld [vmem:[#allocation2 + $0x40] sm:$0xff] }
 0x143   : > { %v1899_v40 = vpop.f32.mrb[5].mxu0  ;;  %v1947_v42 = vpop.f32.mrb[5].mxu1 }
 0x144   : > { %v1900_v43 = vadd.f32 %v1899_v40, %v1898_v37  ;;  %v1948_v44 = vadd.f32 %v1947_v42, %v1946_v38  ;;  %v1901_v45 = vpop.f32.mrb[6].mxu0  ;;  %v1949_v46 = vpop.f32.mrb[6].mxu1  ;;  %v461_v37 = vld [vmem:[#allocation2 + $0xc0] sm:$0xff] }
 0x145   : > { %v1902_v48 = vpop.f32.mrb[7].mxu0  ;;  %v1950_v50 = vpop.f32.mrb[7].mxu1 }
 0x146   : > { %v952_v51 = vadd.f32 %v1900_v43, %v439_v39  ;;  %v968_v52 = vadd.f32 %v1948_v44, %v455_v41  ;;  %v1903_v53 = vadd.f32 %v1902_v48, %v1901_v45  ;;  %v1951_v54 = vadd.f32 %v1950_v50, %v1949_v46  ;;  %v446_v43 = vld [vmem:[#allocation2 + $0x48] sm:$0xff] }
 0x147   : > { %v462_v45 = vld [vmem:[#allocation2 + $0xc8] sm:$0xff] }
 0x148   : > { %985 = vst.msk [vmem:[#allocation2 + $0x10] sm:$0xff] %vm982_vm1, %v952_v51  ;;  %1001 = vst.msk [vmem:[#allocation2 + $0x90] sm:$0xff] %vm982_vm1, %v968_v52  ;;  %v953_v55 = vadd.f32 %v1903_v53, %v440_v47  ;;  %v969_v56 = vadd.f32 %v1951_v54, %v456_v49 }
 0x14a   : > { %986 = vst.msk [vmem:[#allocation2 + $0x18] sm:$0xff] %vm982_vm1, %v953_v55  ;;  %1002 = vst.msk [vmem:[#allocation2 + $0x98] sm:$0xff] %vm982_vm1, %v969_v56  ;;  %v1904_v57 = vpop.f32.mrb[8].mxu0  ;;  %v1952_v58 = vpop.f32.mrb[8].mxu1  ;;  %v447_v55 = vld [vmem:[#allocation2 + $0x50] sm:$0xff] }
 0x14b   : > { %v1905_v60 = vpop.f32.mrb[9].mxu0  ;;  %v1953_v62 = vpop.f32.mrb[9].mxu1 }
 0x14c   : > { %v1906_v63 = vadd.f32 %v1905_v60, %v1904_v57  ;;  %v1954_v0 = vadd.f32 %v1953_v62, %v1952_v58  ;;  %v1907_v1 = vpop.f32.mrb[10].mxu0  ;;  %v1955_v2 = vpop.f32.mrb[10].mxu1  ;;  %v463_v57 = vld [vmem:[#allocation2 + $0xd0] sm:$0xff] }
 0x14d   : > { %v1908_v4 = vpop.f32.mrb[11].mxu0  ;;  %v1956_v6 = vpop.f32.mrb[11].mxu1 }
 0x14e   : > { %v954_v7 = vadd.f32 %v1906_v63, %v441_v59  ;;  %v970_v8 = vadd.f32 %v1954_v0, %v457_v61  ;;  %v1909_v9 = vadd.f32 %v1908_v4, %v1907_v1  ;;  %v1957_v10 = vadd.f32 %v1956_v6, %v1955_v2  ;;  %v448_v63 = vld [vmem:[#allocation2 + $0x58] sm:$0xff] }
 0x14f   : > { %v464_v1 = vld [vmem:[#allocation2 + $0xd8] sm:$0xff] }
 0x150   : > { %987 = vst.msk [vmem:[#allocation2 + $0x20] sm:$0xff] %vm982_vm1, %v954_v7  ;;  %1003 = vst.msk [vmem:[#allocation2 + $0xa0] sm:$0xff] %vm982_vm1, %v970_v8  ;;  %v955_v11 = vadd.f32 %v1909_v9, %v442_v3  ;;  %v971_v12 = vadd.f32 %v1957_v10, %v458_v5 }
 0x152   : > { %988 = vst.msk [vmem:[#allocation2 + $0x28] sm:$0xff] %vm982_vm1, %v955_v11  ;;  %1004 = vst.msk [vmem:[#allocation2 + $0xa8] sm:$0xff] %vm982_vm1, %v971_v12  ;;  %v1910_v13 = vpop.f32.mrb[12].mxu0  ;;  %v1958_v14 = vpop.f32.mrb[12].mxu1  ;;  %v449_v11 = vld [vmem:[#allocation2 + $0x60] sm:$0xff] }
 0x153   : > { %v1911_v16 = vpop.f32.mrb[13].mxu0  ;;  %v1959_v18 = vpop.f32.mrb[13].mxu1 }
 0x154   : > { %v1912_v19 = vadd.f32 %v1911_v16, %v1910_v13  ;;  %v1960_v20 = vadd.f32 %v1959_v18, %v1958_v14  ;;  %v1913_v21 = vpop.f32.mrb[14].mxu0  ;;  %v1961_v22 = vpop.f32.mrb[14].mxu1  ;;  %v465_v13 = vld [vmem:[#allocation2 + $0xe0] sm:$0xff] }
 0x155   : > { %v1914_v24 = vpop.f32.mrb[15].mxu0  ;;  %v1962_v26 = vpop.f32.mrb[15].mxu1 }
 0x156   : > { %v956_v27 = vadd.f32 %v1912_v19, %v443_v15  ;;  %v972_v28 = vadd.f32 %v1960_v20, %v459_v17  ;;  %v1915_v29 = vadd.f32 %v1914_v24, %v1913_v21  ;;  %v1963_v30 = vadd.f32 %v1962_v26, %v1961_v22  ;;  %v450_v19 = vld [vmem:[#allocation2 + $0x68] sm:$0xff] }
 0x157   : > { %v466_v21 = vld [vmem:[#allocation2 + $0xe8] sm:$0xff] }
 0x158   : > { %989 = vst.msk [vmem:[#allocation2 + $0x30] sm:$0xff] %vm982_vm1, %v956_v27  ;;  %1005 = vst.msk [vmem:[#allocation2 + $0xb0] sm:$0xff] %vm982_vm1, %v972_v28  ;;  %v957_v31 = vadd.f32 %v1915_v29, %v444_v23  ;;  %v973_v32 = vadd.f32 %v1963_v30, %v460_v25 }
 0x15a   : > { %990 = vst.msk [vmem:[#allocation2 + $0x38] sm:$0xff] %vm982_vm1, %v957_v31  ;;  %1006 = vst.msk [vmem:[#allocation2 + $0xb8] sm:$0xff] %vm982_vm1, %v973_v32  ;;  %v1916_v33 = vpop.f32.mrb[16].mxu0  ;;  %v1964_v34 = vpop.f32.mrb[16].mxu1  ;;  %v451_v31 = vld [vmem:[#allocation2 + $0x70] sm:$0xff] }
 0x15b   : > { %v1917_v36 = vpop.f32.mrb[17].mxu0  ;;  %v1965_v38 = vpop.f32.mrb[17].mxu1 }
 0x15c   : > { %v1918_v39 = vadd.f32 %v1917_v36, %v1916_v33  ;;  %v1966_v40 = vadd.f32 %v1965_v38, %v1964_v34  ;;  %v1919_v41 = vpop.f32.mrb[18].mxu0  ;;  %v1967_v42 = vpop.f32.mrb[18].mxu1  ;;  %v467_v33 = vld [vmem:[#allocation2 + $0xf0] sm:$0xff] }
 0x15d   : > { %v1920_v44 = vpop.f32.mrb[19].mxu0  ;;  %v1968_v46 = vpop.f32.mrb[19].mxu1 }
 0x15e   : > { %v958_v47 = vadd.f32 %v1918_v39, %v445_v35  ;;  %v974_v48 = vadd.f32 %v1966_v40, %v461_v37  ;;  %v1921_v49 = vadd.f32 %v1920_v44, %v1919_v41  ;;  %v1969_v50 = vadd.f32 %v1968_v46, %v1967_v42  ;;  %v452_v39 = vld [vmem:[#allocation2 + $0x78] sm:$0xff] }
 0x15f   : > { %v468_v41 = vld [vmem:[#allocation2 + $0xf8] sm:$0xff] }
 0x160   : > { %991 = vst.msk [vmem:[#allocation2 + $0x40] sm:$0xff] %vm982_vm1, %v958_v47  ;;  %1007 = vst.msk [vmem:[#allocation2 + $0xc0] sm:$0xff] %vm982_vm1, %v974_v48  ;;  %v959_v51 = vadd.f32 %v1921_v49, %v446_v43  ;;  %v975_v52 = vadd.f32 %v1969_v50, %v462_v45  ;;  %v2193_v49 = vld [vmem:[%s2643_s3] sm:$0xff] (!%p1692_p13)   ;;  %v2194_v50 = vld [vmem:[%s2643_s3 + $0x8] sm:$0xff] (!%p1692_p13)  }
 0x161   : > { %2008 = vmatprep.subr.bf16.mxu0 (!%p1692_p13), %v2193_v49  ;;  %2064 = vmatprep.subr.bf16.mxu1 (!%p1692_p13), %v2193_v49 }
 0x162   : > { %992 = vst.msk [vmem:[#allocation2 + $0x48] sm:$0xff] %vm982_vm1, %v959_v51  ;;  %1008 = vst.msk [vmem:[#allocation2 + $0xc8] sm:$0xff] %vm982_vm1, %v975_v52  ;;  %v1922_v53 = vpop.f32.mrb[20].mxu0  ;;  %v1970_v54 = vpop.f32.mrb[20].mxu1  ;;  %2009 = vmatpush3.bf16.msra.mxu0 (!%p1692_p13), %v2193_v49  ;;  %2068 = vmatpush3.bf16.msra.mxu1 (!%p1692_p13), %v2193_v49  ;;  %v2195_v51 = vld [vmem:[%s2643_s3 + $0x10] sm:$0xff] (!%p1692_p13)   ;;  %v1019_v52 = vld [vmem:[#allocation2] sm:$0xff] (!%p1692_p13) }
 0x163   : > { %v1923_v56 = vpop.f32.mrb[21].mxu0  ;;  %v1971_v58 = vpop.f32.mrb[21].mxu1  ;;  %2010 = vmatprep.subr.bf16.mxu0 (!%p1692_p13), %v2194_v50  ;;  %2065 = vmatprep.subr.bf16.mxu1 (!%p1692_p13), %v2194_v50 }
 0x164   : > { %v1924_v59 = vadd.f32 %v1923_v56, %v1922_v53  ;;  %v1972_v60 = vadd.f32 %v1971_v58, %v1970_v54  ;;  %v1925_v61 = vpop.f32.mrb[22].mxu0  ;;  %v1973_v62 = vpop.f32.mrb[22].mxu1  ;;  %v1020_v53 = vld [vmem:[#allocation2 + $0x8] sm:$0xff] (!%p1692_p13)  ;;  %v2550_v54 = vld [vmem:[%s2642_s2] ss:$0 sm:$0xff] (!%p1692_p13) }
 0x165   : > { %v1926_v0 = vpop.f32.mrb[23].mxu0  ;;  %v1974_v2 = vpop.f32.mrb[23].mxu1  ;;  %v1059_v56 = vadd.f32 (!%p1692_p13), %v2550_v54, %v1020_v53  ;;  %v1036_v58 = vld [vmem:[#allocation2 + $0x88] sm:$0xff] (!%p1692_p13) }
 0x166   : > { %v960_v3 = vadd.f32 %v1924_v59, %v447_v55  ;;  %v976_v4 = vadd.f32 %v1972_v60, %v463_v57  ;;  %v1927_v5 = vadd.f32 %v1926_v0, %v1925_v61  ;;  %v1975_v6 = vadd.f32 %v1974_v2, %v1973_v62  ;;  %v1035_v57 = vld [vmem:[#allocation2 + $0x80] sm:$0xff] (!%p1692_p13)  ;;  %v1021_v59 = vld [vmem:[#allocation2 + $0x10] sm:$0xff] (!%p1692_p13)  ;;  %v1022_v62 = vld [vmem:[#allocation2 + $0x18] sm:$0xff] (!%p1692_p13)  ;;  %2011 = vmatpush3.bf16.msra.mxu0 (!%p1692_p13), %v2194_v50 }
 0x167   : > { %v1058_v55 = vadd.f32 (!%p1692_p13), %v2550_v54, %v1019_v52  ;;  %v1074_v60 = vadd.f32 (!%p1692_p13), %v2550_v54, %v1035_v57  ;;  %v1075_v61 = vadd.f32 (!%p1692_p13), %v2550_v54, %v1036_v58  ;;  %v1037_v0 = vld [vmem:[#allocation2 + $0x90] sm:$0xff] (!%p1692_p13)  ;;  %2069 = vmatpush3.bf16.msra.mxu1 (!%p1692_p13), %v2194_v50  ;;  %2012 = vmatprep.subr.bf16.mxu0 (!%p1692_p13), %v2195_v51 }
 0x168   : > { %993 = vst.msk [vmem:[#allocation2 + $0x50] sm:$0xff] %vm982_vm1, %v960_v3  ;;  %1009 = vst.msk [vmem:[#allocation2 + $0xd0] sm:$0xff] %vm982_vm1, %v976_v4  ;;  %v961_v7 = vadd.f32 %v1927_v5, %v448_v63  ;;  %v977_v8 = vadd.f32 %v1975_v6, %v464_v1  ;;  %v1060_v63 = vadd.f32 (!%p1692_p13), %v2550_v54, %v1021_v59  ;;  %v1038_v1 = vld [vmem:[#allocation2 + $0x98] sm:$0xff] (!%p1692_p13)  ;;  %v1091_v3 = vmax.f32 (!%p1692_p13), %v1059_v56, 0.0  ;;  %v1023_v6 = vld [vmem:[#allocation2 + $0x20] sm:$0xff] (!%p1692_p13) }
 0x169   : > { %v1090_v2 = vmax.f32 (!%p1692_p13), %v1058_v55, 0.0  ;;  %v1061_v4 = vadd.f32 (!%p1692_p13), %v2550_v54, %v1022_v62  ;;  %v1076_v5 = vadd.f32 (!%p1692_p13), %v2550_v54, %v1037_v0  ;;  %2066 = vmatprep.subr.bf16.mxu1 (!%p1692_p13), %v2195_v51 }
 0x16a   : > { %994 = vst.msk [vmem:[#allocation2 + $0x58] sm:$0xff] %vm982_vm1, %v961_v7  ;;  %1010 = vst.msk [vmem:[#allocation2 + $0xd8] sm:$0xff] %vm982_vm1, %v977_v8  ;;  %v1928_v9 = vpop.f32.mrb[24].mxu0  ;;  %v1976_v10 = vpop.f32.mrb[24].mxu1  ;;  %v1024_v7 = vld [vmem:[#allocation2 + $0x28] sm:$0xff] (!%p1692_p13)  ;;  %v1039_v8 = vld [vmem:[#allocation2 + $0xa0] sm:$0xff] (!%p1692_p13)  ;;  %2013 = vmatpush3.bf16.msra.mxu0 (!%p1692_p13), %v2195_v51 }
 0x16b   : > { %v1929_v12 = vpop.f32.mrb[25].mxu0  ;;  %v1977_v14 = vpop.f32.mrb[25].mxu1  ;;  %2070 = vmatpush3.bf16.msra.mxu1 (!%p1692_p13), %v2195_v51 }
 0x16c   : > { %v1930_v15 = vadd.f32 %v1929_v12, %v1928_v9  ;;  %v1978_v16 = vadd.f32 %v1977_v14, %v1976_v10  ;;  %v1931_v17 = vpop.f32.mrb[26].mxu0  ;;  %v1979_v18 = vpop.f32.mrb[26].mxu1  ;;  %v2196_v9 = vld [vmem:[%s2643_s3 + $0x18] sm:$0xff] (!%p1692_p13)   ;;  %v1106_v10 = vmax.f32 (!%p1692_p13), %v1074_v60, 0.0  ;;  %v1092_v12 = vmax.f32 (!%p1692_p13), %v1060_v63, 0.0  ;;  %v1040_v14 = vld [vmem:[#allocation2 + $0xa8] sm:$0xff] (!%p1692_p13) }
 0x16d   : > { %v1932_v20 = vpop.f32.mrb[27].mxu0  ;;  %v1980_v22 = vpop.f32.mrb[27].mxu1  ;;  %2014 = vmatprep.subr.bf16.mxu0 (!%p1692_p13), %v2196_v9  ;;  %2067 = vmatprep.subr.bf16.mxu1 (!%p1692_p13), %v2196_v9 }
 0x16e   : > { %v962_v23 = vadd.f32 %v1930_v15, %v449_v11  ;;  %v978_v24 = vadd.f32 %v1978_v16, %v465_v13  ;;  %v1933_v25 = vadd.f32 %v1932_v20, %v1931_v17  ;;  %v1981_v26 = vadd.f32 %v1980_v22, %v1979_v18  ;;  %2015 = vmatpush3.bf16.msra.mxu0 (!%p1692_p13), %v2196_v9 }
 0x16f   : > { %v1107_v11 = vmax.f32 (!%p1692_p13), %v1075_v61, 0.0  ;;  %v1077_v13 = vadd.f32 (!%p1692_p13), %v2550_v54, %v1038_v1  ;;  %v1122_v15 = vpack.c.bf16 (!%p1692_p13), %v1091_v3, %v1090_v2  ;;  %v1093_v16 = vmax.f32 (!%p1692_p13), %v1061_v4, 0.0  ;;  %2071 = vmatpush3.bf16.msra.mxu1 (!%p1692_p13), %v2196_v9  ;;  %v1029_v50 = vld [vmem:[#allocation2 + $0x50] sm:$0xff] (!%p1692_p13) }
 0x170   : > { %995 = vst.msk [vmem:[#allocation2 + $0x60] sm:$0xff] %vm982_vm1, %v962_v23  ;;  %1011 = vst.msk [vmem:[#allocation2 + $0xe0] sm:$0xff] %vm982_vm1, %v978_v24  ;;  %v963_v27 = vadd.f32 %v1933_v25, %v450_v19  ;;  %v979_v28 = vadd.f32 %v1981_v26, %v466_v21  ;;  %v1108_v17 = vmax.f32 (!%p1692_p13), %v1076_v5, 0.0  ;;  %v1062_v18 = vadd.f32 (!%p1692_p13), %v2550_v54, %v1023_v6  ;;  %v1025_v23 = vld [vmem:[#allocation2 + $0x30] sm:$0xff] (!%p1692_p13)  ;;  %v1026_v24 = vld [vmem:[#allocation2 + $0x38] sm:$0xff] (!%p1692_p13) }
 0x171   : > { %v1130_v19 = vpack.c.bf16 (!%p1692_p13), %v1107_v11, %v1106_v10  ;;  %v1109_v20 = vmax.f32 (!%p1692_p13), %v1077_v13, 0.0  ;;  %v1063_v21 = vadd.f32 (!%p1692_p13), %v2550_v54, %v1024_v7  ;;  %v1078_v22 = vadd.f32 (!%p1692_p13), %v2550_v54, %v1039_v8  ;;  %v1041_v25 = vld [vmem:[#allocation2 + $0xb0] sm:$0xff] (!%p1692_p13)  ;;  %2016 = vmatprep.mubr.msk.bf16.mxu0 (!%p1692_p13), %vm982_vm1, %v1122_v15  ;;  %v1030_v51 = vld [vmem:[#allocation2 + $0x58] sm:$0xff] (!%p1692_p13) }
 0x172   : > { %996 = vst.msk [vmem:[#allocation2 + $0x68] sm:$0xff] %vm982_vm1, %v963_v27  ;;  %1012 = vst.msk [vmem:[#allocation2 + $0xe8] sm:$0xff] %vm982_vm1, %v979_v28  ;;  %v1934_v29 = vpop.f32.mrb[28].mxu0  ;;  %v1982_v30 = vpop.f32.mrb[28].mxu1  ;;  %v1094_v26 = vmax.f32 (!%p1692_p13), %v1062_v18, 0.0  ;;  %v1079_v27 = vadd.f32 (!%p1692_p13), %v2550_v54, %v1040_v14  ;;  %v1042_v28 = vld [vmem:[#allocation2 + $0xb8] sm:$0xff] (!%p1692_p13)  ;;  %v1068_v1 = vadd.f32 (!%p1692_p13), %v2550_v54, %v1029_v50  ;;  %v1069_v2 = vadd.f32 (!%p1692_p13), %v2550_v54, %v1030_v51 }
 0x173   : > { %v1935_v32 = vpop.f32.mrb[29].mxu0  ;;  %v1983_v34 = vpop.f32.mrb[29].mxu1  ;;  %2032 = vmatprep.mubr.msk.bf16.mxu1 (!%p1692_p13), %vm982_vm1, %v1130_v19  ;;  %v1045_v57 = vld [vmem:[#allocation2 + $0xd0] sm:$0xff] (!%p1692_p13)  ;;  %v1046_v58 = vld [vmem:[#allocation2 + $0xd8] sm:$0xff] (!%p1692_p13) }
 0x174   : > { %v1936_v35 = vadd.f32 %v1935_v32, %v1934_v29  ;;  %v1984_v36 = vadd.f32 %v1983_v34, %v1982_v30  ;;  %v1937_v37 = vpop.f32.mrb[30].mxu0  ;;  %v1985_v38 = vpop.f32.mrb[30].mxu1  ;;  %1018 = sbr.rel (%p1692_p13) target bundleno = 621 (0x26d), region = 82  ;;  %v1027_v29 = vld [vmem:[#allocation2 + $0x40] sm:$0xff] (!%p1692_p13)  ;;  %v1028_v30 = vld [vmem:[#allocation2 + $0x48] sm:$0xff] (!%p1692_p13)  ;;  %v1095_v32 = vmax.f32 (!%p1692_p13), %v1063_v21, 0.0  ;;  %v1084_v3 = vadd.f32 (!%p1692_p13), %v2550_v54, %v1045_v57 }
 0x175   : > { %v1938_v40 = vpop.f32.mrb[31].mxu0  ;;  %v1986_v42 = vpop.f32.mrb[31].mxu1  ;;  %v1043_v34 = vld [vmem:[#allocation2 + $0xc0] sm:$0xff] (!%p1692_p13)  ;;  %v1085_v4 = vadd.f32 (!%p1692_p13), %v2550_v54, %v1046_v58  ;;  %v1100_v13 = vmax.f32 (!%p1692_p13), %v1068_v1, 0.0  ;;  %v1101_v14 = vmax.f32 (!%p1692_p13), %v1069_v2, 0.0 }
 0x176   : > { %v964_v43 = vadd.f32 %v1936_v35, %v451_v31  ;;  %v980_v44 = vadd.f32 %v1984_v36, %v467_v33  ;;  %v1939_v45 = vadd.f32 %v1938_v40, %v1937_v37  ;;  %v1987_v46 = vadd.f32 %v1986_v42, %v1985_v38 }
 0x177   : > { %v1123_v31 = vpack.c.bf16 (!%p1692_p13), %v1093_v16, %v1092_v12  ;;  %v1110_v33 = vmax.f32 (!%p1692_p13), %v1078_v22, 0.0  ;;  %v1131_v35 = vpack.c.bf16 (!%p1692_p13), %v1109_v20, %v1108_v17  ;;  %v1111_v36 = vmax.f32 (!%p1692_p13), %v1079_v27, 0.0  ;;  %v1031_v61 = vld [vmem:[#allocation2 + $0x60] sm:$0xff] (!%p1692_p13) }
 0x178   : > { %997 = vst.msk [vmem:[#allocation2 + $0x70] sm:$0xff] %vm982_vm1, %v964_v43  ;;  %1013 = vst.msk [vmem:[#allocation2 + $0xf0] sm:$0xff] %vm982_vm1, %v980_v44  ;;  %v965_v47 = vadd.f32 %v1939_v45, %v452_v39  ;;  %v981_v48 = vadd.f32 %v1987_v46, %v468_v41  ;;  %v1064_v37 = vadd.f32 (!%p1692_p13), %v2550_v54, %v1025_v23  ;;  %v1044_v39 = vld [vmem:[#allocation2 + $0xc8] sm:$0xff] (!%p1692_p13)  ;;  %v1047_v63 = vld [vmem:[#allocation2 + $0xe0] sm:$0xff] (!%p1692_p13)  ;;  %v1116_v15 = vmax.f32 (!%p1692_p13), %v1084_v3, 0.0 }
 0x179   : > { %v1065_v38 = vadd.f32 (!%p1692_p13), %v2550_v54, %v1026_v24  ;;  %v1080_v40 = vadd.f32 (!%p1692_p13), %v2550_v54, %v1041_v25  ;;  %v1081_v41 = vadd.f32 (!%p1692_p13), %v2550_v54, %v1042_v28  ;;  %v1066_v42 = vadd.f32 (!%p1692_p13), %v2550_v54, %v1027_v29  ;;  %2017 = vmatmul.mubr.msk.bf16.vlgmr.msra.gmra.mrb[0].mxu0 (!%p1692_p13), %vm982_vm1, %v1123_v31  ;;  %v1032_v62 = vld [vmem:[#allocation2 + $0x68] sm:$0xff] (!%p1692_p13) }
 0x17a   : > { %998 = vst.msk [vmem:[#allocation2 + $0x78] sm:$0xff] %vm982_vm1, %v965_v47  ;;  %1014 = vst.msk [vmem:[#allocation2 + $0xf8] sm:$0xff] %vm982_vm1, %v981_v48  ;;  %v1067_v43 = vadd.f32 (!%p1692_p13), %v2550_v54, %v1028_v30  ;;  %v1124_v44 = vpack.c.bf16 (!%p1692_p13), %v1095_v32, %v1094_v26  ;;  %v1132_v45 = vpack.c.bf16 (!%p1692_p13), %v1111_v36, %v1110_v33  ;;  %v1096_v48 = vmax.f32 (!%p1692_p13), %v1064_v37, 0.0  ;;  %v1048_v0 = vld [vmem:[#allocation2 + $0xe8] sm:$0xff] (!%p1692_p13) }
 0x17b   : > { %v1082_v46 = vadd.f32 %v2550_v54, %v1043_v34  ;;  %v1083_v47 = vadd.f32 %v2550_v54, %v1044_v39  ;;  %v1097_v49 = vmax.f32 %v1065_v38, 0.0  ;;  %2033 = vmatmul.mubr.msk.bf16.vlgmr.msra.gmra.mrb[0].mxu1 %vm982_vm1, %v1131_v35  ;;  %v1112_v52 = vmax.f32 %v1080_v40, 0.0 }
 0x17c   : > { %v1113_v53 = vmax.f32 %v1081_v41, 0.0  ;;  %v1098_v55 = vmax.f32 %v1066_v42, 0.0  ;;  %v1099_v56 = vmax.f32 %v1067_v43, 0.0  ;;  %2020 = vmatprep.mubr.msk.bf16.mxu0 %vm982_vm1, %v1124_v44  ;;  %2036 = vmatprep.mubr.msk.bf16.mxu1 %vm982_vm1, %v1132_v45  ;;  %v1070_v8 = vadd.f32 %v2550_v54, %v1031_v61 }
 0x17d   : > { %v1114_v59 = vmax.f32 %v1082_v46, 0.0  ;;  %v1115_v60 = vmax.f32 %v1083_v47, 0.0  ;;  %v1125_v5 = vpack.c.bf16 %v1097_v49, %v1096_v48  ;;  %v1071_v10 = vadd.f32 %v2550_v54, %v1032_v62 }
 0x17e   : > { %v1133_v6 = vpack.c.bf16 %v1113_v53, %v1112_v52  ;;  %v1126_v7 = vpack.c.bf16 %v1099_v56, %v1098_v55  ;;  %v1086_v11 = vadd.f32 %v2550_v54, %v1047_v63  ;;  %v1087_v12 = vadd.f32 %v2550_v54, %v1048_v0 }
 0x17f   : > { %v1134_v9 = vpack.c.bf16 %v1115_v60, %v1114_v59  ;;  %v1117_v16 = vmax.f32 %v1085_v4, 0.0  ;;  %v1033_v17 = vld [vmem:[#allocation2 + $0x70] sm:$0xff]  ;;  %v1102_v19 = vmax.f32 %v1070_v8, 0.0  ;;  %v1103_v20 = vmax.f32 %v1071_v10, 0.0 }
 0x180   : > { %v1118_v21 = vmax.f32 %v1086_v11, 0.0  ;;  %v1119_v22 = vmax.f32 %v1087_v12, 0.0  ;;  %v1049_v23 = vld [vmem:[#allocation2 + $0xf0] sm:$0xff]  ;;  %v1127_v25 = vpack.c.bf16 %v1101_v14, %v1100_v13  ;;  %v1072_v27 = vadd.f32 %v2550_v54, %v1033_v17 }
 0x181   : > { %2021 = vmatmul.mubr.msk.bf16.gmra.mrb[4].mxu0 %vm982_vm1, %v1125_v5  ;;  %v1034_v18 = vld [vmem:[#allocation2 + $0x78] sm:$0xff]  ;;  %v1135_v26 = vpack.c.bf16 %v1117_v16, %v1116_v15  ;;  %v1088_v29 = vadd.f32 %v2550_v54, %v1049_v23  ;;  %v1128_v31 = vpack.c.bf16 %v1103_v20, %v1102_v19 }
 0x182   : > { %2024 = vmatprep.mubr.msk.bf16.mxu0 %vm982_vm1, %v1126_v7  ;;  %v1050_v24 = vld [vmem:[#allocation2 + $0xf8] sm:$0xff]  ;;  %v1073_v28 = vadd.f32 %v2550_v54, %v1034_v18  ;;  %v1136_v32 = vpack.c.bf16 %v1119_v22, %v1118_v21  ;;  %v1104_v33 = vmax.f32 %v1072_v27, 0.0 }
 0x183   : > { %2037 = vmatmul.mubr.msk.bf16.gmra.mrb[4].mxu1 %vm982_vm1, %v1133_v6  ;;  %v1089_v30 = vadd.f32 %v2550_v54, %v1050_v24  ;;  %v1120_v35 = vmax.f32 %v1088_v29, 0.0 }
 0x184   : > { %2040 = vmatprep.mubr.msk.bf16.mxu1 %vm982_vm1, %v1134_v9  ;;  %v1105_v34 = vmax.f32 %v1073_v28, 0.0 }
 0x185   : > { %v1121_v36 = vmax.f32 %v1089_v30, 0.0 }
 0x186   : > { %v1129_v37 = vpack.c.bf16 %v1105_v34, %v1104_v33 }
 0x187   : > { %v1137_v38 = vpack.c.bf16 %v1121_v36, %v1120_v35 }
 0x189   : > { %2025 = vmatmul.mubr.msk.bf16.gmra.mrb[8].mxu0 %vm982_vm1, %v1127_v25 }
 0x18a   : > { %2028 = vmatprep.mubr.msk.bf16.mxu0 %vm982_vm1, %v1128_v31 }
 0x18b   : > { %2041 = vmatmul.mubr.msk.bf16.gmra.mrb[8].mxu1 %vm982_vm1, %v1135_v26 }
 0x18c   : > { %2044 = vmatprep.mubr.msk.bf16.mxu1 %vm982_vm1, %v1136_v32 }
 0x191   : > { %2029 = vmatmul.mubr.msk.bf16.gmra.mrb[12].mxu0 %vm982_vm1, %v1129_v37 }
 0x193   : > { %2045 = vmatmul.mubr.msk.bf16.gmra.mrb[12].mxu1 %vm982_vm1, %v1137_v38 }
 0x24c   : > { %v2018_v54 = vpop.f32.mrb[0].mxu0 }
 0x24d   : > { %v1252_v40 = vpop.f32.mrb[1].mxu0 }
 0x24e   : > { %v2034_v39 = vpop.f32.mrb[0].mxu1  ;;  %v2019_v42 = vpop.f32.mrb[2].mxu0 }
 0x24f   : > { %v1316_v41 = vpop.f32.mrb[1].mxu1  ;;  %v1789_v44 = vpack.c.bf16 %v2019_v42, %v2018_v54  ;;  %v1255_v46 = vpop.f32.mrb[3].mxu0 }
 0x250   : > { %v2035_v43 = vpop.f32.mrb[2].mxu1  ;;  %v1784_v48 = vpack.c.bf16 %v1255_v46, %v1252_v40 }
 0x251   : > { %v1829_v45 = vpack.c.bf16 %v2035_v43, %v2034_v39  ;;  %v1319_v47 = vpop.f32.mrb[3].mxu1  ;;  %1861 = vst [vmem:[%s2420_s8 + $0x8] sm:$0xff] %v1789_v44  }
 0x252   : > { %v1824_v49 = vpack.c.bf16 %v1319_v47, %v1316_v41  ;;  %1785 = vst [vmem:[%s2420_s8] sm:$0xff] %v1784_v48  }
 0x253   : > { %1869 = vst [vmem:[%s2420_s8 + $0x48] sm:$0xff] %v1829_v45  }
 0x254   : > { %1868 = vst [vmem:[%s2420_s8 + $0x40] sm:$0xff] %v1824_v49   ;;  %v2022_v50 = vpop.f32.mrb[4].mxu0 }
 0x255   : > { %v1268_v52 = vpop.f32.mrb[5].mxu0 }
 0x256   : > { %v2038_v51 = vpop.f32.mrb[4].mxu1  ;;  %v2023_v55 = vpop.f32.mrb[6].mxu0 }
 0x257   : > { %v1332_v53 = vpop.f32.mrb[5].mxu1  ;;  %v1799_v57 = vpack.c.bf16 %v2023_v55, %v2022_v50  ;;  %v1271_v59 = vpop.f32.mrb[7].mxu0 }
 0x258   : > { %v2039_v56 = vpop.f32.mrb[6].mxu1  ;;  %v1794_v61 = vpack.c.bf16 %v1271_v59, %v1268_v52 }
 0x259   : > { %v1839_v58 = vpack.c.bf16 %v2039_v56, %v2038_v51  ;;  %v1335_v60 = vpop.f32.mrb[7].mxu1  ;;  %1863 = vst [vmem:[%s2420_s8 + $0x18] sm:$0xff] %v1799_v57  }
 0x25a   : > { %v1834_v62 = vpack.c.bf16 %v1335_v60, %v1332_v53  ;;  %1862 = vst [vmem:[%s2420_s8 + $0x10] sm:$0xff] %v1794_v61  }
 0x25b   : > { %1871 = vst [vmem:[%s2420_s8 + $0x58] sm:$0xff] %v1839_v58  }
 0x25c   : > { %1870 = vst [vmem:[%s2420_s8 + $0x50] sm:$0xff] %v1834_v62   ;;  %v2026_v63 = vpop.f32.mrb[8].mxu0 }
 0x25d   : > { %v1284_v1 = vpop.f32.mrb[9].mxu0 }
 0x25e   : > { %v2042_v0 = vpop.f32.mrb[8].mxu1  ;;  %v2027_v3 = vpop.f32.mrb[10].mxu0 }
 0x25f   : > { %v1348_v2 = vpop.f32.mrb[9].mxu1  ;;  %v1809_v5 = vpack.c.bf16 %v2027_v3, %v2026_v63  ;;  %v1287_v7 = vpop.f32.mrb[11].mxu0 }
 0x260   : > { %v2043_v4 = vpop.f32.mrb[10].mxu1  ;;  %v1804_v9 = vpack.c.bf16 %v1287_v7, %v1284_v1 }
 0x261   : > { %v1849_v6 = vpack.c.bf16 %v2043_v4, %v2042_v0  ;;  %v1351_v8 = vpop.f32.mrb[11].mxu1  ;;  %1865 = vst [vmem:[%s2420_s8 + $0x28] sm:$0xff] %v1809_v5  }
 0x262   : > { %v1844_v10 = vpack.c.bf16 %v1351_v8, %v1348_v2  ;;  %1864 = vst [vmem:[%s2420_s8 + $0x20] sm:$0xff] %v1804_v9  }
 0x263   : > { %1873 = vst [vmem:[%s2420_s8 + $0x68] sm:$0xff] %v1849_v6  }
 0x264   : > { %1872 = vst [vmem:[%s2420_s8 + $0x60] sm:$0xff] %v1844_v10   ;;  %v2030_v11 = vpop.f32.mrb[12].mxu0 }
 0x265   : > { %v1300_v13 = vpop.f32.mrb[13].mxu0 }
 0x266   : > { %v2046_v12 = vpop.f32.mrb[12].mxu1  ;;  %v2031_v15 = vpop.f32.mrb[14].mxu0 }
 0x267   : > { %v1364_v14 = vpop.f32.mrb[13].mxu1  ;;  %v1819_v17 = vpack.c.bf16 %v2031_v15, %v2030_v11  ;;  %v1303_v19 = vpop.f32.mrb[15].mxu0 }
 0x268   : > { %v2047_v16 = vpop.f32.mrb[14].mxu1  ;;  %v1814_v21 = vpack.c.bf16 %v1303_v19, %v1300_v13 }
 0x269   : > { %v1859_v18 = vpack.c.bf16 %v2047_v16, %v2046_v12  ;;  %v1367_v20 = vpop.f32.mrb[15].mxu1  ;;  %1867 = vst [vmem:[%s2420_s8 + $0x38] sm:$0xff] %v1819_v17  }
 0x26a   : > { %v1854_v22 = vpack.c.bf16 %v1367_v20, %v1364_v14  ;;  %1866 = vst [vmem:[%s2420_s8 + $0x30] sm:$0xff] %v1814_v21  }
 0x26b   : > { %1875 = vst [vmem:[%s2420_s8 + $0x78] sm:$0xff] %v1859_v18  }
 0x26c   : > { %1874 = vst [vmem:[%s2420_s8 + $0x70] sm:$0xff] %v1854_v22  }
 0x26d PF: > { %s14_s21 = sadd.s32 1, %s2251_s21   ;;  %s2645_s15 = smov %s2231_s16 }
 0x26e   : > { %p11_p0 = scmp.ge.s32.totalorder %s14_s21, 6   ;;  %s2646_s16 = smov %s2330_s28 }
 0x26f   : > { %s2647_s17 = smov %s2243_s19  ;;  %s2648_s18 = smov %s2247_s20 }
 0x270   : > { %s2649_s19 = smov %s2652_s22  ;;  %s2650_s20 = smov %s2656_s23 }
 0x271   :  { %13 = sbr.rel (!%p11_p0) target bundleno = 4 (0x4), region = 120 }

</bundles_post_ra>
